<compile_context>
chip_gen: v7x
topology: tpu7x:2x2x1
jax: 0.10.0
libtpu: 0.0.40
codegen_flags: <defaults>
</compile_context>

<pallas_src>
import functools
import jax
import jax.numpy as jnp
from jax.experimental import pallas as pl
from jax.experimental.pallas import tpu as pltpu


# ----------------------------- Pallas kernel ------------------------------- #
def make_gpt_lstm_kernel(num_layers, T, B, H, V):
    def kernel(*refs):
        # ---- inputs ----
        len_ref = refs[0]            # SMEM (B,) int32 sequence lengths
        emb_ref = refs[1]            # VMEM (T*B, V) token+pos embeddings, row r = t*B + b
        p = 2
        layer_refs = []
        for _ in range(num_layers):
            # (4, in, H) w_ih per gate, (4, H, H) w_hh per gate, (4, 1, H) bias per gate
            layer_refs.append((refs[p], refs[p + 1], refs[p + 2]))
            p += 3
        w_out_ref = refs[p]          # (H, V)
        b_out_ref = refs[p + 1]      # (1, V)
        p += 2
        # ---- outputs ----
        logits_ref = refs[p]         # (T*B, V)
        hn_ref = refs[p + 1]         # (L, B, H)
        cn_ref = refs[p + 2]         # (L, B, H)
        # ---- scratch ----
        y_scr = refs[p + 3]          # (T*B, H) inter-layer activations / head input

        # Per-batch length column (B, 1), built once from SMEM scalars (B is small).
        b_idx = jax.lax.broadcasted_iota(jnp.int32, (B, 1), 0)
        len_col = jnp.zeros((B, 1), jnp.int32)
        for b in range(B):
            len_col = jnp.where(b_idx == b, len_ref[b], len_col)

        x_all = emb_ref[...]                               # (T*B, V) layer-0 input slab

        for l, (w_ih_ref, w_hh_ref, b_ref) in enumerate(layer_refs):
            last = (l == num_layers - 1)

            # Batched input->hidden projection for ALL timesteps at once, per gate
            # (bias folded in here, hoisted out of the serial loop).
            gx = [jnp.dot(x_all, w_ih_ref[g], preferred_element_type=jnp.float32)
                  + b_ref[g]
                  for g in range(4)]                       # 4 x (T*B, H)
            # Hoisted recurrent weights (loaded once per layer).
            whh = [w_hh_ref[g] for g in range(4)]          # 4 x (H, H)

            h = jnp.zeros((B, H), jnp.float32)
            c = jnp.zeros((B, H), jnp.float32)

            # Fully unrolled serial recurrence (T static & small).
            for t in range(T):
                r0, r1 = t * B, (t + 1) * B
                i_g = jax.nn.sigmoid(
                    gx[0][r0:r1] + jnp.dot(h, whh[0], preferred_element_type=jnp.float32))
                f_g = jax.nn.sigmoid(
                    gx[1][r0:r1] + jnp.dot(h, whh[1], preferred_element_type=jnp.float32))
                g_g = jnp.tanh(
                    gx[2][r0:r1] + jnp.dot(h, whh[2], preferred_element_type=jnp.float32))
                o_g = jax.nn.sigmoid(
                    gx[3][r0:r1] + jnp.dot(h, whh[3], preferred_element_type=jnp.float32))
                c_new = f_g * c + i_g * g_g
                h_new = o_g * jnp.tanh(c_new)

                m_t = len_col > t                          # (B, 1) bool: t < length[b]
                # packed-sequence semantics: state only advances on valid steps
                h = jnp.where(m_t, h_new, h)
                c = jnp.where(m_t, c_new, c)

                if last:
                    # pad_packed_sequence zeros padded positions before the head
                    y_scr[r0:r1, :] = jnp.where(m_t, h, 0.0)
                else:
                    y_scr[r0:r1, :] = h                    # next layer's input

            hn_ref[l] = h
            cn_ref[l] = c
            if not last:
                x_all = y_scr[...]                         # (T*B, H) next-layer slab

        # Single batched head matmul + one contiguous slab store.
        logits_ref[...] = (jnp.dot(y_scr[...], w_out_ref[...],
                                   preferred_element_type=jnp.float32)
                           + b_out_ref[...])

    return kernel


# ------------------------------ JAX wrapper -------------------------------- #
def gpt_forward(tokens, lengths, params, *, num_layers, hidden):
    B, T = tokens.shape
    V = params["emb_table"].shape[0]
    H = hidden

    # glue: embedding gather + positional embedding (dropout = identity)
    emb = jnp.take(params["emb_table"], tokens, axis=0) + params["pos_emb"][:, :T, :]  # (B,T,V)
    emb_2d = jnp.transpose(emb, (1, 0, 2)).reshape(T * B, V).astype(jnp.float32)       # row = t*B+b

    lengths_i32 = lengths.astype(jnp.int32)

    # pre-split weights per gate (PyTorch order i, f, g, o along the 4H axis)
    flat_w = []
    for l in range(num_layers):
        in_dim = V if l == 0 else H
        w_ih = params[f"w_ih{l}"].reshape(in_dim, 4, H).transpose(1, 0, 2)  # (4, in, H)
        w_hh = params[f"w_hh{l}"].reshape(H, 4, H).transpose(1, 0, 2)       # (4, H, H)
        b = params[f"b{l}"].reshape(4, 1, H)                                # (4, 1, H)
        flat_w += [w_ih, w_hh, b]
    flat_w += [params["w_out"], params["b_out"]]

    kernel = make_gpt_lstm_kernel(num_layers, T, B, H, V)
    vmem = pl.BlockSpec(memory_space=pltpu.MemorySpace.VMEM)
    smem = pl.BlockSpec(memory_space=pltpu.MemorySpace.SMEM)

    logits_2d, hn, cn = pl.pallas_call(
        kernel,
        out_shape=(
            jax.ShapeDtypeStruct((T * B, V), jnp.float32),
            jax.ShapeDtypeStruct((num_layers, B, H), jnp.float32),
            jax.ShapeDtypeStruct((num_layers, B, H), jnp.float32),
        ),
        in_specs=[smem, vmem] + [vmem] * len(flat_w),
        out_specs=(vmem, vmem, vmem),
        scratch_shapes=[pltpu.VMEM((T * B, H), jnp.float32)],
    )(lengths_i32, emb_2d, *flat_w)

    logits = logits_2d.reshape(T, B, V).transpose(1, 0, 2)   # (B, T, V), batch_first
    return logits, lengths, (hn, cn)


# -------------------------- pure-JAX reference ------------------------------ #
def ref_forward(tokens, lengths, params, *, num_layers, hidden):
    B, T = tokens.shape
    H = hidden
    emb = jnp.take(params["emb_table"], tokens, axis=0) + params["pos_emb"][:, :T, :]
    mask = (jnp.arange(T)[None, :] < lengths[:, None]).astype(jnp.float32)  # (B, T)
    h = [jnp.zeros((B, H), jnp.float32) for _ in range(num_layers)]
    c = [jnp.zeros((B, H), jnp.float32) for _ in range(num_layers)]
    ys = []
    for t in range(T):
        x_in = emb[:, t, :]
        m = mask[:, t][:, None]
        for l in range(num_layers):
            gates = x_in @ params[f"w_ih{l}"] + h[l] @ params[f"w_hh{l}"] + params[f"b{l}"]
            i_g = jax.nn.sigmoid(gates[:, :H])
            f_g = jax.nn.sigmoid(gates[:, H:2 * H])
            g_g = jnp.tanh(gates[:, 2 * H:3 * H])
            o_g = jax.nn.sigmoid(gates[:, 3 * H:])
            c_new = f_g * c[l] + i_g * g_g
            h_new = o_g * jnp.tanh(c_new)
            h[l] = m * h_new + (1.0 - m) * h[l]
            c[l] = m * c_new + (1.0 - m) * c[l]
            x_in = h[l]
        ys.append((x_in * m) @ params["w_out"] + params["b_out"])
    logits = jnp.stack(ys, axis=1)
    return logits, jnp.stack(h), jnp.stack(c)


# ------------------------------ param init --------------------------------- #
def init_params(key, vocab_size, hidden, num_layers, block_size, pad_idx):
    V, H = vocab_size, hidden
    keys = jax.random.split(key, 4 + 4 * num_layers)
    params = {}
    # Embedding ~ N(0,1), padding row zeroed (padding_idx)
    emb = jax.random.normal(keys[0], (V, V), jnp.float32)
    params["emb_table"] = emb.at[pad_idx].set(0.0)
    # pos_emb initialized to zeros (as in the PyTorch module)
    params["pos_emb"] = jnp.zeros((1, block_size, V), jnp.float32)
    k = 1.0 / jnp.sqrt(H)
    for l in range(num_layers):
        in_dim = V if l == 0 else H
        params[f"w_ih{l}"] = jax.random.uniform(keys[1 + 4 * l], (in_dim, 4 * H), jnp.float32, -k, k)
        params[f"w_hh{l}"] = jax.random.uniform(keys[2 + 4 * l], (H, 4 * H), jnp.float32, -k, k)
        b_ih = jax.random.uniform(keys[3 + 4 * l], (1, 4 * H), jnp.float32, -k, k)
        b_hh = jax.random.uniform(keys[4 + 4 * l], (1, 4 * H), jnp.float32, -k, k)
        params[f"b{l}"] = b_ih + b_hh            # combined bias (PyTorch adds both)
    params["w_out"] = jax.random.uniform(keys[-2], (H, V), jnp.float32, -k, k)
    params["b_out"] = jax.random.uniform(keys[-1], (1, V), jnp.float32, -k, k)
    return params


# --------------------------------- main ------------------------------------ #
if __name__ == "__main__":
    VOCAB = 16        # len(vocabulary)  (<pad>=0, <bos>=1, <eos>=2, rest tokens)
    HIDDEN = 32       # config.hidden
    NUM_LAYERS = 2    # config.num_layers
    BLOCK_SIZE = 16   # config.block_size
    B, T = 2, 8       # batch, sequence length (t <= block_size)
    PAD_IDX = 0

    key = jax.random.PRNGKey(0)
    k_par, k_tok = jax.random.split(key)
    params = init_params(k_par, VOCAB, HIDDEN, NUM_LAYERS, BLOCK_SIZE, PAD_IDX)

    tokens = jax.random.randint(k_tok, (B, T), 3, VOCAB, dtype=jnp.int32)
    lengths = jnp.array([T, 5], dtype=jnp.int32)   # sorted descending, max == T
    # zero out padded token positions (they would be <pad> in real data)
    valid = (jnp.arange(T)[None, :] < lengths[:, None])
    tokens = jnp.where(valid, tokens, PAD_IDX)

    fwd = jax.jit(functools.partial(gpt_forward, num_layers=NUM_LAYERS, hidden=HIDDEN))
    logits, out_lens, (hn, cn) = fwd(tokens, lengths, params)
    jax.block_until_ready(logits)
    jax.block_until_ready(hn)
    jax.block_until_ready(cn)

    # correctness check vs. plain-JAX reference of the same semantics
    ref_logits, ref_hn, ref_cn = ref_forward(
        tokens, lengths, params, num_layers=NUM_LAYERS, hidden=HIDDEN)
    assert logits.shape == (B, T, VOCAB)
    assert hn.shape == (NUM_LAYERS, B, HIDDEN) and cn.shape == (NUM_LAYERS, B, HIDDEN)
    assert jnp.allclose(logits, ref_logits, atol=1e-4, rtol=1e-4)
    assert jnp.allclose(hn, ref_hn, atol=1e-4, rtol=1e-4)
    assert jnp.allclose(cn, ref_cn, atol=1e-4, rtol=1e-4)

    print("KERNEL_OK")
</pallas_src>

<mosaic_0001>
module attributes {stable_mosaic.version = 11 : i64} {
  func.func @kernel(%arg0: memref<2xi32, #tpu.memory_space<smem>>, %arg1: memref<16x16xf32, #tpu.memory_space<vmem>>, %arg2: memref<4x16x32xf32, #tpu.memory_space<vmem>>, %arg3: memref<4x32x32xf32, #tpu.memory_space<vmem>>, %arg4: memref<4x1x32xf32, #tpu.memory_space<vmem>>, %arg5: memref<4x32x32xf32, #tpu.memory_space<vmem>>, %arg6: memref<4x32x32xf32, #tpu.memory_space<vmem>>, %arg7: memref<4x1x32xf32, #tpu.memory_space<vmem>>, %arg8: memref<32x16xf32, #tpu.memory_space<vmem>>, %arg9: memref<1x16xf32, #tpu.memory_space<vmem>>, %arg10: memref<16x16xf32, #tpu.memory_space<vmem>>, %arg11: memref<2x2x32xf32, #tpu.memory_space<vmem>>, %arg12: memref<2x2x32xf32, #tpu.memory_space<vmem>>, %arg13: memref<16x32xf32, #tpu.memory_space<vmem>>) attributes {dimension_semantics = [], scalar_prefetch = 0 : i64, scratch_operands = 1 : i64, tpu.core_type = #tpu.core_type<tc>} {
    %0 = tpu.iota {dimensions = array<i32: 0>} : vector<2x1xi32>
    %c0_i32 = arith.constant 0 : i32
    %1 = vector.broadcast %c0_i32 : i32 to vector<2x1xi32>
    %c0_i32_0 = arith.constant 0 : i32
    %2 = vector.broadcast %c0_i32_0 : i32 to vector<2x1xi32>
    %3 = arith.cmpi eq, %0, %2 : vector<2x1xi32>
    %c0 = arith.constant 0 : index
    %4 = memref.load %arg0[%c0] : memref<2xi32, #tpu.memory_space<smem>>
    %5 = vector.broadcast %4 : i32 to vector<2x1xi32>
    %6 = arith.select %3, %5, %1 : vector<2x1xi1>, vector<2x1xi32>
    %c1_i32 = arith.constant 1 : i32
    %7 = vector.broadcast %c1_i32 : i32 to vector<2x1xi32>
    %8 = arith.cmpi eq, %0, %7 : vector<2x1xi32>
    %c1 = arith.constant 1 : index
    %9 = memref.load %arg0[%c1] : memref<2xi32, #tpu.memory_space<smem>>
    %10 = vector.broadcast %9 : i32 to vector<2x1xi32>
    %11 = arith.select %8, %10, %6 : vector<2x1xi1>, vector<2x1xi32>
    %c0_1 = arith.constant 0 : index
    %c0_2 = arith.constant 0 : index
    %12 = vector.load %arg1[%c0_1, %c0_2] : memref<16x16xf32, #tpu.memory_space<vmem>>, vector<16x16xf32>
    %c0_3 = arith.constant 0 : index
    %c0_4 = arith.constant 0 : index
    %c0_5 = arith.constant 0 : index
    %13 = vector.load %arg2[%c0_3, %c0_4, %c0_5] : memref<4x16x32xf32, #tpu.memory_space<vmem>>, vector<1x16x32xf32>
    %14 = vector.shape_cast %13 : vector<1x16x32xf32> to vector<16x32xf32>
    %cst = arith.constant dense<0.000000e+00> : vector<16x32xf32>
    %15 = tpu.matmul %12, %14, %cst {dimension_numbers = #tpu.dot_dimension_numbers<[1], [0], [0], [1], [0, 0, 1, 1], [], []>} : vector<16x16xf32>, vector<16x32xf32>, vector<16x32xf32> -> vector<16x32xf32>
    %c0_6 = arith.constant 0 : index
    %c0_7 = arith.constant 0 : index
    %c0_8 = arith.constant 0 : index
    %16 = vector.load %arg4[%c0_6, %c0_7, %c0_8] : memref<4x1x32xf32, #tpu.memory_space<vmem>>, vector<1x1x32xf32>
    %17 = vector.shape_cast %16 : vector<1x1x32xf32> to vector<1x32xf32>
    %18 = vector.broadcast %17 : vector<1x32xf32> to vector<16x32xf32>
    %19 = arith.addf %15, %18 : vector<16x32xf32>
    %c1_9 = arith.constant 1 : index
    %c0_10 = arith.constant 0 : index
    %c0_11 = arith.constant 0 : index
    %20 = vector.load %arg2[%c1_9, %c0_10, %c0_11] : memref<4x16x32xf32, #tpu.memory_space<vmem>>, vector<1x16x32xf32>
    %21 = vector.shape_cast %20 : vector<1x16x32xf32> to vector<16x32xf32>
    %cst_12 = arith.constant dense<0.000000e+00> : vector<16x32xf32>
    %22 = tpu.matmul %12, %21, %cst_12 {dimension_numbers = #tpu.dot_dimension_numbers<[1], [0], [0], [1], [0, 0, 1, 1], [], []>} : vector<16x16xf32>, vector<16x32xf32>, vector<16x32xf32> -> vector<16x32xf32>
    %c1_13 = arith.constant 1 : index
    %c0_14 = arith.constant 0 : index
    %c0_15 = arith.constant 0 : index
    %23 = vector.load %arg4[%c1_13, %c0_14, %c0_15] : memref<4x1x32xf32, #tpu.memory_space<vmem>>, vector<1x1x32xf32>
    %24 = vector.shape_cast %23 : vector<1x1x32xf32> to vector<1x32xf32>
    %25 = vector.broadcast %24 : vector<1x32xf32> to vector<16x32xf32>
    %26 = arith.addf %22, %25 : vector<16x32xf32>
    %c2 = arith.constant 2 : index
    %c0_16 = arith.constant 0 : index
    %c0_17 = arith.constant 0 : index
    %27 = vector.load %arg2[%c2, %c0_16, %c0_17] : memref<4x16x32xf32, #tpu.memory_space<vmem>>, vector<1x16x32xf32>
    %28 = vector.shape_cast %27 : vector<1x16x32xf32> to vector<16x32xf32>
    %cst_18 = arith.constant dense<0.000000e+00> : vector<16x32xf32>
    %29 = tpu.matmul %12, %28, %cst_18 {dimension_numbers = #tpu.dot_dimension_numbers<[1], [0], [0], [1], [0, 0, 1, 1], [], []>} : vector<16x16xf32>, vector<16x32xf32>, vector<16x32xf32> -> vector<16x32xf32>
    %c2_19 = arith.constant 2 : index
    %c0_20 = arith.constant 0 : index
    %c0_21 = arith.constant 0 : index
    %30 = vector.load %arg4[%c2_19, %c0_20, %c0_21] : memref<4x1x32xf32, #tpu.memory_space<vmem>>, vector<1x1x32xf32>
    %31 = vector.shape_cast %30 : vector<1x1x32xf32> to vector<1x32xf32>
    %32 = vector.broadcast %31 : vector<1x32xf32> to vector<16x32xf32>
    %33 = arith.addf %29, %32 : vector<16x32xf32>
    %c3 = arith.constant 3 : index
    %c0_22 = arith.constant 0 : index
    %c0_23 = arith.constant 0 : index
    %34 = vector.load %arg2[%c3, %c0_22, %c0_23] : memref<4x16x32xf32, #tpu.memory_space<vmem>>, vector<1x16x32xf32>
    %35 = vector.shape_cast %34 : vector<1x16x32xf32> to vector<16x32xf32>
    %cst_24 = arith.constant dense<0.000000e+00> : vector<16x32xf32>
    %36 = tpu.matmul %12, %35, %cst_24 {dimension_numbers = #tpu.dot_dimension_numbers<[1], [0], [0], [1], [0, 0, 1, 1], [], []>} : vector<16x16xf32>, vector<16x32xf32>, vector<16x32xf32> -> vector<16x32xf32>
    %c3_25 = arith.constant 3 : index
    %c0_26 = arith.constant 0 : index
    %c0_27 = arith.constant 0 : index
    %37 = vector.load %arg4[%c3_25, %c0_26, %c0_27] : memref<4x1x32xf32, #tpu.memory_space<vmem>>, vector<1x1x32xf32>
    %38 = vector.shape_cast %37 : vector<1x1x32xf32> to vector<1x32xf32>
    %39 = vector.broadcast %38 : vector<1x32xf32> to vector<16x32xf32>
    %40 = arith.addf %36, %39 : vector<16x32xf32>
    %c0_28 = arith.constant 0 : index
    %c0_29 = arith.constant 0 : index
    %c0_30 = arith.constant 0 : index
    %41 = vector.load %arg3[%c0_28, %c0_29, %c0_30] : memref<4x32x32xf32, #tpu.memory_space<vmem>>, vector<1x32x32xf32>
    %42 = vector.shape_cast %41 : vector<1x32x32xf32> to vector<32x32xf32>
    %c1_31 = arith.constant 1 : index
    %c0_32 = arith.constant 0 : index
    %c0_33 = arith.constant 0 : index
    %43 = vector.load %arg3[%c1_31, %c0_32, %c0_33] : memref<4x32x32xf32, #tpu.memory_space<vmem>>, vector<1x32x32xf32>
    %44 = vector.shape_cast %43 : vector<1x32x32xf32> to vector<32x32xf32>
    %c2_34 = arith.constant 2 : index
    %c0_35 = arith.constant 0 : index
    %c0_36 = arith.constant 0 : index
    %45 = vector.load %arg3[%c2_34, %c0_35, %c0_36] : memref<4x32x32xf32, #tpu.memory_space<vmem>>, vector<1x32x32xf32>
    %46 = vector.shape_cast %45 : vector<1x32x32xf32> to vector<32x32xf32>
    %c3_37 = arith.constant 3 : index
    %c0_38 = arith.constant 0 : index
    %c0_39 = arith.constant 0 : index
    %47 = vector.load %arg3[%c3_37, %c0_38, %c0_39] : memref<4x32x32xf32, #tpu.memory_space<vmem>>, vector<1x32x32xf32>
    %48 = vector.shape_cast %47 : vector<1x32x32xf32> to vector<32x32xf32>
    %cst_40 = arith.constant 0.000000e+00 : f32
    %49 = vector.broadcast %cst_40 : f32 to vector<2x32xf32>
    %cst_41 = arith.constant 0.000000e+00 : f32
    %50 = vector.broadcast %cst_41 : f32 to vector<2x32xf32>
    %51 = vector.extract_strided_slice %19 {offsets = [0, 0], sizes = [2, 32], strides = [1, 1]} : vector<16x32xf32> to vector<2x32xf32>
    %cst_42 = arith.constant dense<0.000000e+00> : vector<2x32xf32>
    %52 = tpu.matmul %49, %42, %cst_42 {dimension_numbers = #tpu.dot_dimension_numbers<[1], [0], [0], [1], [0, 0, 1, 1], [], []>} : vector<2x32xf32>, vector<32x32xf32>, vector<2x32xf32> -> vector<2x32xf32>
    %53 = arith.addf %51, %52 : vector<2x32xf32>
    %54 = arith.negf %53 : vector<2x32xf32>
    %55 = math.exp %54 : vector<2x32xf32>
    %cst_43 = arith.constant 1.000000e+00 : f32
    %56 = vector.broadcast %cst_43 : f32 to vector<2x32xf32>
    %57 = arith.addf %56, %55 : vector<2x32xf32>
    %58 = arith.divf %56, %57 : vector<2x32xf32>
    %59 = vector.extract_strided_slice %26 {offsets = [0, 0], sizes = [2, 32], strides = [1, 1]} : vector<16x32xf32> to vector<2x32xf32>
    %cst_44 = arith.constant dense<0.000000e+00> : vector<2x32xf32>
    %60 = tpu.matmul %49, %44, %cst_44 {dimension_numbers = #tpu.dot_dimension_numbers<[1], [0], [0], [1], [0, 0, 1, 1], [], []>} : vector<2x32xf32>, vector<32x32xf32>, vector<2x32xf32> -> vector<2x32xf32>
    %61 = arith.addf %59, %60 : vector<2x32xf32>
    %62 = arith.negf %61 : vector<2x32xf32>
    %63 = math.exp %62 : vector<2x32xf32>
    %cst_45 = arith.constant 1.000000e+00 : f32
    %64 = vector.broadcast %cst_45 : f32 to vector<2x32xf32>
    %65 = arith.addf %64, %63 : vector<2x32xf32>
    %66 = arith.divf %64, %65 : vector<2x32xf32>
    %67 = vector.extract_strided_slice %33 {offsets = [0, 0], sizes = [2, 32], strides = [1, 1]} : vector<16x32xf32> to vector<2x32xf32>
    %cst_46 = arith.constant dense<0.000000e+00> : vector<2x32xf32>
    %68 = tpu.matmul %49, %46, %cst_46 {dimension_numbers = #tpu.dot_dimension_numbers<[1], [0], [0], [1], [0, 0, 1, 1], [], []>} : vector<2x32xf32>, vector<32x32xf32>, vector<2x32xf32> -> vector<2x32xf32>
    %69 = arith.addf %67, %68 : vector<2x32xf32>
    %70 = math.tanh %69 : vector<2x32xf32>
    %71 = vector.extract_strided_slice %40 {offsets = [0, 0], sizes = [2, 32], strides = [1, 1]} : vector<16x32xf32> to vector<2x32xf32>
    %cst_47 = arith.constant dense<0.000000e+00> : vector<2x32xf32>
    %72 = tpu.matmul %49, %48, %cst_47 {dimension_numbers = #tpu.dot_dimension_numbers<[1], [0], [0], [1], [0, 0, 1, 1], [], []>} : vector<2x32xf32>, vector<32x32xf32>, vector<2x32xf32> -> vector<2x32xf32>
    %73 = arith.addf %71, %72 : vector<2x32xf32>
    %74 = arith.negf %73 : vector<2x32xf32>
    %75 = math.exp %74 : vector<2x32xf32>
    %cst_48 = arith.constant 1.000000e+00 : f32
    %76 = vector.broadcast %cst_48 : f32 to vector<2x32xf32>
    %77 = arith.addf %76, %75 : vector<2x32xf32>
    %78 = arith.divf %76, %77 : vector<2x32xf32>
    %79 = arith.mulf %66, %50 : vector<2x32xf32>
    %80 = arith.mulf %58, %70 : vector<2x32xf32>
    %81 = arith.addf %79, %80 : vector<2x32xf32>
    %82 = math.tanh %81 : vector<2x32xf32>
    %83 = arith.mulf %78, %82 : vector<2x32xf32>
    %c0_i32_49 = arith.constant 0 : i32
    %84 = vector.broadcast %c0_i32_49 : i32 to vector<2x1xi32>
    %85 = arith.cmpi sgt, %11, %84 : vector<2x1xi32>
    %86 = vector.shape_cast %85 : vector<2x1xi1> to vector<2x1xi1>
    %87 = vector.broadcast %86 : vector<2x1xi1> to vector<2x32xi1>
    %88 = arith.select %87, %83, %49 : vector<2x32xi1>, vector<2x32xf32>
    %89 = vector.shape_cast %85 : vector<2x1xi1> to vector<2x1xi1>
    %90 = vector.broadcast %89 : vector<2x1xi1> to vector<2x32xi1>
    %91 = arith.select %90, %81, %50 : vector<2x32xi1>, vector<2x32xf32>
    %c0_50 = arith.constant 0 : index
    %c0_51 = arith.constant 0 : index
    %92 = vector.load %arg13[%c0_50, %c0_51] : memref<16x32xf32, #tpu.memory_space<vmem>>, vector<2x32xf32>
    tpu.vector_store %arg13[%c0_50, %c0_51], %88 {strides = array<i32>} : memref<16x32xf32, #tpu.memory_space<vmem>>, vector<2x32xf32>,
    %93 = vector.extract_strided_slice %19 {offsets = [2, 0], sizes = [2, 32], strides = [1, 1]} : vector<16x32xf32> to vector<2x32xf32>
    %cst_52 = arith.constant dense<0.000000e+00> : vector<2x32xf32>
    %94 = tpu.matmul %88, %42, %cst_52 {dimension_numbers = #tpu.dot_dimension_numbers<[1], [0], [0], [1], [0, 0, 1, 1], [], []>} : vector<2x32xf32>, vector<32x32xf32>, vector<2x32xf32> -> vector<2x32xf32>
    %95 = arith.addf %93, %94 : vector<2x32xf32>
    %96 = arith.negf %95 : vector<2x32xf32>
    %97 = math.exp %96 : vector<2x32xf32>
    %cst_53 = arith.constant 1.000000e+00 : f32
    %98 = vector.broadcast %cst_53 : f32 to vector<2x32xf32>
    %99 = arith.addf %98, %97 : vector<2x32xf32>
    %100 = arith.divf %98, %99 : vector<2x32xf32>
    %101 = vector.extract_strided_slice %26 {offsets = [2, 0], sizes = [2, 32], strides = [1, 1]} : vector<16x32xf32> to vector<2x32xf32>
    %cst_54 = arith.constant dense<0.000000e+00> : vector<2x32xf32>
    %102 = tpu.matmul %88, %44, %cst_54 {dimension_numbers = #tpu.dot_dimension_numbers<[1], [0], [0], [1], [0, 0, 1, 1], [], []>} : vector<2x32xf32>, vector<32x32xf32>, vector<2x32xf32> -> vector<2x32xf32>
    %103 = arith.addf %101, %102 : vector<2x32xf32>
    %104 = arith.negf %103 : vector<2x32xf32>
    %105 = math.exp %104 : vector<2x32xf32>
    %cst_55 = arith.constant 1.000000e+00 : f32
    %106 = vector.broadcast %cst_55 : f32 to vector<2x32xf32>
    %107 = arith.addf %106, %105 : vector<2x32xf32>
    %108 = arith.divf %106, %107 : vector<2x32xf32>
    %109 = vector.extract_strided_slice %33 {offsets = [2, 0], sizes = [2, 32], strides = [1, 1]} : vector<16x32xf32> to vector<2x32xf32>
    %cst_56 = arith.constant dense<0.000000e+00> : vector<2x32xf32>
    %110 = tpu.matmul %88, %46, %cst_56 {dimension_numbers = #tpu.dot_dimension_numbers<[1], [0], [0], [1], [0, 0, 1, 1], [], []>} : vector<2x32xf32>, vector<32x32xf32>, vector<2x32xf32> -> vector<2x32xf32>
    %111 = arith.addf %109, %110 : vector<2x32xf32>
    %112 = math.tanh %111 : vector<2x32xf32>
    %113 = vector.extract_strided_slice %40 {offsets = [2, 0], sizes = [2, 32], strides = [1, 1]} : vector<16x32xf32> to vector<2x32xf32>
    %cst_57 = arith.constant dense<0.000000e+00> : vector<2x32xf32>
    %114 = tpu.matmul %88, %48, %cst_57 {dimension_numbers = #tpu.dot_dimension_numbers<[1], [0], [0], [1], [0, 0, 1, 1], [], []>} : vector<2x32xf32>, vector<32x32xf32>, vector<2x32xf32> -> vector<2x32xf32>
    %115 = arith.addf %113, %114 : vector<2x32xf32>
    %116 = arith.negf %115 : vector<2x32xf32>
    %117 = math.exp %116 : vector<2x32xf32>
    %cst_58 = arith.constant 1.000000e+00 : f32
    %118 = vector.broadcast %cst_58 : f32 to vector<2x32xf32>
    %119 = arith.addf %118, %117 : vector<2x32xf32>
    %120 = arith.divf %118, %119 : vector<2x32xf32>
    %121 = arith.mulf %108, %91 : vector<2x32xf32>
    %122 = arith.mulf %100, %112 : vector<2x32xf32>
    %123 = arith.addf %121, %122 : vector<2x32xf32>
    %124 = math.tanh %123 : vector<2x32xf32>
    %125 = arith.mulf %120, %124 : vector<2x32xf32>
    %c1_i32_59 = arith.constant 1 : i32
    %126 = vector.broadcast %c1_i32_59 : i32 to vector<2x1xi32>
    %127 = arith.cmpi sgt, %11, %126 : vector<2x1xi32>
    %128 = vector.shape_cast %127 : vector<2x1xi1> to vector<2x1xi1>
    %129 = vector.broadcast %128 : vector<2x1xi1> to vector<2x32xi1>
    %130 = arith.select %129, %125, %88 : vector<2x32xi1>, vector<2x32xf32>
    %131 = vector.shape_cast %127 : vector<2x1xi1> to vector<2x1xi1>
    %132 = vector.broadcast %131 : vector<2x1xi1> to vector<2x32xi1>
    %133 = arith.select %132, %123, %91 : vector<2x32xi1>, vector<2x32xf32>
    %c2_60 = arith.constant 2 : index
    %c0_61 = arith.constant 0 : index
    %134 = vector.load %arg13[%c2_60, %c0_61] : memref<16x32xf32, #tpu.memory_space<vmem>>, vector<2x32xf32>
    tpu.vector_store %arg13[%c2_60, %c0_61], %130 {strides = array<i32>} : memref<16x32xf32, #tpu.memory_space<vmem>>, vector<2x32xf32>,
    %135 = vector.extract_strided_slice %19 {offsets = [4, 0], sizes = [2, 32], strides = [1, 1]} : vector<16x32xf32> to vector<2x32xf32>
    %cst_62 = arith.constant dense<0.000000e+00> : vector<2x32xf32>
    %136 = tpu.matmul %130, %42, %cst_62 {dimension_numbers = #tpu.dot_dimension_numbers<[1], [0], [0], [1], [0, 0, 1, 1], [], []>} : vector<2x32xf32>, vector<32x32xf32>, vector<2x32xf32> -> vector<2x32xf32>
    %137 = arith.addf %135, %136 : vector<2x32xf32>
    %138 = arith.negf %137 : vector<2x32xf32>
    %139 = math.exp %138 : vector<2x32xf32>
    %cst_63 = arith.constant 1.000000e+00 : f32
    %140 = vector.broadcast %cst_63 : f32 to vector<2x32xf32>
    %141 = arith.addf %140, %139 : vector<2x32xf32>
    %142 = arith.divf %140, %141 : vector<2x32xf32>
    %143 = vector.extract_strided_slice %26 {offsets = [4, 0], sizes = [2, 32], strides = [1, 1]} : vector<16x32xf32> to vector<2x32xf32>
    %cst_64 = arith.constant dense<0.000000e+00> : vector<2x32xf32>
    %144 = tpu.matmul %130, %44, %cst_64 {dimension_numbers = #tpu.dot_dimension_numbers<[1], [0], [0], [1], [0, 0, 1, 1], [], []>} : vector<2x32xf32>, vector<32x32xf32>, vector<2x32xf32> -> vector<2x32xf32>
    %145 = arith.addf %143, %144 : vector<2x32xf32>
    %146 = arith.negf %145 : vector<2x32xf32>
    %147 = math.exp %146 : vector<2x32xf32>
    %cst_65 = arith.constant 1.000000e+00 : f32
    %148 = vector.broadcast %cst_65 : f32 to vector<2x32xf32>
    %149 = arith.addf %148, %147 : vector<2x32xf32>
    %150 = arith.divf %148, %149 : vector<2x32xf32>
    %151 = vector.extract_strided_slice %33 {offsets = [4, 0], sizes = [2, 32], strides = [1, 1]} : vector<16x32xf32> to vector<2x32xf32>
    %cst_66 = arith.constant dense<0.000000e+00> : vector<2x32xf32>
    %152 = tpu.matmul %130, %46, %cst_66 {dimension_numbers = #tpu.dot_dimension_numbers<[1], [0], [0], [1], [0, 0, 1, 1], [], []>} : vector<2x32xf32>, vector<32x32xf32>, vector<2x32xf32> -> vector<2x32xf32>
    %153 = arith.addf %151, %152 : vector<2x32xf32>
    %154 = math.tanh %153 : vector<2x32xf32>
    %155 = vector.extract_strided_slice %40 {offsets = [4, 0], sizes = [2, 32], strides = [1, 1]} : vector<16x32xf32> to vector<2x32xf32>
    %cst_67 = arith.constant dense<0.000000e+00> : vector<2x32xf32>
    %156 = tpu.matmul %130, %48, %cst_67 {dimension_numbers = #tpu.dot_dimension_numbers<[1], [0], [0], [1], [0, 0, 1, 1], [], []>} : vector<2x32xf32>, vector<32x32xf32>, vector<2x32xf32> -> vector<2x32xf32>
    %157 = arith.addf %155, %156 : vector<2x32xf32>
    %158 = arith.negf %157 : vector<2x32xf32>
    %159 = math.exp %158 : vector<2x32xf32>
    %cst_68 = arith.constant 1.000000e+00 : f32
    %160 = vector.broadcast %cst_68 : f32 to vector<2x32xf32>
    %161 = arith.addf %160, %159 : vector<2x32xf32>
    %162 = arith.divf %160, %161 : vector<2x32xf32>
    %163 = arith.mulf %150, %133 : vector<2x32xf32>
    %164 = arith.mulf %142, %154 : vector<2x32xf32>
    %165 = arith.addf %163, %164 : vector<2x32xf32>
    %166 = math.tanh %165 : vector<2x32xf32>
    %167 = arith.mulf %162, %166 : vector<2x32xf32>
    %c2_i32 = arith.constant 2 : i32
    %168 = vector.broadcast %c2_i32 : i32 to vector<2x1xi32>
    %169 = arith.cmpi sgt, %11, %168 : vector<2x1xi32>
    %170 = vector.shape_cast %169 : vector<2x1xi1> to vector<2x1xi1>
    %171 = vector.broadcast %170 : vector<2x1xi1> to vector<2x32xi1>
    %172 = arith.select %171, %167, %130 : vector<2x32xi1>, vector<2x32xf32>
    %173 = vector.shape_cast %169 : vector<2x1xi1> to vector<2x1xi1>
    %174 = vector.broadcast %173 : vector<2x1xi1> to vector<2x32xi1>
    %175 = arith.select %174, %165, %133 : vector<2x32xi1>, vector<2x32xf32>
    %c4 = arith.constant 4 : index
    %c0_69 = arith.constant 0 : index
    %176 = vector.load %arg13[%c4, %c0_69] : memref<16x32xf32, #tpu.memory_space<vmem>>, vector<2x32xf32>
    tpu.vector_store %arg13[%c4, %c0_69], %172 {strides = array<i32>} : memref<16x32xf32, #tpu.memory_space<vmem>>, vector<2x32xf32>,
    %177 = vector.extract_strided_slice %19 {offsets = [6, 0], sizes = [2, 32], strides = [1, 1]} : vector<16x32xf32> to vector<2x32xf32>
    %cst_70 = arith.constant dense<0.000000e+00> : vector<2x32xf32>
    %178 = tpu.matmul %172, %42, %cst_70 {dimension_numbers = #tpu.dot_dimension_numbers<[1], [0], [0], [1], [0, 0, 1, 1], [], []>} : vector<2x32xf32>, vector<32x32xf32>, vector<2x32xf32> -> vector<2x32xf32>
    %179 = arith.addf %177, %178 : vector<2x32xf32>
    %180 = arith.negf %179 : vector<2x32xf32>
    %181 = math.exp %180 : vector<2x32xf32>
    %cst_71 = arith.constant 1.000000e+00 : f32
    %182 = vector.broadcast %cst_71 : f32 to vector<2x32xf32>
    %183 = arith.addf %182, %181 : vector<2x32xf32>
    %184 = arith.divf %182, %183 : vector<2x32xf32>
    %185 = vector.extract_strided_slice %26 {offsets = [6, 0], sizes = [2, 32], strides = [1, 1]} : vector<16x32xf32> to vector<2x32xf32>
    %cst_72 = arith.constant dense<0.000000e+00> : vector<2x32xf32>
    %186 = tpu.matmul %172, %44, %cst_72 {dimension_numbers = #tpu.dot_dimension_numbers<[1], [0], [0], [1], [0, 0, 1, 1], [], []>} : vector<2x32xf32>, vector<32x32xf32>, vector<2x32xf32> -> vector<2x32xf32>
    %187 = arith.addf %185, %186 : vector<2x32xf32>
    %188 = arith.negf %187 : vector<2x32xf32>
    %189 = math.exp %188 : vector<2x32xf32>
    %cst_73 = arith.constant 1.000000e+00 : f32
    %190 = vector.broadcast %cst_73 : f32 to vector<2x32xf32>
    %191 = arith.addf %190, %189 : vector<2x32xf32>
    %192 = arith.divf %190, %191 : vector<2x32xf32>
    %193 = vector.extract_strided_slice %33 {offsets = [6, 0], sizes = [2, 32], strides = [1, 1]} : vector<16x32xf32> to vector<2x32xf32>
    %cst_74 = arith.constant dense<0.000000e+00> : vector<2x32xf32>
    %194 = tpu.matmul %172, %46, %cst_74 {dimension_numbers = #tpu.dot_dimension_numbers<[1], [0], [0], [1], [0, 0, 1, 1], [], []>} : vector<2x32xf32>, vector<32x32xf32>, vector<2x32xf32> -> vector<2x32xf32>
    %195 = arith.addf %193, %194 : vector<2x32xf32>
    %196 = math.tanh %195 : vector<2x32xf32>
    %197 = vector.extract_strided_slice %40 {offsets = [6, 0], sizes = [2, 32], strides = [1, 1]} : vector<16x32xf32> to vector<2x32xf32>
    %cst_75 = arith.constant dense<0.000000e+00> : vector<2x32xf32>
    %198 = tpu.matmul %172, %48, %cst_75 {dimension_numbers = #tpu.dot_dimension_numbers<[1], [0], [0], [1], [0, 0, 1, 1], [], []>} : vector<2x32xf32>, vector<32x32xf32>, vector<2x32xf32> -> vector<2x32xf32>
    %199 = arith.addf %197, %198 : vector<2x32xf32>
    %200 = arith.negf %199 : vector<2x32xf32>
    %201 = math.exp %200 : vector<2x32xf32>
    %cst_76 = arith.constant 1.000000e+00 : f32
    %202 = vector.broadcast %cst_76 : f32 to vector<2x32xf32>
    %203 = arith.addf %202, %201 : vector<2x32xf32>
    %204 = arith.divf %202, %203 : vector<2x32xf32>
    %205 = arith.mulf %192, %175 : vector<2x32xf32>
    %206 = arith.mulf %184, %196 : vector<2x32xf32>
    %207 = arith.addf %205, %206 : vector<2x32xf32>
    %208 = math.tanh %207 : vector<2x32xf32>
    %209 = arith.mulf %204, %208 : vector<2x32xf32>
    %c3_i32 = arith.constant 3 : i32
    %210 = vector.broadcast %c3_i32 : i32 to vector<2x1xi32>
    %211 = arith.cmpi sgt, %11, %210 : vector<2x1xi32>
    %212 = vector.shape_cast %211 : vector<2x1xi1> to vector<2x1xi1>
    %213 = vector.broadcast %212 : vector<2x1xi1> to vector<2x32xi1>
    %214 = arith.select %213, %209, %172 : vector<2x32xi1>, vector<2x32xf32>
    %215 = vector.shape_cast %211 : vector<2x1xi1> to vector<2x1xi1>
    %216 = vector.broadcast %215 : vector<2x1xi1> to vector<2x32xi1>
    %217 = arith.select %216, %207, %175 : vector<2x32xi1>, vector<2x32xf32>
    %c6 = arith.constant 6 : index
    %c0_77 = arith.constant 0 : index
    %218 = vector.load %arg13[%c6, %c0_77] : memref<16x32xf32, #tpu.memory_space<vmem>>, vector<2x32xf32>
    tpu.vector_store %arg13[%c6, %c0_77], %214 {strides = array<i32>} : memref<16x32xf32, #tpu.memory_space<vmem>>, vector<2x32xf32>,
    %219 = vector.extract_strided_slice %19 {offsets = [8, 0], sizes = [2, 32], strides = [1, 1]} : vector<16x32xf32> to vector<2x32xf32>
    %cst_78 = arith.constant dense<0.000000e+00> : vector<2x32xf32>
    %220 = tpu.matmul %214, %42, %cst_78 {dimension_numbers = #tpu.dot_dimension_numbers<[1], [0], [0], [1], [0, 0, 1, 1], [], []>} : vector<2x32xf32>, vector<32x32xf32>, vector<2x32xf32> -> vector<2x32xf32>
    %221 = arith.addf %219, %220 : vector<2x32xf32>
    %222 = arith.negf %221 : vector<2x32xf32>
    %223 = math.exp %222 : vector<2x32xf32>
    %cst_79 = arith.constant 1.000000e+00 : f32
    %224 = vector.broadcast %cst_79 : f32 to vector<2x32xf32>
    %225 = arith.addf %224, %223 : vector<2x32xf32>
    %226 = arith.divf %224, %225 : vector<2x32xf32>
    %227 = vector.extract_strided_slice %26 {offsets = [8, 0], sizes = [2, 32], strides = [1, 1]} : vector<16x32xf32> to vector<2x32xf32>
    %cst_80 = arith.constant dense<0.000000e+00> : vector<2x32xf32>
    %228 = tpu.matmul %214, %44, %cst_80 {dimension_numbers = #tpu.dot_dimension_numbers<[1], [0], [0], [1], [0, 0, 1, 1], [], []>} : vector<2x32xf32>, vector<32x32xf32>, vector<2x32xf32> -> vector<2x32xf32>
    %229 = arith.addf %227, %228 : vector<2x32xf32>
    %230 = arith.negf %229 : vector<2x32xf32>
    %231 = math.exp %230 : vector<2x32xf32>
    %cst_81 = arith.constant 1.000000e+00 : f32
    %232 = vector.broadcast %cst_81 : f32 to vector<2x32xf32>
    %233 = arith.addf %232, %231 : vector<2x32xf32>
    %234 = arith.divf %232, %233 : vector<2x32xf32>
    %235 = vector.extract_strided_slice %33 {offsets = [8, 0], sizes = [2, 32], strides = [1, 1]} : vector<16x32xf32> to vector<2x32xf32>
    %cst_82 = arith.constant dense<0.000000e+00> : vector<2x32xf32>
    %236 = tpu.matmul %214, %46, %cst_82 {dimension_numbers = #tpu.dot_dimension_numbers<[1], [0], [0], [1], [0, 0, 1, 1], [], []>} : vector<2x32xf32>, vector<32x32xf32>, vector<2x32xf32> -> vector<2x32xf32>
    %237 = arith.addf %235, %236 : vector<2x32xf32>
    %238 = math.tanh %237 : vector<2x32xf32>
    %239 = vector.extract_strided_slice %40 {offsets = [8, 0], sizes = [2, 32], strides = [1, 1]} : vector<16x32xf32> to vector<2x32xf32>
    %cst_83 = arith.constant dense<0.000000e+00> : vector<2x32xf32>
    %240 = tpu.matmul %214, %48, %cst_83 {dimension_numbers = #tpu.dot_dimension_numbers<[1], [0], [0], [1], [0, 0, 1, 1], [], []>} : vector<2x32xf32>, vector<32x32xf32>, vector<2x32xf32> -> vector<2x32xf32>
    %241 = arith.addf %239, %240 : vector<2x32xf32>
    %242 = arith.negf %241 : vector<2x32xf32>
    %243 = math.exp %242 : vector<2x32xf32>
    %cst_84 = arith.constant 1.000000e+00 : f32
    %244 = vector.broadcast %cst_84 : f32 to vector<2x32xf32>
    %245 = arith.addf %244, %243 : vector<2x32xf32>
    %246 = arith.divf %244, %245 : vector<2x32xf32>
    %247 = arith.mulf %234, %217 : vector<2x32xf32>
    %248 = arith.mulf %226, %238 : vector<2x32xf32>
    %249 = arith.addf %247, %248 : vector<2x32xf32>
    %250 = math.tanh %249 : vector<2x32xf32>
    %251 = arith.mulf %246, %250 : vector<2x32xf32>
    %c4_i32 = arith.constant 4 : i32
    %252 = vector.broadcast %c4_i32 : i32 to vector<2x1xi32>
    %253 = arith.cmpi sgt, %11, %252 : vector<2x1xi32>
    %254 = vector.shape_cast %253 : vector<2x1xi1> to vector<2x1xi1>
    %255 = vector.broadcast %254 : vector<2x1xi1> to vector<2x32xi1>
    %256 = arith.select %255, %251, %214 : vector<2x32xi1>, vector<2x32xf32>
    %257 = vector.shape_cast %253 : vector<2x1xi1> to vector<2x1xi1>
    %258 = vector.broadcast %257 : vector<2x1xi1> to vector<2x32xi1>
    %259 = arith.select %258, %249, %217 : vector<2x32xi1>, vector<2x32xf32>
    %c8 = arith.constant 8 : index
    %c0_85 = arith.constant 0 : index
    %260 = vector.load %arg13[%c8, %c0_85] : memref<16x32xf32, #tpu.memory_space<vmem>>, vector<2x32xf32>
    tpu.vector_store %arg13[%c8, %c0_85], %256 {strides = array<i32>} : memref<16x32xf32, #tpu.memory_space<vmem>>, vector<2x32xf32>,
    %261 = vector.extract_strided_slice %19 {offsets = [10, 0], sizes = [2, 32], strides = [1, 1]} : vector<16x32xf32> to vector<2x32xf32>
    %cst_86 = arith.constant dense<0.000000e+00> : vector<2x32xf32>
    %262 = tpu.matmul %256, %42, %cst_86 {dimension_numbers = #tpu.dot_dimension_numbers<[1], [0], [0], [1], [0, 0, 1, 1], [], []>} : vector<2x32xf32>, vector<32x32xf32>, vector<2x32xf32> -> vector<2x32xf32>
    %263 = arith.addf %261, %262 : vector<2x32xf32>
    %264 = arith.negf %263 : vector<2x32xf32>
    %265 = math.exp %264 : vector<2x32xf32>
    %cst_87 = arith.constant 1.000000e+00 : f32
    %266 = vector.broadcast %cst_87 : f32 to vector<2x32xf32>
    %267 = arith.addf %266, %265 : vector<2x32xf32>
    %268 = arith.divf %266, %267 : vector<2x32xf32>
    %269 = vector.extract_strided_slice %26 {offsets = [10, 0], sizes = [2, 32], strides = [1, 1]} : vector<16x32xf32> to vector<2x32xf32>
    %cst_88 = arith.constant dense<0.000000e+00> : vector<2x32xf32>
    %270 = tpu.matmul %256, %44, %cst_88 {dimension_numbers = #tpu.dot_dimension_numbers<[1], [0], [0], [1], [0, 0, 1, 1], [], []>} : vector<2x32xf32>, vector<32x32xf32>, vector<2x32xf32> -> vector<2x32xf32>
    %271 = arith.addf %269, %270 : vector<2x32xf32>
    %272 = arith.negf %271 : vector<2x32xf32>
    %273 = math.exp %272 : vector<2x32xf32>
    %cst_89 = arith.constant 1.000000e+00 : f32
    %274 = vector.broadcast %cst_89 : f32 to vector<2x32xf32>
    %275 = arith.addf %274, %273 : vector<2x32xf32>
    %276 = arith.divf %274, %275 : vector<2x32xf32>
    %277 = vector.extract_strided_slice %33 {offsets = [10, 0], sizes = [2, 32], strides = [1, 1]} : vector<16x32xf32> to vector<2x32xf32>
    %cst_90 = arith.constant dense<0.000000e+00> : vector<2x32xf32>
    %278 = tpu.matmul %256, %46, %cst_90 {dimension_numbers = #tpu.dot_dimension_numbers<[1], [0], [0], [1], [0, 0, 1, 1], [], []>} : vector<2x32xf32>, vector<32x32xf32>, vector<2x32xf32> -> vector<2x32xf32>
    %279 = arith.addf %277, %278 : vector<2x32xf32>
    %280 = math.tanh %279 : vector<2x32xf32>
    %281 = vector.extract_strided_slice %40 {offsets = [10, 0], sizes = [2, 32], strides = [1, 1]} : vector<16x32xf32> to vector<2x32xf32>
    %cst_91 = arith.constant dense<0.000000e+00> : vector<2x32xf32>
    %282 = tpu.matmul %256, %48, %cst_91 {dimension_numbers = #tpu.dot_dimension_numbers<[1], [0], [0], [1], [0, 0, 1, 1], [], []>} : vector<2x32xf32>, vector<32x32xf32>, vector<2x32xf32> -> vector<2x32xf32>
    %283 = arith.addf %281, %282 : vector<2x32xf32>
    %284 = arith.negf %283 : vector<2x32xf32>
    %285 = math.exp %284 : vector<2x32xf32>
    %cst_92 = arith.constant 1.000000e+00 : f32
    %286 = vector.broadcast %cst_92 : f32 to vector<2x32xf32>
    %287 = arith.addf %286, %285 : vector<2x32xf32>
    %288 = arith.divf %286, %287 : vector<2x32xf32>
    %289 = arith.mulf %276, %259 : vector<2x32xf32>
    %290 = arith.mulf %268, %280 : vector<2x32xf32>
    %291 = arith.addf %289, %290 : vector<2x32xf32>
    %292 = math.tanh %291 : vector<2x32xf32>
    %293 = arith.mulf %288, %292 : vector<2x32xf32>
    %c5_i32 = arith.constant 5 : i32
    %294 = vector.broadcast %c5_i32 : i32 to vector<2x1xi32>
    %295 = arith.cmpi sgt, %11, %294 : vector<2x1xi32>
    %296 = vector.shape_cast %295 : vector<2x1xi1> to vector<2x1xi1>
    %297 = vector.broadcast %296 : vector<2x1xi1> to vector<2x32xi1>
    %298 = arith.select %297, %293, %256 : vector<2x32xi1>, vector<2x32xf32>
    %299 = vector.shape_cast %295 : vector<2x1xi1> to vector<2x1xi1>
    %300 = vector.broadcast %299 : vector<2x1xi1> to vector<2x32xi1>
    %301 = arith.select %300, %291, %259 : vector<2x32xi1>, vector<2x32xf32>
    %c10 = arith.constant 10 : index
    %c0_93 = arith.constant 0 : index
    %302 = vector.load %arg13[%c10, %c0_93] : memref<16x32xf32, #tpu.memory_space<vmem>>, vector<2x32xf32>
    tpu.vector_store %arg13[%c10, %c0_93], %298 {strides = array<i32>} : memref<16x32xf32, #tpu.memory_space<vmem>>, vector<2x32xf32>,
    %303 = vector.extract_strided_slice %19 {offsets = [12, 0], sizes = [2, 32], strides = [1, 1]} : vector<16x32xf32> to vector<2x32xf32>
    %cst_94 = arith.constant dense<0.000000e+00> : vector<2x32xf32>
    %304 = tpu.matmul %298, %42, %cst_94 {dimension_numbers = #tpu.dot_dimension_numbers<[1], [0], [0], [1], [0, 0, 1, 1], [], []>} : vector<2x32xf32>, vector<32x32xf32>, vector<2x32xf32> -> vector<2x32xf32>
    %305 = arith.addf %303, %304 : vector<2x32xf32>
    %306 = arith.negf %305 : vector<2x32xf32>
    %307 = math.exp %306 : vector<2x32xf32>
    %cst_95 = arith.constant 1.000000e+00 : f32
    %308 = vector.broadcast %cst_95 : f32 to vector<2x32xf32>
    %309 = arith.addf %308, %307 : vector<2x32xf32>
    %310 = arith.divf %308, %309 : vector<2x32xf32>
    %311 = vector.extract_strided_slice %26 {offsets = [12, 0], sizes = [2, 32], strides = [1, 1]} : vector<16x32xf32> to vector<2x32xf32>
    %cst_96 = arith.constant dense<0.000000e+00> : vector<2x32xf32>
    %312 = tpu.matmul %298, %44, %cst_96 {dimension_numbers = #tpu.dot_dimension_numbers<[1], [0], [0], [1], [0, 0, 1, 1], [], []>} : vector<2x32xf32>, vector<32x32xf32>, vector<2x32xf32> -> vector<2x32xf32>
    %313 = arith.addf %311, %312 : vector<2x32xf32>
    %314 = arith.negf %313 : vector<2x32xf32>
    %315 = math.exp %314 : vector<2x32xf32>
    %cst_97 = arith.constant 1.000000e+00 : f32
    %316 = vector.broadcast %cst_97 : f32 to vector<2x32xf32>
    %317 = arith.addf %316, %315 : vector<2x32xf32>
    %318 = arith.divf %316, %317 : vector<2x32xf32>
    %319 = vector.extract_strided_slice %33 {offsets = [12, 0], sizes = [2, 32], strides = [1, 1]} : vector<16x32xf32> to vector<2x32xf32>
    %cst_98 = arith.constant dense<0.000000e+00> : vector<2x32xf32>
    %320 = tpu.matmul %298, %46, %cst_98 {dimension_numbers = #tpu.dot_dimension_numbers<[1], [0], [0], [1], [0, 0, 1, 1], [], []>} : vector<2x32xf32>, vector<32x32xf32>, vector<2x32xf32> -> vector<2x32xf32>
    %321 = arith.addf %319, %320 : vector<2x32xf32>
    %322 = math.tanh %321 : vector<2x32xf32>
    %323 = vector.extract_strided_slice %40 {offsets = [12, 0], sizes = [2, 32], strides = [1, 1]} : vector<16x32xf32> to vector<2x32xf32>
    %cst_99 = arith.constant dense<0.000000e+00> : vector<2x32xf32>
    %324 = tpu.matmul %298, %48, %cst_99 {dimension_numbers = #tpu.dot_dimension_numbers<[1], [0], [0], [1], [0, 0, 1, 1], [], []>} : vector<2x32xf32>, vector<32x32xf32>, vector<2x32xf32> -> vector<2x32xf32>
    %325 = arith.addf %323, %324 : vector<2x32xf32>
    %326 = arith.negf %325 : vector<2x32xf32>
    %327 = math.exp %326 : vector<2x32xf32>
    %cst_100 = arith.constant 1.000000e+00 : f32
    %328 = vector.broadcast %cst_100 : f32 to vector<2x32xf32>
    %329 = arith.addf %328, %327 : vector<2x32xf32>
    %330 = arith.divf %328, %329 : vector<2x32xf32>
    %331 = arith.mulf %318, %301 : vector<2x32xf32>
    %332 = arith.mulf %310, %322 : vector<2x32xf32>
    %333 = arith.addf %331, %332 : vector<2x32xf32>
    %334 = math.tanh %333 : vector<2x32xf32>
    %335 = arith.mulf %330, %334 : vector<2x32xf32>
    %c6_i32 = arith.constant 6 : i32
    %336 = vector.broadcast %c6_i32 : i32 to vector<2x1xi32>
    %337 = arith.cmpi sgt, %11, %336 : vector<2x1xi32>
    %338 = vector.shape_cast %337 : vector<2x1xi1> to vector<2x1xi1>
    %339 = vector.broadcast %338 : vector<2x1xi1> to vector<2x32xi1>
    %340 = arith.select %339, %335, %298 : vector<2x32xi1>, vector<2x32xf32>
    %341 = vector.shape_cast %337 : vector<2x1xi1> to vector<2x1xi1>
    %342 = vector.broadcast %341 : vector<2x1xi1> to vector<2x32xi1>
    %343 = arith.select %342, %333, %301 : vector<2x32xi1>, vector<2x32xf32>
    %c12 = arith.constant 12 : index
    %c0_101 = arith.constant 0 : index
    %344 = vector.load %arg13[%c12, %c0_101] : memref<16x32xf32, #tpu.memory_space<vmem>>, vector<2x32xf32>
    tpu.vector_store %arg13[%c12, %c0_101], %340 {strides = array<i32>} : memref<16x32xf32, #tpu.memory_space<vmem>>, vector<2x32xf32>,
    %345 = vector.extract_strided_slice %19 {offsets = [14, 0], sizes = [2, 32], strides = [1, 1]} : vector<16x32xf32> to vector<2x32xf32>
    %cst_102 = arith.constant dense<0.000000e+00> : vector<2x32xf32>
    %346 = tpu.matmul %340, %42, %cst_102 {dimension_numbers = #tpu.dot_dimension_numbers<[1], [0], [0], [1], [0, 0, 1, 1], [], []>} : vector<2x32xf32>, vector<32x32xf32>, vector<2x32xf32> -> vector<2x32xf32>
    %347 = arith.addf %345, %346 : vector<2x32xf32>
    %348 = arith.negf %347 : vector<2x32xf32>
    %349 = math.exp %348 : vector<2x32xf32>
    %cst_103 = arith.constant 1.000000e+00 : f32
    %350 = vector.broadcast %cst_103 : f32 to vector<2x32xf32>
    %351 = arith.addf %350, %349 : vector<2x32xf32>
    %352 = arith.divf %350, %351 : vector<2x32xf32>
    %353 = vector.extract_strided_slice %26 {offsets = [14, 0], sizes = [2, 32], strides = [1, 1]} : vector<16x32xf32> to vector<2x32xf32>
    %cst_104 = arith.constant dense<0.000000e+00> : vector<2x32xf32>
    %354 = tpu.matmul %340, %44, %cst_104 {dimension_numbers = #tpu.dot_dimension_numbers<[1], [0], [0], [1], [0, 0, 1, 1], [], []>} : vector<2x32xf32>, vector<32x32xf32>, vector<2x32xf32> -> vector<2x32xf32>
    %355 = arith.addf %353, %354 : vector<2x32xf32>
    %356 = arith.negf %355 : vector<2x32xf32>
    %357 = math.exp %356 : vector<2x32xf32>
    %cst_105 = arith.constant 1.000000e+00 : f32
    %358 = vector.broadcast %cst_105 : f32 to vector<2x32xf32>
    %359 = arith.addf %358, %357 : vector<2x32xf32>
    %360 = arith.divf %358, %359 : vector<2x32xf32>
    %361 = vector.extract_strided_slice %33 {offsets = [14, 0], sizes = [2, 32], strides = [1, 1]} : vector<16x32xf32> to vector<2x32xf32>
    %cst_106 = arith.constant dense<0.000000e+00> : vector<2x32xf32>
    %362 = tpu.matmul %340, %46, %cst_106 {dimension_numbers = #tpu.dot_dimension_numbers<[1], [0], [0], [1], [0, 0, 1, 1], [], []>} : vector<2x32xf32>, vector<32x32xf32>, vector<2x32xf32> -> vector<2x32xf32>
    %363 = arith.addf %361, %362 : vector<2x32xf32>
    %364 = math.tanh %363 : vector<2x32xf32>
    %365 = vector.extract_strided_slice %40 {offsets = [14, 0], sizes = [2, 32], strides = [1, 1]} : vector<16x32xf32> to vector<2x32xf32>
    %cst_107 = arith.constant dense<0.000000e+00> : vector<2x32xf32>
    %366 = tpu.matmul %340, %48, %cst_107 {dimension_numbers = #tpu.dot_dimension_numbers<[1], [0], [0], [1], [0, 0, 1, 1], [], []>} : vector<2x32xf32>, vector<32x32xf32>, vector<2x32xf32> -> vector<2x32xf32>
    %367 = arith.addf %365, %366 : vector<2x32xf32>
    %368 = arith.negf %367 : vector<2x32xf32>
    %369 = math.exp %368 : vector<2x32xf32>
    %cst_108 = arith.constant 1.000000e+00 : f32
    %370 = vector.broadcast %cst_108 : f32 to vector<2x32xf32>
    %371 = arith.addf %370, %369 : vector<2x32xf32>
    %372 = arith.divf %370, %371 : vector<2x32xf32>
    %373 = arith.mulf %360, %343 : vector<2x32xf32>
    %374 = arith.mulf %352, %364 : vector<2x32xf32>
    %375 = arith.addf %373, %374 : vector<2x32xf32>
    %376 = math.tanh %375 : vector<2x32xf32>
    %377 = arith.mulf %372, %376 : vector<2x32xf32>
    %c7_i32 = arith.constant 7 : i32
    %378 = vector.broadcast %c7_i32 : i32 to vector<2x1xi32>
    %379 = arith.cmpi sgt, %11, %378 : vector<2x1xi32>
    %380 = vector.shape_cast %379 : vector<2x1xi1> to vector<2x1xi1>
    %381 = vector.broadcast %380 : vector<2x1xi1> to vector<2x32xi1>
    %382 = arith.select %381, %377, %340 : vector<2x32xi1>, vector<2x32xf32>
    %383 = vector.shape_cast %379 : vector<2x1xi1> to vector<2x1xi1>
    %384 = vector.broadcast %383 : vector<2x1xi1> to vector<2x32xi1>
    %385 = arith.select %384, %375, %343 : vector<2x32xi1>, vector<2x32xf32>
    %c14 = arith.constant 14 : index
    %c0_109 = arith.constant 0 : index
    %386 = vector.load %arg13[%c14, %c0_109] : memref<16x32xf32, #tpu.memory_space<vmem>>, vector<2x32xf32>
    tpu.vector_store %arg13[%c14, %c0_109], %382 {strides = array<i32>} : memref<16x32xf32, #tpu.memory_space<vmem>>, vector<2x32xf32>,
    %c0_110 = arith.constant 0 : index
    %c0_111 = arith.constant 0 : index
    %c0_112 = arith.constant 0 : index
    %387 = vector.load %arg11[%c0_110, %c0_111, %c0_112] : memref<2x2x32xf32, #tpu.memory_space<vmem>>, vector<1x2x32xf32>
    %388 = vector.shape_cast %387 : vector<1x2x32xf32> to vector<2x32xf32>
    %389 = vector.shape_cast %382 : vector<2x32xf32> to vector<1x2x32xf32>
    tpu.vector_store %arg11[%c0_110, %c0_111, %c0_112], %389 {strides = array<i32>} : memref<2x2x32xf32, #tpu.memory_space<vmem>>, vector<1x2x32xf32>,
    %c0_113 = arith.constant 0 : index
    %c0_114 = arith.constant 0 : index
    %c0_115 = arith.constant 0 : index
    %390 = vector.load %arg12[%c0_113, %c0_114, %c0_115] : memref<2x2x32xf32, #tpu.memory_space<vmem>>, vector<1x2x32xf32>
    %391 = vector.shape_cast %390 : vector<1x2x32xf32> to vector<2x32xf32>
    %392 = vector.shape_cast %385 : vector<2x32xf32> to vector<1x2x32xf32>
    tpu.vector_store %arg12[%c0_113, %c0_114, %c0_115], %392 {strides = array<i32>} : memref<2x2x32xf32, #tpu.memory_space<vmem>>, vector<1x2x32xf32>,
    %c0_116 = arith.constant 0 : index
    %c0_117 = arith.constant 0 : index
    %393 = vector.load %arg13[%c0_116, %c0_117] : memref<16x32xf32, #tpu.memory_space<vmem>>, vector<16x32xf32>
    %c0_118 = arith.constant 0 : index
    %c0_119 = arith.constant 0 : index
    %c0_120 = arith.constant 0 : index
    %394 = vector.load %arg5[%c0_118, %c0_119, %c0_120] : memref<4x32x32xf32, #tpu.memory_space<vmem>>, vector<1x32x32xf32>
    %395 = vector.shape_cast %394 : vector<1x32x32xf32> to vector<32x32xf32>
    %cst_121 = arith.constant dense<0.000000e+00> : vector<16x32xf32>
    %396 = tpu.matmul %393, %395, %cst_121 {dimension_numbers = #tpu.dot_dimension_numbers<[1], [0], [0], [1], [0, 0, 1, 1], [], []>} : vector<16x32xf32>, vector<32x32xf32>, vector<16x32xf32> -> vector<16x32xf32>
    %c0_122 = arith.constant 0 : index
    %c0_123 = arith.constant 0 : index
    %c0_124 = arith.constant 0 : index
    %397 = vector.load %arg7[%c0_122, %c0_123, %c0_124] : memref<4x1x32xf32, #tpu.memory_space<vmem>>, vector<1x1x32xf32>
    %398 = vector.shape_cast %397 : vector<1x1x32xf32> to vector<1x32xf32>
    %399 = vector.broadcast %398 : vector<1x32xf32> to vector<16x32xf32>
    %400 = arith.addf %396, %399 : vector<16x32xf32>
    %c1_125 = arith.constant 1 : index
    %c0_126 = arith.constant 0 : index
    %c0_127 = arith.constant 0 : index
    %401 = vector.load %arg5[%c1_125, %c0_126, %c0_127] : memref<4x32x32xf32, #tpu.memory_space<vmem>>, vector<1x32x32xf32>
    %402 = vector.shape_cast %401 : vector<1x32x32xf32> to vector<32x32xf32>
    %cst_128 = arith.constant dense<0.000000e+00> : vector<16x32xf32>
    %403 = tpu.matmul %393, %402, %cst_128 {dimension_numbers = #tpu.dot_dimension_numbers<[1], [0], [0], [1], [0, 0, 1, 1], [], []>} : vector<16x32xf32>, vector<32x32xf32>, vector<16x32xf32> -> vector<16x32xf32>
    %c1_129 = arith.constant 1 : index
    %c0_130 = arith.constant 0 : index
    %c0_131 = arith.constant 0 : index
    %404 = vector.load %arg7[%c1_129, %c0_130, %c0_131] : memref<4x1x32xf32, #tpu.memory_space<vmem>>, vector<1x1x32xf32>
    %405 = vector.shape_cast %404 : vector<1x1x32xf32> to vector<1x32xf32>
    %406 = vector.broadcast %405 : vector<1x32xf32> to vector<16x32xf32>
    %407 = arith.addf %403, %406 : vector<16x32xf32>
    %c2_132 = arith.constant 2 : index
    %c0_133 = arith.constant 0 : index
    %c0_134 = arith.constant 0 : index
    %408 = vector.load %arg5[%c2_132, %c0_133, %c0_134] : memref<4x32x32xf32, #tpu.memory_space<vmem>>, vector<1x32x32xf32>
    %409 = vector.shape_cast %408 : vector<1x32x32xf32> to vector<32x32xf32>
    %cst_135 = arith.constant dense<0.000000e+00> : vector<16x32xf32>
    %410 = tpu.matmul %393, %409, %cst_135 {dimension_numbers = #tpu.dot_dimension_numbers<[1], [0], [0], [1], [0, 0, 1, 1], [], []>} : vector<16x32xf32>, vector<32x32xf32>, vector<16x32xf32> -> vector<16x32xf32>
    %c2_136 = arith.constant 2 : index
    %c0_137 = arith.constant 0 : index
    %c0_138 = arith.constant 0 : index
    %411 = vector.load %arg7[%c2_136, %c0_137, %c0_138] : memref<4x1x32xf32, #tpu.memory_space<vmem>>, vector<1x1x32xf32>
    %412 = vector.shape_cast %411 : vector<1x1x32xf32> to vector<1x32xf32>
    %413 = vector.broadcast %412 : vector<1x32xf32> to vector<16x32xf32>
    %414 = arith.addf %410, %413 : vector<16x32xf32>
    %c3_139 = arith.constant 3 : index
    %c0_140 = arith.constant 0 : index
    %c0_141 = arith.constant 0 : index
    %415 = vector.load %arg5[%c3_139, %c0_140, %c0_141] : memref<4x32x32xf32, #tpu.memory_space<vmem>>, vector<1x32x32xf32>
    %416 = vector.shape_cast %415 : vector<1x32x32xf32> to vector<32x32xf32>
    %cst_142 = arith.constant dense<0.000000e+00> : vector<16x32xf32>
    %417 = tpu.matmul %393, %416, %cst_142 {dimension_numbers = #tpu.dot_dimension_numbers<[1], [0], [0], [1], [0, 0, 1, 1], [], []>} : vector<16x32xf32>, vector<32x32xf32>, vector<16x32xf32> -> vector<16x32xf32>
    %c3_143 = arith.constant 3 : index
    %c0_144 = arith.constant 0 : index
    %c0_145 = arith.constant 0 : index
    %418 = vector.load %arg7[%c3_143, %c0_144, %c0_145] : memref<4x1x32xf32, #tpu.memory_space<vmem>>, vector<1x1x32xf32>
    %419 = vector.shape_cast %418 : vector<1x1x32xf32> to vector<1x32xf32>
    %420 = vector.broadcast %419 : vector<1x32xf32> to vector<16x32xf32>
    %421 = arith.addf %417, %420 : vector<16x32xf32>
    %c0_146 = arith.constant 0 : index
    %c0_147 = arith.constant 0 : index
    %c0_148 = arith.constant 0 : index
    %422 = vector.load %arg6[%c0_146, %c0_147, %c0_148] : memref<4x32x32xf32, #tpu.memory_space<vmem>>, vector<1x32x32xf32>
    %423 = vector.shape_cast %422 : vector<1x32x32xf32> to vector<32x32xf32>
    %c1_149 = arith.constant 1 : index
    %c0_150 = arith.constant 0 : index
    %c0_151 = arith.constant 0 : index
    %424 = vector.load %arg6[%c1_149, %c0_150, %c0_151] : memref<4x32x32xf32, #tpu.memory_space<vmem>>, vector<1x32x32xf32>
    %425 = vector.shape_cast %424 : vector<1x32x32xf32> to vector<32x32xf32>
    %c2_152 = arith.constant 2 : index
    %c0_153 = arith.constant 0 : index
    %c0_154 = arith.constant 0 : index
    %426 = vector.load %arg6[%c2_152, %c0_153, %c0_154] : memref<4x32x32xf32, #tpu.memory_space<vmem>>, vector<1x32x32xf32>
    %427 = vector.shape_cast %426 : vector<1x32x32xf32> to vector<32x32xf32>
    %c3_155 = arith.constant 3 : index
    %c0_156 = arith.constant 0 : index
    %c0_157 = arith.constant 0 : index
    %428 = vector.load %arg6[%c3_155, %c0_156, %c0_157] : memref<4x32x32xf32, #tpu.memory_space<vmem>>, vector<1x32x32xf32>
    %429 = vector.shape_cast %428 : vector<1x32x32xf32> to vector<32x32xf32>
    %cst_158 = arith.constant 0.000000e+00 : f32
    %430 = vector.broadcast %cst_158 : f32 to vector<2x32xf32>
    %cst_159 = arith.constant 0.000000e+00 : f32
    %431 = vector.broadcast %cst_159 : f32 to vector<2x32xf32>
    %432 = vector.extract_strided_slice %400 {offsets = [0, 0], sizes = [2, 32], strides = [1, 1]} : vector<16x32xf32> to vector<2x32xf32>
    %cst_160 = arith.constant dense<0.000000e+00> : vector<2x32xf32>
    %433 = tpu.matmul %430, %423, %cst_160 {dimension_numbers = #tpu.dot_dimension_numbers<[1], [0], [0], [1], [0, 0, 1, 1], [], []>} : vector<2x32xf32>, vector<32x32xf32>, vector<2x32xf32> -> vector<2x32xf32>
    %434 = arith.addf %432, %433 : vector<2x32xf32>
    %435 = arith.negf %434 : vector<2x32xf32>
    %436 = math.exp %435 : vector<2x32xf32>
    %cst_161 = arith.constant 1.000000e+00 : f32
    %437 = vector.broadcast %cst_161 : f32 to vector<2x32xf32>
    %438 = arith.addf %437, %436 : vector<2x32xf32>
    %439 = arith.divf %437, %438 : vector<2x32xf32>
    %440 = vector.extract_strided_slice %407 {offsets = [0, 0], sizes = [2, 32], strides = [1, 1]} : vector<16x32xf32> to vector<2x32xf32>
    %cst_162 = arith.constant dense<0.000000e+00> : vector<2x32xf32>
    %441 = tpu.matmul %430, %425, %cst_162 {dimension_numbers = #tpu.dot_dimension_numbers<[1], [0], [0], [1], [0, 0, 1, 1], [], []>} : vector<2x32xf32>, vector<32x32xf32>, vector<2x32xf32> -> vector<2x32xf32>
    %442 = arith.addf %440, %441 : vector<2x32xf32>
    %443 = arith.negf %442 : vector<2x32xf32>
    %444 = math.exp %443 : vector<2x32xf32>
    %cst_163 = arith.constant 1.000000e+00 : f32
    %445 = vector.broadcast %cst_163 : f32 to vector<2x32xf32>
    %446 = arith.addf %445, %444 : vector<2x32xf32>
    %447 = arith.divf %445, %446 : vector<2x32xf32>
    %448 = vector.extract_strided_slice %414 {offsets = [0, 0], sizes = [2, 32], strides = [1, 1]} : vector<16x32xf32> to vector<2x32xf32>
    %cst_164 = arith.constant dense<0.000000e+00> : vector<2x32xf32>
    %449 = tpu.matmul %430, %427, %cst_164 {dimension_numbers = #tpu.dot_dimension_numbers<[1], [0], [0], [1], [0, 0, 1, 1], [], []>} : vector<2x32xf32>, vector<32x32xf32>, vector<2x32xf32> -> vector<2x32xf32>
    %450 = arith.addf %448, %449 : vector<2x32xf32>
    %451 = math.tanh %450 : vector<2x32xf32>
    %452 = vector.extract_strided_slice %421 {offsets = [0, 0], sizes = [2, 32], strides = [1, 1]} : vector<16x32xf32> to vector<2x32xf32>
    %cst_165 = arith.constant dense<0.000000e+00> : vector<2x32xf32>
    %453 = tpu.matmul %430, %429, %cst_165 {dimension_numbers = #tpu.dot_dimension_numbers<[1], [0], [0], [1], [0, 0, 1, 1], [], []>} : vector<2x32xf32>, vector<32x32xf32>, vector<2x32xf32> -> vector<2x32xf32>
    %454 = arith.addf %452, %453 : vector<2x32xf32>
    %455 = arith.negf %454 : vector<2x32xf32>
    %456 = math.exp %455 : vector<2x32xf32>
    %cst_166 = arith.constant 1.000000e+00 : f32
    %457 = vector.broadcast %cst_166 : f32 to vector<2x32xf32>
    %458 = arith.addf %457, %456 : vector<2x32xf32>
    %459 = arith.divf %457, %458 : vector<2x32xf32>
    %460 = arith.mulf %447, %431 : vector<2x32xf32>
    %461 = arith.mulf %439, %451 : vector<2x32xf32>
    %462 = arith.addf %460, %461 : vector<2x32xf32>
    %463 = math.tanh %462 : vector<2x32xf32>
    %464 = arith.mulf %459, %463 : vector<2x32xf32>
    %c0_i32_167 = arith.constant 0 : i32
    %465 = vector.broadcast %c0_i32_167 : i32 to vector<2x1xi32>
    %466 = arith.cmpi sgt, %11, %465 : vector<2x1xi32>
    %467 = vector.shape_cast %466 : vector<2x1xi1> to vector<2x1xi1>
    %468 = vector.broadcast %467 : vector<2x1xi1> to vector<2x32xi1>
    %469 = arith.select %468, %464, %430 : vector<2x32xi1>, vector<2x32xf32>
    %470 = vector.shape_cast %466 : vector<2x1xi1> to vector<2x1xi1>
    %471 = vector.broadcast %470 : vector<2x1xi1> to vector<2x32xi1>
    %472 = arith.select %471, %462, %431 : vector<2x32xi1>, vector<2x32xf32>
    %cst_168 = arith.constant 0.000000e+00 : f32
    %473 = vector.shape_cast %466 : vector<2x1xi1> to vector<2x1xi1>
    %474 = vector.broadcast %473 : vector<2x1xi1> to vector<2x32xi1>
    %475 = vector.broadcast %cst_168 : f32 to vector<2x32xf32>
    %476 = arith.select %474, %469, %475 : vector<2x32xi1>, vector<2x32xf32>
    %c0_169 = arith.constant 0 : index
    %c0_170 = arith.constant 0 : index
    %477 = vector.load %arg13[%c0_169, %c0_170] : memref<16x32xf32, #tpu.memory_space<vmem>>, vector<2x32xf32>
    tpu.vector_store %arg13[%c0_169, %c0_170], %476 {strides = array<i32>} : memref<16x32xf32, #tpu.memory_space<vmem>>, vector<2x32xf32>,
    %478 = vector.extract_strided_slice %400 {offsets = [2, 0], sizes = [2, 32], strides = [1, 1]} : vector<16x32xf32> to vector<2x32xf32>
    %cst_171 = arith.constant dense<0.000000e+00> : vector<2x32xf32>
    %479 = tpu.matmul %469, %423, %cst_171 {dimension_numbers = #tpu.dot_dimension_numbers<[1], [0], [0], [1], [0, 0, 1, 1], [], []>} : vector<2x32xf32>, vector<32x32xf32>, vector<2x32xf32> -> vector<2x32xf32>
    %480 = arith.addf %478, %479 : vector<2x32xf32>
    %481 = arith.negf %480 : vector<2x32xf32>
    %482 = math.exp %481 : vector<2x32xf32>
    %cst_172 = arith.constant 1.000000e+00 : f32
    %483 = vector.broadcast %cst_172 : f32 to vector<2x32xf32>
    %484 = arith.addf %483, %482 : vector<2x32xf32>
    %485 = arith.divf %483, %484 : vector<2x32xf32>
    %486 = vector.extract_strided_slice %407 {offsets = [2, 0], sizes = [2, 32], strides = [1, 1]} : vector<16x32xf32> to vector<2x32xf32>
    %cst_173 = arith.constant dense<0.000000e+00> : vector<2x32xf32>
    %487 = tpu.matmul %469, %425, %cst_173 {dimension_numbers = #tpu.dot_dimension_numbers<[1], [0], [0], [1], [0, 0, 1, 1], [], []>} : vector<2x32xf32>, vector<32x32xf32>, vector<2x32xf32> -> vector<2x32xf32>
    %488 = arith.addf %486, %487 : vector<2x32xf32>
    %489 = arith.negf %488 : vector<2x32xf32>
    %490 = math.exp %489 : vector<2x32xf32>
    %cst_174 = arith.constant 1.000000e+00 : f32
    %491 = vector.broadcast %cst_174 : f32 to vector<2x32xf32>
    %492 = arith.addf %491, %490 : vector<2x32xf32>
    %493 = arith.divf %491, %492 : vector<2x32xf32>
    %494 = vector.extract_strided_slice %414 {offsets = [2, 0], sizes = [2, 32], strides = [1, 1]} : vector<16x32xf32> to vector<2x32xf32>
    %cst_175 = arith.constant dense<0.000000e+00> : vector<2x32xf32>
    %495 = tpu.matmul %469, %427, %cst_175 {dimension_numbers = #tpu.dot_dimension_numbers<[1], [0], [0], [1], [0, 0, 1, 1], [], []>} : vector<2x32xf32>, vector<32x32xf32>, vector<2x32xf32> -> vector<2x32xf32>
    %496 = arith.addf %494, %495 : vector<2x32xf32>
    %497 = math.tanh %496 : vector<2x32xf32>
    %498 = vector.extract_strided_slice %421 {offsets = [2, 0], sizes = [2, 32], strides = [1, 1]} : vector<16x32xf32> to vector<2x32xf32>
    %cst_176 = arith.constant dense<0.000000e+00> : vector<2x32xf32>
    %499 = tpu.matmul %469, %429, %cst_176 {dimension_numbers = #tpu.dot_dimension_numbers<[1], [0], [0], [1], [0, 0, 1, 1], [], []>} : vector<2x32xf32>, vector<32x32xf32>, vector<2x32xf32> -> vector<2x32xf32>
    %500 = arith.addf %498, %499 : vector<2x32xf32>
    %501 = arith.negf %500 : vector<2x32xf32>
    %502 = math.exp %501 : vector<2x32xf32>
    %cst_177 = arith.constant 1.000000e+00 : f32
    %503 = vector.broadcast %cst_177 : f32 to vector<2x32xf32>
    %504 = arith.addf %503, %502 : vector<2x32xf32>
    %505 = arith.divf %503, %504 : vector<2x32xf32>
    %506 = arith.mulf %493, %472 : vector<2x32xf32>
    %507 = arith.mulf %485, %497 : vector<2x32xf32>
    %508 = arith.addf %506, %507 : vector<2x32xf32>
    %509 = math.tanh %508 : vector<2x32xf32>
    %510 = arith.mulf %505, %509 : vector<2x32xf32>
    %c1_i32_178 = arith.constant 1 : i32
    %511 = vector.broadcast %c1_i32_178 : i32 to vector<2x1xi32>
    %512 = arith.cmpi sgt, %11, %511 : vector<2x1xi32>
    %513 = vector.shape_cast %512 : vector<2x1xi1> to vector<2x1xi1>
    %514 = vector.broadcast %513 : vector<2x1xi1> to vector<2x32xi1>
    %515 = arith.select %514, %510, %469 : vector<2x32xi1>, vector<2x32xf32>
    %516 = vector.shape_cast %512 : vector<2x1xi1> to vector<2x1xi1>
    %517 = vector.broadcast %516 : vector<2x1xi1> to vector<2x32xi1>
    %518 = arith.select %517, %508, %472 : vector<2x32xi1>, vector<2x32xf32>
    %cst_179 = arith.constant 0.000000e+00 : f32
    %519 = vector.shape_cast %512 : vector<2x1xi1> to vector<2x1xi1>
    %520 = vector.broadcast %519 : vector<2x1xi1> to vector<2x32xi1>
    %521 = vector.broadcast %cst_179 : f32 to vector<2x32xf32>
    %522 = arith.select %520, %515, %521 : vector<2x32xi1>, vector<2x32xf32>
    %c2_180 = arith.constant 2 : index
    %c0_181 = arith.constant 0 : index
    %523 = vector.load %arg13[%c2_180, %c0_181] : memref<16x32xf32, #tpu.memory_space<vmem>>, vector<2x32xf32>
    tpu.vector_store %arg13[%c2_180, %c0_181], %522 {strides = array<i32>} : memref<16x32xf32, #tpu.memory_space<vmem>>, vector<2x32xf32>,
    %524 = vector.extract_strided_slice %400 {offsets = [4, 0], sizes = [2, 32], strides = [1, 1]} : vector<16x32xf32> to vector<2x32xf32>
    %cst_182 = arith.constant dense<0.000000e+00> : vector<2x32xf32>
    %525 = tpu.matmul %515, %423, %cst_182 {dimension_numbers = #tpu.dot_dimension_numbers<[1], [0], [0], [1], [0, 0, 1, 1], [], []>} : vector<2x32xf32>, vector<32x32xf32>, vector<2x32xf32> -> vector<2x32xf32>
    %526 = arith.addf %524, %525 : vector<2x32xf32>
    %527 = arith.negf %526 : vector<2x32xf32>
    %528 = math.exp %527 : vector<2x32xf32>
    %cst_183 = arith.constant 1.000000e+00 : f32
    %529 = vector.broadcast %cst_183 : f32 to vector<2x32xf32>
    %530 = arith.addf %529, %528 : vector<2x32xf32>
    %531 = arith.divf %529, %530 : vector<2x32xf32>
    %532 = vector.extract_strided_slice %407 {offsets = [4, 0], sizes = [2, 32], strides = [1, 1]} : vector<16x32xf32> to vector<2x32xf32>
    %cst_184 = arith.constant dense<0.000000e+00> : vector<2x32xf32>
    %533 = tpu.matmul %515, %425, %cst_184 {dimension_numbers = #tpu.dot_dimension_numbers<[1], [0], [0], [1], [0, 0, 1, 1], [], []>} : vector<2x32xf32>, vector<32x32xf32>, vector<2x32xf32> -> vector<2x32xf32>
    %534 = arith.addf %532, %533 : vector<2x32xf32>
    %535 = arith.negf %534 : vector<2x32xf32>
    %536 = math.exp %535 : vector<2x32xf32>
    %cst_185 = arith.constant 1.000000e+00 : f32
    %537 = vector.broadcast %cst_185 : f32 to vector<2x32xf32>
    %538 = arith.addf %537, %536 : vector<2x32xf32>
    %539 = arith.divf %537, %538 : vector<2x32xf32>
    %540 = vector.extract_strided_slice %414 {offsets = [4, 0], sizes = [2, 32], strides = [1, 1]} : vector<16x32xf32> to vector<2x32xf32>
    %cst_186 = arith.constant dense<0.000000e+00> : vector<2x32xf32>
    %541 = tpu.matmul %515, %427, %cst_186 {dimension_numbers = #tpu.dot_dimension_numbers<[1], [0], [0], [1], [0, 0, 1, 1], [], []>} : vector<2x32xf32>, vector<32x32xf32>, vector<2x32xf32> -> vector<2x32xf32>
    %542 = arith.addf %540, %541 : vector<2x32xf32>
    %543 = math.tanh %542 : vector<2x32xf32>
    %544 = vector.extract_strided_slice %421 {offsets = [4, 0], sizes = [2, 32], strides = [1, 1]} : vector<16x32xf32> to vector<2x32xf32>
    %cst_187 = arith.constant dense<0.000000e+00> : vector<2x32xf32>
    %545 = tpu.matmul %515, %429, %cst_187 {dimension_numbers = #tpu.dot_dimension_numbers<[1], [0], [0], [1], [0, 0, 1, 1], [], []>} : vector<2x32xf32>, vector<32x32xf32>, vector<2x32xf32> -> vector<2x32xf32>
    %546 = arith.addf %544, %545 : vector<2x32xf32>
    %547 = arith.negf %546 : vector<2x32xf32>
    %548 = math.exp %547 : vector<2x32xf32>
    %cst_188 = arith.constant 1.000000e+00 : f32
    %549 = vector.broadcast %cst_188 : f32 to vector<2x32xf32>
    %550 = arith.addf %549, %548 : vector<2x32xf32>
    %551 = arith.divf %549, %550 : vector<2x32xf32>
    %552 = arith.mulf %539, %518 : vector<2x32xf32>
    %553 = arith.mulf %531, %543 : vector<2x32xf32>
    %554 = arith.addf %552, %553 : vector<2x32xf32>
    %555 = math.tanh %554 : vector<2x32xf32>
    %556 = arith.mulf %551, %555 : vector<2x32xf32>
    %c2_i32_189 = arith.constant 2 : i32
    %557 = vector.broadcast %c2_i32_189 : i32 to vector<2x1xi32>
    %558 = arith.cmpi sgt, %11, %557 : vector<2x1xi32>
    %559 = vector.shape_cast %558 : vector<2x1xi1> to vector<2x1xi1>
    %560 = vector.broadcast %559 : vector<2x1xi1> to vector<2x32xi1>
    %561 = arith.select %560, %556, %515 : vector<2x32xi1>, vector<2x32xf32>
    %562 = vector.shape_cast %558 : vector<2x1xi1> to vector<2x1xi1>
    %563 = vector.broadcast %562 : vector<2x1xi1> to vector<2x32xi1>
    %564 = arith.select %563, %554, %518 : vector<2x32xi1>, vector<2x32xf32>
    %cst_190 = arith.constant 0.000000e+00 : f32
    %565 = vector.shape_cast %558 : vector<2x1xi1> to vector<2x1xi1>
    %566 = vector.broadcast %565 : vector<2x1xi1> to vector<2x32xi1>
    %567 = vector.broadcast %cst_190 : f32 to vector<2x32xf32>
    %568 = arith.select %566, %561, %567 : vector<2x32xi1>, vector<2x32xf32>
    %c4_191 = arith.constant 4 : index
    %c0_192 = arith.constant 0 : index
    %569 = vector.load %arg13[%c4_191, %c0_192] : memref<16x32xf32, #tpu.memory_space<vmem>>, vector<2x32xf32>
    tpu.vector_store %arg13[%c4_191, %c0_192], %568 {strides = array<i32>} : memref<16x32xf32, #tpu.memory_space<vmem>>, vector<2x32xf32>,
    %570 = vector.extract_strided_slice %400 {offsets = [6, 0], sizes = [2, 32], strides = [1, 1]} : vector<16x32xf32> to vector<2x32xf32>
    %cst_193 = arith.constant dense<0.000000e+00> : vector<2x32xf32>
    %571 = tpu.matmul %561, %423, %cst_193 {dimension_numbers = #tpu.dot_dimension_numbers<[1], [0], [0], [1], [0, 0, 1, 1], [], []>} : vector<2x32xf32>, vector<32x32xf32>, vector<2x32xf32> -> vector<2x32xf32>
    %572 = arith.addf %570, %571 : vector<2x32xf32>
    %573 = arith.negf %572 : vector<2x32xf32>
    %574 = math.exp %573 : vector<2x32xf32>
    %cst_194 = arith.constant 1.000000e+00 : f32
    %575 = vector.broadcast %cst_194 : f32 to vector<2x32xf32>
    %576 = arith.addf %575, %574 : vector<2x32xf32>
    %577 = arith.divf %575, %576 : vector<2x32xf32>
    %578 = vector.extract_strided_slice %407 {offsets = [6, 0], sizes = [2, 32], strides = [1, 1]} : vector<16x32xf32> to vector<2x32xf32>
    %cst_195 = arith.constant dense<0.000000e+00> : vector<2x32xf32>
    %579 = tpu.matmul %561, %425, %cst_195 {dimension_numbers = #tpu.dot_dimension_numbers<[1], [0], [0], [1], [0, 0, 1, 1], [], []>} : vector<2x32xf32>, vector<32x32xf32>, vector<2x32xf32> -> vector<2x32xf32>
    %580 = arith.addf %578, %579 : vector<2x32xf32>
    %581 = arith.negf %580 : vector<2x32xf32>
    %582 = math.exp %581 : vector<2x32xf32>
    %cst_196 = arith.constant 1.000000e+00 : f32
    %583 = vector.broadcast %cst_196 : f32 to vector<2x32xf32>
    %584 = arith.addf %583, %582 : vector<2x32xf32>
    %585 = arith.divf %583, %584 : vector<2x32xf32>
    %586 = vector.extract_strided_slice %414 {offsets = [6, 0], sizes = [2, 32], strides = [1, 1]} : vector<16x32xf32> to vector<2x32xf32>
    %cst_197 = arith.constant dense<0.000000e+00> : vector<2x32xf32>
    %587 = tpu.matmul %561, %427, %cst_197 {dimension_numbers = #tpu.dot_dimension_numbers<[1], [0], [0], [1], [0, 0, 1, 1], [], []>} : vector<2x32xf32>, vector<32x32xf32>, vector<2x32xf32> -> vector<2x32xf32>
    %588 = arith.addf %586, %587 : vector<2x32xf32>
    %589 = math.tanh %588 : vector<2x32xf32>
    %590 = vector.extract_strided_slice %421 {offsets = [6, 0], sizes = [2, 32], strides = [1, 1]} : vector<16x32xf32> to vector<2x32xf32>
    %cst_198 = arith.constant dense<0.000000e+00> : vector<2x32xf32>
    %591 = tpu.matmul %561, %429, %cst_198 {dimension_numbers = #tpu.dot_dimension_numbers<[1], [0], [0], [1], [0, 0, 1, 1], [], []>} : vector<2x32xf32>, vector<32x32xf32>, vector<2x32xf32> -> vector<2x32xf32>
    %592 = arith.addf %590, %591 : vector<2x32xf32>
    %593 = arith.negf %592 : vector<2x32xf32>
    %594 = math.exp %593 : vector<2x32xf32>
    %cst_199 = arith.constant 1.000000e+00 : f32
    %595 = vector.broadcast %cst_199 : f32 to vector<2x32xf32>
    %596 = arith.addf %595, %594 : vector<2x32xf32>
    %597 = arith.divf %595, %596 : vector<2x32xf32>
    %598 = arith.mulf %585, %564 : vector<2x32xf32>
    %599 = arith.mulf %577, %589 : vector<2x32xf32>
    %600 = arith.addf %598, %599 : vector<2x32xf32>
    %601 = math.tanh %600 : vector<2x32xf32>
    %602 = arith.mulf %597, %601 : vector<2x32xf32>
    %c3_i32_200 = arith.constant 3 : i32
    %603 = vector.broadcast %c3_i32_200 : i32 to vector<2x1xi32>
    %604 = arith.cmpi sgt, %11, %603 : vector<2x1xi32>
    %605 = vector.shape_cast %604 : vector<2x1xi1> to vector<2x1xi1>
    %606 = vector.broadcast %605 : vector<2x1xi1> to vector<2x32xi1>
    %607 = arith.select %606, %602, %561 : vector<2x32xi1>, vector<2x32xf32>
    %608 = vector.shape_cast %604 : vector<2x1xi1> to vector<2x1xi1>
    %609 = vector.broadcast %608 : vector<2x1xi1> to vector<2x32xi1>
    %610 = arith.select %609, %600, %564 : vector<2x32xi1>, vector<2x32xf32>
    %cst_201 = arith.constant 0.000000e+00 : f32
    %611 = vector.shape_cast %604 : vector<2x1xi1> to vector<2x1xi1>
    %612 = vector.broadcast %611 : vector<2x1xi1> to vector<2x32xi1>
    %613 = vector.broadcast %cst_201 : f32 to vector<2x32xf32>
    %614 = arith.select %612, %607, %613 : vector<2x32xi1>, vector<2x32xf32>
    %c6_202 = arith.constant 6 : index
    %c0_203 = arith.constant 0 : index
    %615 = vector.load %arg13[%c6_202, %c0_203] : memref<16x32xf32, #tpu.memory_space<vmem>>, vector<2x32xf32>
    tpu.vector_store %arg13[%c6_202, %c0_203], %614 {strides = array<i32>} : memref<16x32xf32, #tpu.memory_space<vmem>>, vector<2x32xf32>,
    %616 = vector.extract_strided_slice %400 {offsets = [8, 0], sizes = [2, 32], strides = [1, 1]} : vector<16x32xf32> to vector<2x32xf32>
    %cst_204 = arith.constant dense<0.000000e+00> : vector<2x32xf32>
    %617 = tpu.matmul %607, %423, %cst_204 {dimension_numbers = #tpu.dot_dimension_numbers<[1], [0], [0], [1], [0, 0, 1, 1], [], []>} : vector<2x32xf32>, vector<32x32xf32>, vector<2x32xf32> -> vector<2x32xf32>
    %618 = arith.addf %616, %617 : vector<2x32xf32>
    %619 = arith.negf %618 : vector<2x32xf32>
    %620 = math.exp %619 : vector<2x32xf32>
    %cst_205 = arith.constant 1.000000e+00 : f32
    %621 = vector.broadcast %cst_205 : f32 to vector<2x32xf32>
    %622 = arith.addf %621, %620 : vector<2x32xf32>
    %623 = arith.divf %621, %622 : vector<2x32xf32>
    %624 = vector.extract_strided_slice %407 {offsets = [8, 0], sizes = [2, 32], strides = [1, 1]} : vector<16x32xf32> to vector<2x32xf32>
    %cst_206 = arith.constant dense<0.000000e+00> : vector<2x32xf32>
    %625 = tpu.matmul %607, %425, %cst_206 {dimension_numbers = #tpu.dot_dimension_numbers<[1], [0], [0], [1], [0, 0, 1, 1], [], []>} : vector<2x32xf32>, vector<32x32xf32>, vector<2x32xf32> -> vector<2x32xf32>
    %626 = arith.addf %624, %625 : vector<2x32xf32>
    %627 = arith.negf %626 : vector<2x32xf32>
    %628 = math.exp %627 : vector<2x32xf32>
    %cst_207 = arith.constant 1.000000e+00 : f32
    %629 = vector.broadcast %cst_207 : f32 to vector<2x32xf32>
    %630 = arith.addf %629, %628 : vector<2x32xf32>
    %631 = arith.divf %629, %630 : vector<2x32xf32>
    %632 = vector.extract_strided_slice %414 {offsets = [8, 0], sizes = [2, 32], strides = [1, 1]} : vector<16x32xf32> to vector<2x32xf32>
    %cst_208 = arith.constant dense<0.000000e+00> : vector<2x32xf32>
    %633 = tpu.matmul %607, %427, %cst_208 {dimension_numbers = #tpu.dot_dimension_numbers<[1], [0], [0], [1], [0, 0, 1, 1], [], []>} : vector<2x32xf32>, vector<32x32xf32>, vector<2x32xf32> -> vector<2x32xf32>
    %634 = arith.addf %632, %633 : vector<2x32xf32>
    %635 = math.tanh %634 : vector<2x32xf32>
    %636 = vector.extract_strided_slice %421 {offsets = [8, 0], sizes = [2, 32], strides = [1, 1]} : vector<16x32xf32> to vector<2x32xf32>
    %cst_209 = arith.constant dense<0.000000e+00> : vector<2x32xf32>
    %637 = tpu.matmul %607, %429, %cst_209 {dimension_numbers = #tpu.dot_dimension_numbers<[1], [0], [0], [1], [0, 0, 1, 1], [], []>} : vector<2x32xf32>, vector<32x32xf32>, vector<2x32xf32> -> vector<2x32xf32>
    %638 = arith.addf %636, %637 : vector<2x32xf32>
    %639 = arith.negf %638 : vector<2x32xf32>
    %640 = math.exp %639 : vector<2x32xf32>
    %cst_210 = arith.constant 1.000000e+00 : f32
    %641 = vector.broadcast %cst_210 : f32 to vector<2x32xf32>
    %642 = arith.addf %641, %640 : vector<2x32xf32>
    %643 = arith.divf %641, %642 : vector<2x32xf32>
    %644 = arith.mulf %631, %610 : vector<2x32xf32>
    %645 = arith.mulf %623, %635 : vector<2x32xf32>
    %646 = arith.addf %644, %645 : vector<2x32xf32>
    %647 = math.tanh %646 : vector<2x32xf32>
    %648 = arith.mulf %643, %647 : vector<2x32xf32>
    %c4_i32_211 = arith.constant 4 : i32
    %649 = vector.broadcast %c4_i32_211 : i32 to vector<2x1xi32>
    %650 = arith.cmpi sgt, %11, %649 : vector<2x1xi32>
    %651 = vector.shape_cast %650 : vector<2x1xi1> to vector<2x1xi1>
    %652 = vector.broadcast %651 : vector<2x1xi1> to vector<2x32xi1>
    %653 = arith.select %652, %648, %607 : vector<2x32xi1>, vector<2x32xf32>
    %654 = vector.shape_cast %650 : vector<2x1xi1> to vector<2x1xi1>
    %655 = vector.broadcast %654 : vector<2x1xi1> to vector<2x32xi1>
    %656 = arith.select %655, %646, %610 : vector<2x32xi1>, vector<2x32xf32>
    %cst_212 = arith.constant 0.000000e+00 : f32
    %657 = vector.shape_cast %650 : vector<2x1xi1> to vector<2x1xi1>
    %658 = vector.broadcast %657 : vector<2x1xi1> to vector<2x32xi1>
    %659 = vector.broadcast %cst_212 : f32 to vector<2x32xf32>
    %660 = arith.select %658, %653, %659 : vector<2x32xi1>, vector<2x32xf32>
    %c8_213 = arith.constant 8 : index
    %c0_214 = arith.constant 0 : index
    %661 = vector.load %arg13[%c8_213, %c0_214] : memref<16x32xf32, #tpu.memory_space<vmem>>, vector<2x32xf32>
    tpu.vector_store %arg13[%c8_213, %c0_214], %660 {strides = array<i32>} : memref<16x32xf32, #tpu.memory_space<vmem>>, vector<2x32xf32>,
    %662 = vector.extract_strided_slice %400 {offsets = [10, 0], sizes = [2, 32], strides = [1, 1]} : vector<16x32xf32> to vector<2x32xf32>
    %cst_215 = arith.constant dense<0.000000e+00> : vector<2x32xf32>
    %663 = tpu.matmul %653, %423, %cst_215 {dimension_numbers = #tpu.dot_dimension_numbers<[1], [0], [0], [1], [0, 0, 1, 1], [], []>} : vector<2x32xf32>, vector<32x32xf32>, vector<2x32xf32> -> vector<2x32xf32>
    %664 = arith.addf %662, %663 : vector<2x32xf32>
    %665 = arith.negf %664 : vector<2x32xf32>
    %666 = math.exp %665 : vector<2x32xf32>
    %cst_216 = arith.constant 1.000000e+00 : f32
    %667 = vector.broadcast %cst_216 : f32 to vector<2x32xf32>
    %668 = arith.addf %667, %666 : vector<2x32xf32>
    %669 = arith.divf %667, %668 : vector<2x32xf32>
    %670 = vector.extract_strided_slice %407 {offsets = [10, 0], sizes = [2, 32], strides = [1, 1]} : vector<16x32xf32> to vector<2x32xf32>
    %cst_217 = arith.constant dense<0.000000e+00> : vector<2x32xf32>
    %671 = tpu.matmul %653, %425, %cst_217 {dimension_numbers = #tpu.dot_dimension_numbers<[1], [0], [0], [1], [0, 0, 1, 1], [], []>} : vector<2x32xf32>, vector<32x32xf32>, vector<2x32xf32> -> vector<2x32xf32>
    %672 = arith.addf %670, %671 : vector<2x32xf32>
    %673 = arith.negf %672 : vector<2x32xf32>
    %674 = math.exp %673 : vector<2x32xf32>
    %cst_218 = arith.constant 1.000000e+00 : f32
    %675 = vector.broadcast %cst_218 : f32 to vector<2x32xf32>
    %676 = arith.addf %675, %674 : vector<2x32xf32>
    %677 = arith.divf %675, %676 : vector<2x32xf32>
    %678 = vector.extract_strided_slice %414 {offsets = [10, 0], sizes = [2, 32], strides = [1, 1]} : vector<16x32xf32> to vector<2x32xf32>
    %cst_219 = arith.constant dense<0.000000e+00> : vector<2x32xf32>
    %679 = tpu.matmul %653, %427, %cst_219 {dimension_numbers = #tpu.dot_dimension_numbers<[1], [0], [0], [1], [0, 0, 1, 1], [], []>} : vector<2x32xf32>, vector<32x32xf32>, vector<2x32xf32> -> vector<2x32xf32>
    %680 = arith.addf %678, %679 : vector<2x32xf32>
    %681 = math.tanh %680 : vector<2x32xf32>
    %682 = vector.extract_strided_slice %421 {offsets = [10, 0], sizes = [2, 32], strides = [1, 1]} : vector<16x32xf32> to vector<2x32xf32>
    %cst_220 = arith.constant dense<0.000000e+00> : vector<2x32xf32>
    %683 = tpu.matmul %653, %429, %cst_220 {dimension_numbers = #tpu.dot_dimension_numbers<[1], [0], [0], [1], [0, 0, 1, 1], [], []>} : vector<2x32xf32>, vector<32x32xf32>, vector<2x32xf32> -> vector<2x32xf32>
    %684 = arith.addf %682, %683 : vector<2x32xf32>
    %685 = arith.negf %684 : vector<2x32xf32>
    %686 = math.exp %685 : vector<2x32xf32>
    %cst_221 = arith.constant 1.000000e+00 : f32
    %687 = vector.broadcast %cst_221 : f32 to vector<2x32xf32>
    %688 = arith.addf %687, %686 : vector<2x32xf32>
    %689 = arith.divf %687, %688 : vector<2x32xf32>
    %690 = arith.mulf %677, %656 : vector<2x32xf32>
    %691 = arith.mulf %669, %681 : vector<2x32xf32>
    %692 = arith.addf %690, %691 : vector<2x32xf32>
    %693 = math.tanh %692 : vector<2x32xf32>
    %694 = arith.mulf %689, %693 : vector<2x32xf32>
    %c5_i32_222 = arith.constant 5 : i32
    %695 = vector.broadcast %c5_i32_222 : i32 to vector<2x1xi32>
    %696 = arith.cmpi sgt, %11, %695 : vector<2x1xi32>
    %697 = vector.shape_cast %696 : vector<2x1xi1> to vector<2x1xi1>
    %698 = vector.broadcast %697 : vector<2x1xi1> to vector<2x32xi1>
    %699 = arith.select %698, %694, %653 : vector<2x32xi1>, vector<2x32xf32>
    %700 = vector.shape_cast %696 : vector<2x1xi1> to vector<2x1xi1>
    %701 = vector.broadcast %700 : vector<2x1xi1> to vector<2x32xi1>
    %702 = arith.select %701, %692, %656 : vector<2x32xi1>, vector<2x32xf32>
    %cst_223 = arith.constant 0.000000e+00 : f32
    %703 = vector.shape_cast %696 : vector<2x1xi1> to vector<2x1xi1>
    %704 = vector.broadcast %703 : vector<2x1xi1> to vector<2x32xi1>
    %705 = vector.broadcast %cst_223 : f32 to vector<2x32xf32>
    %706 = arith.select %704, %699, %705 : vector<2x32xi1>, vector<2x32xf32>
    %c10_224 = arith.constant 10 : index
    %c0_225 = arith.constant 0 : index
    %707 = vector.load %arg13[%c10_224, %c0_225] : memref<16x32xf32, #tpu.memory_space<vmem>>, vector<2x32xf32>
    tpu.vector_store %arg13[%c10_224, %c0_225], %706 {strides = array<i32>} : memref<16x32xf32, #tpu.memory_space<vmem>>, vector<2x32xf32>,
    %708 = vector.extract_strided_slice %400 {offsets = [12, 0], sizes = [2, 32], strides = [1, 1]} : vector<16x32xf32> to vector<2x32xf32>
    %cst_226 = arith.constant dense<0.000000e+00> : vector<2x32xf32>
    %709 = tpu.matmul %699, %423, %cst_226 {dimension_numbers = #tpu.dot_dimension_numbers<[1], [0], [0], [1], [0, 0, 1, 1], [], []>} : vector<2x32xf32>, vector<32x32xf32>, vector<2x32xf32> -> vector<2x32xf32>
    %710 = arith.addf %708, %709 : vector<2x32xf32>
    %711 = arith.negf %710 : vector<2x32xf32>
    %712 = math.exp %711 : vector<2x32xf32>
    %cst_227 = arith.constant 1.000000e+00 : f32
    %713 = vector.broadcast %cst_227 : f32 to vector<2x32xf32>
    %714 = arith.addf %713, %712 : vector<2x32xf32>
    %715 = arith.divf %713, %714 : vector<2x32xf32>
    %716 = vector.extract_strided_slice %407 {offsets = [12, 0], sizes = [2, 32], strides = [1, 1]} : vector<16x32xf32> to vector<2x32xf32>
    %cst_228 = arith.constant dense<0.000000e+00> : vector<2x32xf32>
    %717 = tpu.matmul %699, %425, %cst_228 {dimension_numbers = #tpu.dot_dimension_numbers<[1], [0], [0], [1], [0, 0, 1, 1], [], []>} : vector<2x32xf32>, vector<32x32xf32>, vector<2x32xf32> -> vector<2x32xf32>
    %718 = arith.addf %716, %717 : vector<2x32xf32>
    %719 = arith.negf %718 : vector<2x32xf32>
    %720 = math.exp %719 : vector<2x32xf32>
    %cst_229 = arith.constant 1.000000e+00 : f32
    %721 = vector.broadcast %cst_229 : f32 to vector<2x32xf32>
    %722 = arith.addf %721, %720 : vector<2x32xf32>
    %723 = arith.divf %721, %722 : vector<2x32xf32>
    %724 = vector.extract_strided_slice %414 {offsets = [12, 0], sizes = [2, 32], strides = [1, 1]} : vector<16x32xf32> to vector<2x32xf32>
    %cst_230 = arith.constant dense<0.000000e+00> : vector<2x32xf32>
    %725 = tpu.matmul %699, %427, %cst_230 {dimension_numbers = #tpu.dot_dimension_numbers<[1], [0], [0], [1], [0, 0, 1, 1], [], []>} : vector<2x32xf32>, vector<32x32xf32>, vector<2x32xf32> -> vector<2x32xf32>
    %726 = arith.addf %724, %725 : vector<2x32xf32>
    %727 = math.tanh %726 : vector<2x32xf32>
    %728 = vector.extract_strided_slice %421 {offsets = [12, 0], sizes = [2, 32], strides = [1, 1]} : vector<16x32xf32> to vector<2x32xf32>
    %cst_231 = arith.constant dense<0.000000e+00> : vector<2x32xf32>
    %729 = tpu.matmul %699, %429, %cst_231 {dimension_numbers = #tpu.dot_dimension_numbers<[1], [0], [0], [1], [0, 0, 1, 1], [], []>} : vector<2x32xf32>, vector<32x32xf32>, vector<2x32xf32> -> vector<2x32xf32>
    %730 = arith.addf %728, %729 : vector<2x32xf32>
    %731 = arith.negf %730 : vector<2x32xf32>
    %732 = math.exp %731 : vector<2x32xf32>
    %cst_232 = arith.constant 1.000000e+00 : f32
    %733 = vector.broadcast %cst_232 : f32 to vector<2x32xf32>
    %734 = arith.addf %733, %732 : vector<2x32xf32>
    %735 = arith.divf %733, %734 : vector<2x32xf32>
    %736 = arith.mulf %723, %702 : vector<2x32xf32>
    %737 = arith.mulf %715, %727 : vector<2x32xf32>
    %738 = arith.addf %736, %737 : vector<2x32xf32>
    %739 = math.tanh %738 : vector<2x32xf32>
    %740 = arith.mulf %735, %739 : vector<2x32xf32>
    %c6_i32_233 = arith.constant 6 : i32
    %741 = vector.broadcast %c6_i32_233 : i32 to vector<2x1xi32>
    %742 = arith.cmpi sgt, %11, %741 : vector<2x1xi32>
    %743 = vector.shape_cast %742 : vector<2x1xi1> to vector<2x1xi1>
    %744 = vector.broadcast %743 : vector<2x1xi1> to vector<2x32xi1>
    %745 = arith.select %744, %740, %699 : vector<2x32xi1>, vector<2x32xf32>
    %746 = vector.shape_cast %742 : vector<2x1xi1> to vector<2x1xi1>
    %747 = vector.broadcast %746 : vector<2x1xi1> to vector<2x32xi1>
    %748 = arith.select %747, %738, %702 : vector<2x32xi1>, vector<2x32xf32>
    %cst_234 = arith.constant 0.000000e+00 : f32
    %749 = vector.shape_cast %742 : vector<2x1xi1> to vector<2x1xi1>
    %750 = vector.broadcast %749 : vector<2x1xi1> to vector<2x32xi1>
    %751 = vector.broadcast %cst_234 : f32 to vector<2x32xf32>
    %752 = arith.select %750, %745, %751 : vector<2x32xi1>, vector<2x32xf32>
    %c12_235 = arith.constant 12 : index
    %c0_236 = arith.constant 0 : index
    %753 = vector.load %arg13[%c12_235, %c0_236] : memref<16x32xf32, #tpu.memory_space<vmem>>, vector<2x32xf32>
    tpu.vector_store %arg13[%c12_235, %c0_236], %752 {strides = array<i32>} : memref<16x32xf32, #tpu.memory_space<vmem>>, vector<2x32xf32>,
    %754 = vector.extract_strided_slice %400 {offsets = [14, 0], sizes = [2, 32], strides = [1, 1]} : vector<16x32xf32> to vector<2x32xf32>
    %cst_237 = arith.constant dense<0.000000e+00> : vector<2x32xf32>
    %755 = tpu.matmul %745, %423, %cst_237 {dimension_numbers = #tpu.dot_dimension_numbers<[1], [0], [0], [1], [0, 0, 1, 1], [], []>} : vector<2x32xf32>, vector<32x32xf32>, vector<2x32xf32> -> vector<2x32xf32>
    %756 = arith.addf %754, %755 : vector<2x32xf32>
    %757 = arith.negf %756 : vector<2x32xf32>
    %758 = math.exp %757 : vector<2x32xf32>
    %cst_238 = arith.constant 1.000000e+00 : f32
    %759 = vector.broadcast %cst_238 : f32 to vector<2x32xf32>
    %760 = arith.addf %759, %758 : vector<2x32xf32>
    %761 = arith.divf %759, %760 : vector<2x32xf32>
    %762 = vector.extract_strided_slice %407 {offsets = [14, 0], sizes = [2, 32], strides = [1, 1]} : vector<16x32xf32> to vector<2x32xf32>
    %cst_239 = arith.constant dense<0.000000e+00> : vector<2x32xf32>
    %763 = tpu.matmul %745, %425, %cst_239 {dimension_numbers = #tpu.dot_dimension_numbers<[1], [0], [0], [1], [0, 0, 1, 1], [], []>} : vector<2x32xf32>, vector<32x32xf32>, vector<2x32xf32> -> vector<2x32xf32>
    %764 = arith.addf %762, %763 : vector<2x32xf32>
    %765 = arith.negf %764 : vector<2x32xf32>
    %766 = math.exp %765 : vector<2x32xf32>
    %cst_240 = arith.constant 1.000000e+00 : f32
    %767 = vector.broadcast %cst_240 : f32 to vector<2x32xf32>
    %768 = arith.addf %767, %766 : vector<2x32xf32>
    %769 = arith.divf %767, %768 : vector<2x32xf32>
    %770 = vector.extract_strided_slice %414 {offsets = [14, 0], sizes = [2, 32], strides = [1, 1]} : vector<16x32xf32> to vector<2x32xf32>
    %cst_241 = arith.constant dense<0.000000e+00> : vector<2x32xf32>
    %771 = tpu.matmul %745, %427, %cst_241 {dimension_numbers = #tpu.dot_dimension_numbers<[1], [0], [0], [1], [0, 0, 1, 1], [], []>} : vector<2x32xf32>, vector<32x32xf32>, vector<2x32xf32> -> vector<2x32xf32>
    %772 = arith.addf %770, %771 : vector<2x32xf32>
    %773 = math.tanh %772 : vector<2x32xf32>
    %774 = vector.extract_strided_slice %421 {offsets = [14, 0], sizes = [2, 32], strides = [1, 1]} : vector<16x32xf32> to vector<2x32xf32>
    %cst_242 = arith.constant dense<0.000000e+00> : vector<2x32xf32>
    %775 = tpu.matmul %745, %429, %cst_242 {dimension_numbers = #tpu.dot_dimension_numbers<[1], [0], [0], [1], [0, 0, 1, 1], [], []>} : vector<2x32xf32>, vector<32x32xf32>, vector<2x32xf32> -> vector<2x32xf32>
    %776 = arith.addf %774, %775 : vector<2x32xf32>
    %777 = arith.negf %776 : vector<2x32xf32>
    %778 = math.exp %777 : vector<2x32xf32>
    %cst_243 = arith.constant 1.000000e+00 : f32
    %779 = vector.broadcast %cst_243 : f32 to vector<2x32xf32>
    %780 = arith.addf %779, %778 : vector<2x32xf32>
    %781 = arith.divf %779, %780 : vector<2x32xf32>
    %782 = arith.mulf %769, %748 : vector<2x32xf32>
    %783 = arith.mulf %761, %773 : vector<2x32xf32>
    %784 = arith.addf %782, %783 : vector<2x32xf32>
    %785 = math.tanh %784 : vector<2x32xf32>
    %786 = arith.mulf %781, %785 : vector<2x32xf32>
    %c7_i32_244 = arith.constant 7 : i32
    %787 = vector.broadcast %c7_i32_244 : i32 to vector<2x1xi32>
    %788 = arith.cmpi sgt, %11, %787 : vector<2x1xi32>
    %789 = vector.shape_cast %788 : vector<2x1xi1> to vector<2x1xi1>
    %790 = vector.broadcast %789 : vector<2x1xi1> to vector<2x32xi1>
    %791 = arith.select %790, %786, %745 : vector<2x32xi1>, vector<2x32xf32>
    %792 = vector.shape_cast %788 : vector<2x1xi1> to vector<2x1xi1>
    %793 = vector.broadcast %792 : vector<2x1xi1> to vector<2x32xi1>
    %794 = arith.select %793, %784, %748 : vector<2x32xi1>, vector<2x32xf32>
    %cst_245 = arith.constant 0.000000e+00 : f32
    %795 = vector.shape_cast %788 : vector<2x1xi1> to vector<2x1xi1>
    %796 = vector.broadcast %795 : vector<2x1xi1> to vector<2x32xi1>
    %797 = vector.broadcast %cst_245 : f32 to vector<2x32xf32>
    %798 = arith.select %796, %791, %797 : vector<2x32xi1>, vector<2x32xf32>
    %c14_246 = arith.constant 14 : index
    %c0_247 = arith.constant 0 : index
    %799 = vector.load %arg13[%c14_246, %c0_247] : memref<16x32xf32, #tpu.memory_space<vmem>>, vector<2x32xf32>
    tpu.vector_store %arg13[%c14_246, %c0_247], %798 {strides = array<i32>} : memref<16x32xf32, #tpu.memory_space<vmem>>, vector<2x32xf32>,
    %c1_248 = arith.constant 1 : index
    %c0_249 = arith.constant 0 : index
    %c0_250 = arith.constant 0 : index
    %800 = vector.load %arg11[%c1_248, %c0_249, %c0_250] : memref<2x2x32xf32, #tpu.memory_space<vmem>>, vector<1x2x32xf32>
    %801 = vector.shape_cast %800 : vector<1x2x32xf32> to vector<2x32xf32>
    %802 = vector.shape_cast %791 : vector<2x32xf32> to vector<1x2x32xf32>
    tpu.vector_store %arg11[%c1_248, %c0_249, %c0_250], %802 {strides = array<i32>} : memref<2x2x32xf32, #tpu.memory_space<vmem>>, vector<1x2x32xf32>,
    %c1_251 = arith.constant 1 : index
    %c0_252 = arith.constant 0 : index
    %c0_253 = arith.constant 0 : index
    %803 = vector.load %arg12[%c1_251, %c0_252, %c0_253] : memref<2x2x32xf32, #tpu.memory_space<vmem>>, vector<1x2x32xf32>
    %804 = vector.shape_cast %803 : vector<1x2x32xf32> to vector<2x32xf32>
    %805 = vector.shape_cast %794 : vector<2x32xf32> to vector<1x2x32xf32>
    tpu.vector_store %arg12[%c1_251, %c0_252, %c0_253], %805 {strides = array<i32>} : memref<2x2x32xf32, #tpu.memory_space<vmem>>, vector<1x2x32xf32>,
    %c0_254 = arith.constant 0 : index
    %c0_255 = arith.constant 0 : index
    %806 = vector.load %arg13[%c0_254, %c0_255] : memref<16x32xf32, #tpu.memory_space<vmem>>, vector<16x32xf32>
    %c0_256 = arith.constant 0 : index
    %c0_257 = arith.constant 0 : index
    %807 = vector.load %arg8[%c0_256, %c0_257] : memref<32x16xf32, #tpu.memory_space<vmem>>, vector<32x16xf32>
    %cst_258 = arith.constant dense<0.000000e+00> : vector<16x16xf32>
    %808 = tpu.matmul %806, %807, %cst_258 {dimension_numbers = #tpu.dot_dimension_numbers<[1], [0], [0], [1], [0, 0, 1, 1], [], []>} : vector<16x32xf32>, vector<32x16xf32>, vector<16x16xf32> -> vector<16x16xf32>
    %c0_259 = arith.constant 0 : index
    %c0_260 = arith.constant 0 : index
    %809 = vector.load %arg9[%c0_259, %c0_260] : memref<1x16xf32, #tpu.memory_space<vmem>>, vector<1x16xf32>
    %810 = vector.broadcast %809 : vector<1x16xf32> to vector<16x16xf32>
    %811 = arith.addf %808, %810 : vector<16x16xf32>
    %c0_261 = arith.constant 0 : index
    %c0_262 = arith.constant 0 : index
    %812 = vector.load %arg10[%c0_261, %c0_262] : memref<16x16xf32, #tpu.memory_space<vmem>>, vector<16x16xf32>
    tpu.vector_store %arg10[%c0_261, %c0_262], %811 {strides = array<i32>} : memref<16x16xf32, #tpu.memory_space<vmem>>, vector<16x16xf32>,
    return
  }
}

</mosaic_0001>

<bundles_post_ra>
// kernel: gpt_forward.1
= control target key start
LH: loop header
LB: loop body
LE: loop exit
PB: predicated region body
PF: predicated region fallthrough
CT: control target
= control target key end

     0   :  { %18 = vsyncpa [#allocation5], 0  ;;  %s9588_s0 = inlined_call_operand.vmem [shape: s32[2], index: 0, kind: input, shape index: {}]   ;;  %s9589_s1 = inlined_call_operand.vmem [shape: f32[16,16], index: 1, kind: input, shape index: {}]   ;;  %s9590_s2 = inlined_call_operand.vmem [shape: f32[4,16,32], index: 2, kind: input, shape index: {}]   ;;  %s9591_s3 = inlined_call_operand.vmem [shape: f32[4,32,32], index: 3, kind: input, shape index: {}]   ;;  %s9592_s4 = inlined_call_operand.vmem [shape: f32[4,1,32], index: 4, kind: input, shape index: {}]   ;;  %s9593_s5 = inlined_call_operand.vmem [shape: f32[4,32,32], index: 5, kind: input, shape index: {}]   ;;  %s9594_s6 = inlined_call_operand.vmem [shape: f32[4,32,32], index: 6, kind: input, shape index: {}]   ;;  %s9595_s7 = inlined_call_operand.vmem [shape: f32[4,1,32], index: 7, kind: input, shape index: {}]   ;;  %s9596_s8 = inlined_call_operand.vmem [shape: f32[32,16], index: 8, kind: input, shape index: {}]   ;;  %s9597_s9 = inlined_call_operand.vmem [shape: f32[1,16], index: 9, kind: input, shape index: {}]   ;;  %s9598_s10 = inlined_call_operand.vmem [shape: f32[16,16], index: 10, kind: output, shape index: {0}]   ;;  %s9599_s11 = inlined_call_operand.hbm [shape: f32[2,2,32], index: 11, kind: output, shape index: {1}]   ;;  %s9600_s12 = inlined_call_operand.hbm [shape: f32[2,2,32], index: 12, kind: output, shape index: {2}]  }
   0x1   :  { %19 = vsyncpa [#allocation4], 0 }
   0x2   :  { %20 = vsyncpa [#allocation8], 0  ;;  %s27_s23 = sshll.u32 %s9588_s0, 4  ;;  %s28_s23 = int_to_ptr.vmem [resolvable:$true] %s27_s23 }
   0x3   :  { %s8292_s24 = scalar_lea.vmem %s28_s23, 16  ;;  %p8297_p1 = scmp.lt.s32.totalorder %s28_s23, %s28_s23 }
   0x4   :  { %p8293_p0 = scmp.ne.s32.totalorder %s28_s23, %s8292_s24  ;;  %p8298_p2 = scmp.lt.s32.totalorder %s8292_s24, %s8292_s24 }
   0x6   :  { %p8299_p3 = por %p8298_p2, %p8297_p1 }
   0x8   :  { %p8300_p4 = pnand %p8299_p3, %p8293_p0 }
   0xa   :  { %8303 = shalt.err (!%p8300_p4)
}
   0xb   :  { %s8354_s25 = smov [#allocation3]  }
   0xc   :  { %30 = dma.vmem_to_smem %s28_s23, 16, %s8354_s25, [#allocation5]  }
   0xd   :  { %8348 = dma.done.wait [#allocation5], 16  }
   0xe   :  { %8349 = vsyncadd [#allocation5], 4294967280 }
   0xf   :  { %52 = sfence }
  0x10   :  { %v65_v0 = vld [vmem:[%s9590_s2] sm:$0xff]  ;;  %v66_v1 = vld [vmem:[%s9590_s2 + $0x8] sm:$0xff]  ;;  %vm74_vm0 = vcmask 130048   ;;  %v6259_v7 = vld [vmem:[%s9590_s2 + $0x10] sm:$0xff]  ;;  %v8355_v16 = vmov 0.0|0.0   ;;  %vm8356_vm1 = vmmov 0  }
  0x11   :  { %v6265_v2 = vld [vmem:[%s9590_s2 + $0x20] sm:$0xff]  ;;  %v7588_v3 = vpack.c.bf16 %v66_v1, %v65_v0  ;;  %v6266_v4 = vld [vmem:[%s9590_s2 + $0x28] sm:$0xff]  ;;  %v6260_v8 = vld [vmem:[%s9590_s2 + $0x18] sm:$0xff]  ;;  %v8357_v25 = vmov 0.0   ;;  %s6255_s24 = sld [smem:[#allocation3 + $0x1]]  ;;  %vm433_vm4 = vcmask 261120  }
  0x12   :  { %v63_v5 = vld [vmem:[%s9589_s1] sm:$0xff]  ;;  %v7596_v6 = vpack.c.bf16 %v6266_v4, %v6265_v2  ;;  %v7592_v10 = vpack.c.bf16 %v6260_v8, %v6259_v7  ;;  %v415_v11 = vld [vmem:[%s9591_s3 + $0x8] sm:$0xff]  ;;  %v6271_v12 = vld [vmem:[%s9590_s2 + $0x30] sm:$0xff]  ;;  %vm750_vm5 = vcmask 254976   ;;  %s8359_s14 = smov [#allocation7]  }
  0x13   :  { %6805 = vmatprep.mubr.msk.f32.mxu1 %vm74_vm0, %v63_v5  ;;  %6819 = vmatprep.mubr.msk.f32.mxu0 %vm74_vm0, %v63_v5  ;;  %v414_v9 = vld [vmem:[%s9591_s3] sm:$0xff]  ;;  %v6272_v13 = vld [vmem:[%s9590_s2 + $0x38] sm:$0xff]  ;;  %v64_v14 = vld [vmem:[%s9589_s1 + $0x8] sm:$0xff]  ;;  %s6237_s2 = sshll.u32 %s8359_s14, 4  ;;  %s9546_s2 = int_to_ptr.vmem [resolvable:$true] %s6237_s2 }
  0x14   :  { %7589 = vmatprep.subr.bf16.mxu1 %v7588_v3  ;;  %7597 = vmatprep.subr.bf16.mxu0 %v7596_v6  ;;  %v8468_v15 = vpack.c.bf16 %v415_v11, %v414_v9  ;;  %v7600_v17 = vpack.c.bf16 %v6272_v13, %v6271_v12  ;;  %v416_v18 = vld [vmem:[%s9591_s3 + $0x10] sm:$0xff]  ;;  %v417_v19 = vld [vmem:[%s9591_s3 + $0x18] sm:$0xff]  ;;  %v6277_v21 = vld [vmem:[%s9591_s3 + $0x20] sm:$0xff] }
  0x15   :  { %7591 = vmatpush3.bf16.msra.mxu1 %v7588_v3  ;;  %7599 = vmatpush3.bf16.msra.mxu0 %v7596_v6  ;;  %v8481_v20 = vpack.c.bf16 %v417_v19, %v416_v18  ;;  %v6278_v22 = vld [vmem:[%s9591_s3 + $0x28] sm:$0xff]  ;;  %v6281_v23 = vld [vmem:[%s9591_s3 + $0x40] sm:$0xff]  ;;  %v6279_v28 = vld [vmem:[%s9591_s3 + $0x30] sm:$0xff] }
  0x16   :  { %7593 = vmatprep.subr.bf16.mxu1 %v7592_v10  ;;  %7604 = vmatprep.subr.bf16.mxu0 %v8355_v16  ;;  %v6282_v24 = vld [vmem:[%s9591_s3 + $0x48] sm:$0xff]  ;;  %v8500_v26 = vpack.c.bf16 %v6278_v22, %v6277_v21  ;;  %v6280_v29 = vld [vmem:[%s9591_s3 + $0x38] sm:$0xff]  ;;  %v6283_v30 = vld [vmem:[%s9591_s3 + $0x50] sm:$0xff] }
  0x17   :  { %v8504_v27 = vpack.c.bf16 %v6282_v24, %v6281_v23  ;;  %v6284_v31 = vld [vmem:[%s9591_s3 + $0x58] sm:$0xff]  ;;  %v8522_v32 = vpack.c.bf16 %v6280_v29, %v6279_v28  ;;  %v6285_v34 = vld [vmem:[%s9591_s3 + $0x60] sm:$0xff]  ;;  %v6286_v35 = vld [vmem:[%s9591_s3 + $0x68] sm:$0xff]  ;;  %v53_v24 = vlaneseq }
  0x18   :  { %6806 = vmatmul.mubr.msk.f32.vlgmr.msra.gmra.mrb[0].mxu1 %vm74_vm0, %v64_v14  ;;  %6820 = vmatmul.mubr.msk.f32.vlgmr.msra.gmra.mrb[0].mxu0 %vm74_vm0, %v64_v14  ;;  %v8526_v33 = vpack.c.bf16 %v6284_v31, %v6283_v30  ;;  %v8540_v36 = vpack.c.bf16 %v6286_v35, %v6285_v34  ;;  %v6287_v37 = vld [vmem:[%s9591_s3 + $0x70] sm:$0xff]  ;;  %v6288_v38 = vld [vmem:[%s9591_s3 + $0x78] sm:$0xff]  ;;  %v6256_v40 = vld [vmem:[%s9592_s4] ss:$0 sm:$0xff]  ;;  %v61_v35 = vstv %s6255_s24 }
  0x19   :  { %7595 = vmatpush3.bf16.msra.mxu1 %v7592_v10  ;;  %7606 = vmatpush3.bf16.msra.mxu0 %v8468_v15  ;;  %v8554_v39 = vpack.c.bf16 %v6288_v38, %v6287_v37  ;;  %v6268_v41 = vld [vmem:[%s9592_s4 + $0x2] ss:$0 sm:$0xff]  ;;  %v6262_v46 = vld [vmem:[%s9592_s4 + $0x1] ss:$0 sm:$0xff]  ;;  %v6274_v52 = vld [vmem:[%s9592_s4 + $0x3] ss:$0 sm:$0xff] }
  0x1a   :  { %6812 = vmatprep.mubr.msk.f32.mxu1 %vm74_vm0, %v63_v5  ;;  %7601 = vmatprep.subr.bf16.mxu1 %v7600_v17  ;;  %s56_s4 = sld [smem:[#allocation3]]  ;;  %v54_v30 = vshrl.u32 %v53_v24, 7 }
  0x1b   :  { %7607 = vmatprep.subr.bf16.mxu0 %v8355_v16  ;;  %6837 = vmatprep.mubr.msk.f32.mxu0 %vm8356_vm1, %v8357_v25 }
  0x1c   :  { %6813 = vmatmul.mubr.msk.f32.vlgmr.msra.gmra.mrb[2].mxu1 %vm74_vm0, %v64_v14  ;;  %vm55_vm2 = vcmp.eq.s32.totalorder %v54_v30, 0  ;;  %vm59_vm3 = vcmp.eq.s32.totalorder %v54_v30, 1 }
  0x1d   :  { %7603 = vmatpush3.bf16.msra.mxu1 %v7600_v17  ;;  %6826 = vmatprep.mubr.msk.f32.mxu1 %vm74_vm0, %v63_v5 }
  0x1e   :  { %7609 = vmatpush3.bf16.msra.mxu0 %v8481_v20  ;;  %7610 = vmatprep.subr.bf16.mxu1 %v8355_v16 }
  0x1f   :  { %7616 = vmatprep.subr.bf16.mxu0 %v8355_v16 }
  0x20   :  { %6827 = vmatmul.mubr.msk.f32.vlgmr.msra.gmra.mrb[4].mxu1 %vm74_vm0, %v64_v14  ;;  %v57_v31 = vstv %s56_s4 }
  0x21   :  { %6838 = vmatmul.mubr.f32.vlgmr.msra.gmra.mrb[2].mxu0 %v8357_v25  ;;  %7612 = vmatpush3.bf16.msra.mxu1 %v8500_v26  ;;  %v58_v34 = vsel %vm55_vm2, %v57_v31, 0 }
  0x22   :  { %7618 = vmatpush3.bf16.msra.mxu0 %v8504_v27  ;;  %7613 = vmatprep.subr.bf16.mxu1 %v8355_v16  ;;  %v8609_v38 = vsel %vm59_vm3, %v61_v35, %v58_v34 }
  0x23   :  { %7619 = vmatprep.subr.bf16.mxu0 %v8355_v16  ;;  %6848 = vmatprep.mubr.msk.f32.mxu1 %vm8356_vm1, %v8357_v25  ;;  %vm745_vm6 = vcmp.gt.s32.totalorder %v8609_v38, 0  ;;  %vm1078_vm7 = vcmp.gt.s32.totalorder %v8609_v38, 1  ;;  %vm1416_vm8 = vcmp.gt.s32.totalorder %v8609_v38, 2  ;;  %vm1754_vm9 = vcmp.gt.s32.totalorder %v8609_v38, 3 }
  0x24   :  { %6859 = vmatprep.mubr.msk.f32.mxu0 %vm8356_vm1, %v8357_v25  ;;  %vm2077_vm10 = vcmp.gt.s32.totalorder %v8609_v38, 4  ;;  %vm2409_vm11 = vcmp.gt.s32.totalorder %v8609_v38, 5  ;;  %vm2747_vm12 = vcmp.gt.s32.totalorder %v8609_v38, 6  ;;  %vm3085_vm13 = vcmp.gt.s32.totalorder %v8609_v38, 7 }
  0x25   :  { %7615 = vmatpush3.bf16.msra.mxu1 %v8522_v32 }
  0x26   :  { %7621 = vmatpush3.bf16.msra.mxu0 %v8526_v33  ;;  %7622 = vmatprep.subr.bf16.mxu1 %v8355_v16 }
  0x27   :  { %7628 = vmatprep.subr.bf16.mxu0 %v8355_v16 }
  0x28   :  { %6849 = vmatmul.mubr.f32.vlgmr.msra.gmra.mrb[6].mxu1 %v8357_v25 }
  0x29   :  { %6860 = vmatmul.mubr.f32.vlgmr.msra.gmra.mrb[4].mxu0 %v8357_v25  ;;  %7624 = vmatpush3.bf16.msra.mxu1 %v8540_v36 }
  0x2a   :  { %7625 = vmatprep.subr.bf16.mxu1 %v8355_v16  ;;  %6870 = vmatprep.mubr.msk.f32.mxu1 %vm8356_vm1, %v8357_v25 }
  0x2b   :  { %7630 = vmatpush3.bf16.msra.mxu0 %v8468_v15  ;;  %6881 = vmatprep.mubr.msk.f32.mxu0 %vm8356_vm1, %v8357_v25 }
  0x2c   :  { %7631 = vmatprep.subr.bf16.mxu0 %v8355_v16 }
  0x2d   :  { %7627 = vmatpush3.bf16.msra.mxu1 %v8554_v39 }
  0x2e   :  { %7634 = vmatprep.subr.bf16.mxu1 %v8355_v16 }
  0x2f   :  { %7633 = vmatpush3.bf16.msra.mxu0 %v8481_v20 }
  0x30   :  { %6871 = vmatmul.mubr.f32.vlgmr.msra.gmra.mrb[8].mxu1 %v8357_v25  ;;  %7640 = vmatprep.subr.bf16.mxu0 %v8355_v16 }
  0x31   :  { %7636 = vmatpush3.bf16.msra.mxu1 %v8500_v26  ;;  %6892 = vmatprep.mubr.msk.f32.mxu1 %vm8356_vm1, %v8357_v25 }
  0x32   :  { %7637 = vmatprep.subr.bf16.mxu1 %v8355_v16 }
  0x35   :  { %7639 = vmatpush3.bf16.msra.mxu1 %v8522_v32 }
  0x36   :  { %7646 = vmatprep.subr.bf16.mxu1 %v8355_v16 }
  0xeb   :  { %v6807_v42 = vpop.f32.mrb[0].mxu1  ;;  %v6821_v45 = vpop.f32.mrb[0].mxu0 }
  0xec   :  { %v8580_v43 = vadd.f32 %v6807_v42, %v6256_v40  ;;  %v147_v44 = vpop.f32.mrb[1].mxu1  ;;  %v8585_v47 = vadd.f32 %v6821_v45, %v6268_v41  ;;  %v319_v48 = vpop.f32.mrb[1].mxu0 }
  0xed   :  { %v8592_v53 = vadd.f32 %v6256_v40, %v147_v44  ;;  %v8600_v4 = vadd.f32 %v6268_v41, %v319_v48 }
  0xef   :  { %v6814_v49 = vpop.f32.mrb[2].mxu1 }
  0xf0   :  { %v8587_v50 = vadd.f32 %v6814_v49, %v6262_v46  ;;  %v233_v51 = vpop.f32.mrb[3].mxu1 }
  0xf1   :  { %v8597_v61 = vadd.f32 %v6262_v46, %v233_v51 }
  0xf3   :  { %v6828_v54 = vpop.f32.mrb[4].mxu1 }
  0xf4   :  { %v8594_v55 = vadd.f32 %v6828_v54, %v6274_v52  ;;  %v503_v56 = vpop.f32.mrb[2].mxu0  ;;  %v405_v57 = vpop.f32.mrb[5].mxu1 }
  0xf5   :  { %v507_v58 = vadd.f32 %v503_v56, %v8592_v53  ;;  %v6839_v59 = vpop.f32.mrb[3].mxu0  ;;  %v8603_v6 = vadd.f32 %v6274_v52, %v405_v57 }
  0xf7   :  { %v6289_v60 = vmul.f32 -1.442695, %v507_v58 }
  0xf9   :  { %8036 = vpow2.f32 %v6289_v60 }
  0xfb   :  { %v580_v62 = vpop.f32.mrb[6].mxu1 }
  0xfc   :  { %v584_v63 = vadd.f32 %v580_v62, %v8597_v61  ;;  %v657_v0 = vpop.f32.mrb[4].mxu0  ;;  %v6850_v1 = vpop.f32.mrb[7].mxu1 }
  0xfd   :  { %v6861_v2 = vpop.f32.mrb[5].mxu0  ;;  %v661_v5 = vadd.f32 %v657_v0, %v8600_v4 }
  0xfe   :  { %v6290_v3 = vmul.f32 -1.442695, %v584_v63 }
 0x100   :  { %8038 = vpow2.f32 %v6290_v3 }
 0x101   :  { %8040 = vtanh.f32 %v661_v5 }
 0x103   :  { %v8037_v7 = vpop.eup %8036  ;;  %v729_v8 = vpop.f32.mrb[8].mxu1 }
 0x104   :  { %v511_v9 = vadd.f32 1.0, %v8037_v7  ;;  %v733_v10 = vadd.f32 %v729_v8, %v8603_v6  ;;  %v6872_v11 = vpop.f32.mrb[9].mxu1 }
 0x106   :  { %8042 = vrcp.f32 %v511_v9  ;;  %v6291_v12 = vmul.f32 -1.442695, %v733_v10 }
 0x108   :  { %8044 = vpow2.f32 %v6291_v12 }
 0x10a   :  { %v8039_v13 = vpop.eup %8038 }
 0x10b   :  { %v588_v14 = vadd.f32 1.0, %v8039_v13  ;;  %v8041_v17 = vpop.eup %8040 }
 0x10d   :  { %8046 = vrcp.f32 %v588_v14 }
 0x110   :  { %v8043_v18 = vpop.eup %8042 }
 0x111   :  { %v741_v19 = vmul.f32 %v8043_v18, %v8041_v17 }
 0x112   :  { %v8045_v21 = vpop.eup %8044 }
 0x113   :  { %v737_v23 = vadd.f32 1.0, %v8045_v21 }
 0x115   :  { %8048 = vrcp.f32 %v737_v23 }
 0x117   :  { %v8047_v22 = vpop.eup %8046 }
 0x118   :  { %v740_v28 = vmul.f32 0.0, %v8047_v22 }
 0x11a   :  { %v8606_v29 = vadd.f32 %v741_v19, %v740_v28 }
 0x11c   :  { %8050 = vtanh.f32 %v8606_v29  ;;  %v8657_v10 = vsel %vm745_vm6, %v8606_v29, 0.0 }
 0x11d   :  { %v1071_v14 = vrot.slane %v8657_v10, 6 }
 0x11f   :  { %v8049_v37 = vpop.eup %8048 }
 0x126   :  { %v8051_v40 = vpop.eup %8050 }
 0x127   :  { %v744_v41 = vmul.f32 %v8051_v40, %v8049_v37 }
 0x129   :  { %v8614_v42 = vsel %vm745_vm6, %v744_v41, 0.0 }
 0x12a   :  { %751 = vst.msk [vmem:[#allocation2] sm:$0x3] %vm750_vm5, %v8614_v42  ;;  %6882 = vmatmul.mubr.msk.f32.vlgmr.msra.gmra.mrb[6].mxu0 %vm433_vm4, %v8614_v42  ;;  %6893 = vmatmul.mubr.msk.f32.vlgmr.msra.gmra.mrb[10].mxu1 %vm433_vm4, %v8614_v42 }
 0x12b   :  { %7642 = vmatpush3.bf16.msra.mxu0 %v8504_v27  ;;  %7648 = vmatpush3.bf16.msra.mxu1 %v8540_v36 }
 0x12c   :  { %7643 = vmatprep.subr.bf16.mxu0 %v8355_v16  ;;  %7649 = vmatprep.subr.bf16.mxu1 %v8355_v16 }
 0x12d   :  { %6903 = vmatprep.mubr.msk.f32.mxu0 %vm8356_vm1, %v8357_v25  ;;  %6914 = vmatprep.mubr.msk.f32.mxu1 %vm8356_vm1, %v8357_v25 }
 0x12f   :  { %7645 = vmatpush3.bf16.msra.mxu0 %v8526_v33  ;;  %7651 = vmatpush3.bf16.msra.mxu1 %v8554_v39 }
 0x130   :  { %7652 = vmatprep.subr.bf16.mxu0 %v8355_v16  ;;  %7658 = vmatprep.subr.bf16.mxu1 %v8355_v16 }
 0x132   :  { %6904 = vmatmul.mubr.msk.f32.vlgmr.msra.gmra.mrb[8].mxu0 %vm433_vm4, %v8614_v42  ;;  %6915 = vmatmul.mubr.msk.f32.vlgmr.msra.gmra.mrb[12].mxu1 %vm433_vm4, %v8614_v42 }
 0x133   :  { %7654 = vmatpush3.bf16.msra.mxu0 %v8468_v15  ;;  %7660 = vmatpush3.bf16.msra.mxu1 %v8500_v26 }
 0x134   :  { %7655 = vmatprep.subr.bf16.mxu0 %v8355_v16  ;;  %7661 = vmatprep.subr.bf16.mxu1 %v8355_v16 }
 0x135   :  { %6925 = vmatprep.mubr.msk.f32.mxu0 %vm8356_vm1, %v8357_v25  ;;  %6936 = vmatprep.mubr.msk.f32.mxu1 %vm8356_vm1, %v8357_v25 }
 0x137   :  { %7657 = vmatpush3.bf16.msra.mxu0 %v8481_v20  ;;  %7663 = vmatpush3.bf16.msra.mxu1 %v8522_v32 }
 0x138   :  { %7664 = vmatprep.subr.bf16.mxu0 %v8355_v16  ;;  %7670 = vmatprep.subr.bf16.mxu1 %v8355_v16 }
 0x1fd   :  { %v821_v44 = vpop.f32.mrb[6].mxu0  ;;  %v901_v45 = vpop.f32.mrb[10].mxu1 }
 0x1fe   :  { %v826_v46 = vrot.slane %v821_v44, 6  ;;  %v906_v48 = vrot.slane %v901_v45, 6  ;;  %v6883_v49 = vpop.f32.mrb[7].mxu0  ;;  %v6894_v51 = vpop.f32.mrb[11].mxu1 }
 0x200   :  { %v828_v52 = vadd.f32 %v826_v46, %v8592_v53  ;;  %v908_v54 = vadd.f32 %v906_v48, %v8597_v61 }
 0x202   :  { %v6293_v56 = vmul.f32 -1.442695, %v828_v52  ;;  %v6295_v57 = vmul.f32 -1.442695, %v908_v54 }
 0x204   :  { %8052 = vpow2.f32 %v6293_v56 }
 0x205   :  { %8054 = vpow2.f32 %v6295_v57  ;;  %v981_v58 = vpop.f32.mrb[8].mxu0  ;;  %v1056_v59 = vpop.f32.mrb[12].mxu1 }
 0x206   :  { %v1061_v60 = vrot.slane %v1056_v59, 6  ;;  %v6905_v62 = vpop.f32.mrb[9].mxu0  ;;  %v6916_v63 = vpop.f32.mrb[13].mxu1  ;;  %v986_v0 = vrot.slane %v981_v58, 6 }
 0x208   :  { %v1063_v1 = vadd.f32 %v1061_v60, %v8603_v6  ;;  %v988_v3 = vadd.f32 %v986_v0, %v8600_v4 }
 0x20a   :  { %v6298_v2 = vmul.f32 -1.442695, %v1063_v1 }
 0x20c   :  { %8056 = vpow2.f32 %v6298_v2 }
 0x20d   :  { %8058 = vtanh.f32 %v988_v3 }
 0x20e   :  { %v8053_v5 = vpop.eup %8052 }
 0x20f   :  { %v8055_v7 = vpop.eup %8054  ;;  %v832_v8 = vadd.f32 1.0, %v8053_v5 }
 0x210   :  { %v912_v9 = vadd.f32 1.0, %v8055_v7 }
 0x211   :  { %8060 = vrcp.f32 %v832_v8 }
 0x212   :  { %8062 = vrcp.f32 %v912_v9 }
 0x216   :  { %v8057_v11 = vpop.eup %8056 }
 0x217   :  { %v8059_v12 = vpop.eup %8058  ;;  %v1067_v19 = vadd.f32 1.0, %v8057_v11 }
 0x219   :  { %8064 = vrcp.f32 %v1067_v19 }
 0x21b   :  { %v8061_v13 = vpop.eup %8060 }
 0x21c   :  { %v8063_v17 = vpop.eup %8062  ;;  %v1074_v18 = vmul.f32 %v8061_v13, %v8059_v12 }
 0x21d   :  { %v1073_v21 = vmul.f32 %v8063_v17, %v1071_v14 }
 0x21f   :  { %v8660_v22 = vadd.f32 %v1074_v18, %v1073_v21 }
 0x221   :  { %8066 = vtanh.f32 %v8660_v22  ;;  %v1086_v1 = vrot.slane %v8660_v22, 2 }
 0x223   :  { %v8065_v23 = vpop.eup %8064  ;;  %v8711_v2 = vsel %vm1078_vm7, %v1086_v1, %v8657_v10 }
 0x224   :  { %v1409_v8 = vrot.slane %v8711_v2, 4 }
 0x22b   :  { %v8067_v24 = vpop.eup %8066 }
 0x22c   :  { %v1077_v28 = vmul.f32 %v8067_v24, %v8065_v23 }
 0x22e   :  { %v1082_v30 = vrot.slane %v1077_v28, 2 }
 0x230   :  { %v8667_v29 = vsel %vm1078_vm7, %v1082_v30, %v8614_v42 }
 0x231   :  { %1089 = vst.msk [vmem:[#allocation2 + $0x2] sm:$0x3] %vm750_vm5, %v8667_v29  ;;  %6926 = vmatmul.mubr.msk.f32.vlgmr.msra.gmra.mrb[10].mxu0 %vm433_vm4, %v8667_v29  ;;  %6937 = vmatmul.mubr.msk.f32.vlgmr.msra.gmra.mrb[14].mxu1 %vm433_vm4, %v8667_v29 }
 0x232   :  { %7666 = vmatpush3.bf16.msra.mxu0 %v8504_v27  ;;  %7672 = vmatpush3.bf16.msra.mxu1 %v8540_v36 }
 0x233   :  { %7667 = vmatprep.subr.bf16.mxu0 %v8355_v16  ;;  %7673 = vmatprep.subr.bf16.mxu1 %v8355_v16 }
 0x234   :  { %6947 = vmatprep.mubr.msk.f32.mxu0 %vm8356_vm1, %v8357_v25  ;;  %6958 = vmatprep.mubr.msk.f32.mxu1 %vm8356_vm1, %v8357_v25 }
 0x236   :  { %7669 = vmatpush3.bf16.msra.mxu0 %v8526_v33  ;;  %7675 = vmatpush3.bf16.msra.mxu1 %v8554_v39 }
 0x237   :  { %7676 = vmatprep.subr.bf16.mxu0 %v8355_v16  ;;  %7682 = vmatprep.subr.bf16.mxu1 %v8355_v16 }
 0x239   :  { %6948 = vmatmul.mubr.msk.f32.vlgmr.msra.gmra.mrb[12].mxu0 %vm433_vm4, %v8667_v29  ;;  %6959 = vmatmul.mubr.msk.f32.vlgmr.msra.gmra.mrb[16].mxu1 %vm433_vm4, %v8667_v29 }
 0x23a   :  { %7678 = vmatpush3.bf16.msra.mxu0 %v8468_v15  ;;  %7684 = vmatpush3.bf16.msra.mxu1 %v8500_v26 }
 0x23b   :  { %7679 = vmatprep.subr.bf16.mxu0 %v8355_v16  ;;  %7685 = vmatprep.subr.bf16.mxu1 %v8355_v16 }
 0x23c   :  { %6969 = vmatprep.mubr.msk.f32.mxu0 %vm8356_vm1, %v8357_v25  ;;  %6980 = vmatprep.mubr.msk.f32.mxu1 %vm8356_vm1, %v8357_v25 }
 0x23e   :  { %7681 = vmatpush3.bf16.msra.mxu0 %v8481_v20  ;;  %7687 = vmatpush3.bf16.msra.mxu1 %v8522_v32 }
 0x23f   :  { %7688 = vmatprep.subr.bf16.mxu0 %v8355_v16  ;;  %7694 = vmatprep.subr.bf16.mxu1 %v8355_v16 }
 0x304   :  { %v1159_v31 = vpop.f32.mrb[10].mxu0  ;;  %v1239_v34 = vpop.f32.mrb[14].mxu1 }
 0x305   :  { %v1164_v35 = vrot.slane %v1159_v31, 4  ;;  %v1244_v37 = vrot.slane %v1239_v34, 4  ;;  %v6927_v40 = vpop.f32.mrb[11].mxu0  ;;  %v6938_v41 = vpop.f32.mrb[15].mxu1 }
 0x307   :  { %v1166_v42 = vadd.f32 %v1164_v35, %v8592_v53  ;;  %v1246_v44 = vadd.f32 %v1244_v37, %v8597_v61 }
 0x309   :  { %v6300_v45 = vmul.f32 -1.442695, %v1166_v42  ;;  %v6302_v46 = vmul.f32 -1.442695, %v1246_v44 }
 0x30b   :  { %8068 = vpow2.f32 %v6300_v45 }
 0x30c   :  { %8070 = vpow2.f32 %v6302_v46  ;;  %v1319_v48 = vpop.f32.mrb[12].mxu0  ;;  %v1394_v49 = vpop.f32.mrb[16].mxu1 }
 0x30d   :  { %v1399_v51 = vrot.slane %v1394_v49, 4  ;;  %v6949_v52 = vpop.f32.mrb[13].mxu0  ;;  %v6960_v54 = vpop.f32.mrb[17].mxu1  ;;  %v1324_v56 = vrot.slane %v1319_v48, 4 }
 0x30f   :  { %v1401_v57 = vadd.f32 %v1399_v51, %v8603_v6  ;;  %v1326_v59 = vadd.f32 %v1324_v56, %v8600_v4 }
 0x311   :  { %v6305_v58 = vmul.f32 -1.442695, %v1401_v57 }
 0x313   :  { %8072 = vpow2.f32 %v6305_v58 }
 0x314   :  { %8074 = vtanh.f32 %v1326_v59 }
 0x315   :  { %v8069_v60 = vpop.eup %8068 }
 0x316   :  { %v8071_v62 = vpop.eup %8070  ;;  %v1170_v63 = vadd.f32 1.0, %v8069_v60 }
 0x317   :  { %v1250_v0 = vadd.f32 1.0, %v8071_v62 }
 0x318   :  { %8076 = vrcp.f32 %v1170_v63 }
 0x319   :  { %8078 = vrcp.f32 %v1250_v0 }
 0x31d   :  { %v8073_v3 = vpop.eup %8072 }
 0x31e   :  { %v8075_v5 = vpop.eup %8074  ;;  %v1405_v12 = vadd.f32 1.0, %v8073_v3 }
 0x320   :  { %8080 = vrcp.f32 %v1405_v12 }
 0x322   :  { %v8077_v7 = vpop.eup %8076 }
 0x323   :  { %v8079_v9 = vpop.eup %8078  ;;  %v1412_v11 = vmul.f32 %v8077_v7, %v8075_v5 }
 0x324   :  { %v1411_v13 = vmul.f32 %v8079_v9, %v1409_v8 }
 0x326   :  { %v8714_v14 = vadd.f32 %v1412_v11, %v1411_v13 }
 0x328   :  { %8082 = vtanh.f32 %v8714_v14  ;;  %v1424_v56 = vrot.slane %v8714_v14, 4 }
 0x32a   :  { %v8081_v17 = vpop.eup %8080  ;;  %v8765_v57 = vsel %vm1416_vm8, %v1424_v56, %v8711_v2 }
 0x332   :  { %v8083_v18 = vpop.eup %8082 }
 0x333   :  { %v1415_v19 = vmul.f32 %v8083_v18, %v8081_v17 }
 0x335   :  { %v1420_v21 = vrot.slane %v1415_v19, 4 }
 0x337   :  { %v8721_v10 = vsel %vm1416_vm8, %v1420_v21, %v8667_v29 }
 0x338   :  { %1427 = vst.msk [vmem:[#allocation2 + $0x4] sm:$0x3] %vm750_vm5, %v8721_v10  ;;  %6970 = vmatmul.mubr.msk.f32.vlgmr.msra.gmra.mrb[14].mxu0 %vm433_vm4, %v8721_v10  ;;  %6981 = vmatmul.mubr.msk.f32.vlgmr.msra.gmra.mrb[18].mxu1 %vm433_vm4, %v8721_v10 }
 0x339   :  { %7690 = vmatpush3.bf16.msra.mxu0 %v8504_v27  ;;  %7696 = vmatpush3.bf16.msra.mxu1 %v8540_v36 }
 0x33a   :  { %7691 = vmatprep.subr.bf16.mxu0 %v8355_v16  ;;  %7697 = vmatprep.subr.bf16.mxu1 %v8355_v16 }
 0x33b   :  { %6991 = vmatprep.mubr.msk.f32.mxu0 %vm8356_vm1, %v8357_v25  ;;  %7002 = vmatprep.mubr.msk.f32.mxu1 %vm8356_vm1, %v8357_v25 }
 0x33d   :  { %7693 = vmatpush3.bf16.msra.mxu0 %v8526_v33  ;;  %7699 = vmatpush3.bf16.msra.mxu1 %v8554_v39 }
 0x33e   :  { %7700 = vmatprep.subr.bf16.mxu0 %v8355_v16  ;;  %7706 = vmatprep.subr.bf16.mxu1 %v8355_v16 }
 0x340   :  { %6992 = vmatmul.mubr.msk.f32.vlgmr.msra.gmra.mrb[16].mxu0 %vm433_vm4, %v8721_v10  ;;  %7003 = vmatmul.mubr.msk.f32.vlgmr.msra.gmra.mrb[20].mxu1 %vm433_vm4, %v8721_v10 }
 0x341   :  { %7702 = vmatpush3.bf16.msra.mxu0 %v8468_v15  ;;  %7708 = vmatpush3.bf16.msra.mxu1 %v8500_v26 }
 0x342   :  { %7703 = vmatprep.subr.bf16.mxu0 %v8355_v16  ;;  %7709 = vmatprep.subr.bf16.mxu1 %v8355_v16 }
 0x343   :  { %7013 = vmatprep.mubr.msk.f32.mxu0 %vm8356_vm1, %v8357_v25  ;;  %7024 = vmatprep.mubr.msk.f32.mxu1 %vm8356_vm1, %v8357_v25 }
 0x345   :  { %7705 = vmatpush3.bf16.msra.mxu0 %v8481_v20  ;;  %7711 = vmatpush3.bf16.msra.mxu1 %v8522_v32 }
 0x346   :  { %7712 = vmatprep.subr.bf16.mxu0 %v8355_v16  ;;  %7718 = vmatprep.subr.bf16.mxu1 %v8355_v16 }
 0x40b   :  { %v1497_v22 = vpop.f32.mrb[14].mxu0  ;;  %v1577_v23 = vpop.f32.mrb[18].mxu1 }
 0x40c   :  { %v1502_v24 = vrot.slane %v1497_v22, 2  ;;  %v1582_v28 = vrot.slane %v1577_v23, 2  ;;  %v6971_v30 = vpop.f32.mrb[15].mxu0  ;;  %v6982_v29 = vpop.f32.mrb[19].mxu1 }
 0x40e   :  { %v1504_v31 = vadd.f32 %v1502_v24, %v8592_v53  ;;  %v1584_v34 = vadd.f32 %v1582_v28, %v8597_v61 }
 0x410   :  { %v6307_v35 = vmul.f32 -1.442695, %v1504_v31  ;;  %v6309_v37 = vmul.f32 -1.442695, %v1584_v34 }
 0x412   :  { %8084 = vpow2.f32 %v6307_v35 }
 0x413   :  { %8086 = vpow2.f32 %v6309_v37  ;;  %v1657_v40 = vpop.f32.mrb[16].mxu0  ;;  %v1732_v41 = vpop.f32.mrb[20].mxu1 }
 0x414   :  { %v1737_v42 = vrot.slane %v1732_v41, 2  ;;  %v6993_v44 = vpop.f32.mrb[17].mxu0  ;;  %v7004_v45 = vpop.f32.mrb[21].mxu1  ;;  %v1662_v46 = vrot.slane %v1657_v40, 2 }
 0x416   :  { %v1739_v48 = vadd.f32 %v1737_v42, %v8603_v6  ;;  %v1664_v51 = vadd.f32 %v1662_v46, %v8600_v4  ;;  %v1747_v4 = vrot.slane %v8765_v57, 2 }
 0x418   :  { %v6312_v49 = vmul.f32 -1.442695, %v1739_v48 }
 0x41a   :  { %8088 = vpow2.f32 %v6312_v49 }
 0x41b   :  { %8090 = vtanh.f32 %v1664_v51 }
 0x41c   :  { %v8085_v52 = vpop.eup %8084 }
 0x41d   :  { %v8087_v54 = vpop.eup %8086  ;;  %v1508_v53 = vadd.f32 1.0, %v8085_v52 }
 0x41e   :  { %v1588_v61 = vadd.f32 1.0, %v8087_v54 }
 0x41f   :  { %8092 = vrcp.f32 %v1508_v53 }
 0x420   :  { %8094 = vrcp.f32 %v1588_v61 }
 0x424   :  { %v8089_v58 = vpop.eup %8088 }
 0x425   :  { %v8091_v6 = vpop.eup %8090  ;;  %v1743_v63 = vadd.f32 1.0, %v8089_v58 }
 0x427   :  { %8096 = vrcp.f32 %v1743_v63 }
 0x429   :  { %v8093_v59 = vpop.eup %8092 }
 0x42a   :  { %v8095_v60 = vpop.eup %8094  ;;  %v1750_v62 = vmul.f32 %v8093_v59, %v8091_v6 }
 0x42b   :  { %v1749_v0 = vmul.f32 %v8095_v60, %v1747_v4 }
 0x42d   :  { %v8768_v1 = vadd.f32 %v1750_v62, %v1749_v0 }
 0x42f   :  { %8098 = vtanh.f32 %v8768_v1  ;;  %v1762_v37 = vrot.slane %v8768_v1, 6 }
 0x431   :  { %v8097_v3 = vpop.eup %8096  ;;  %v1764_v45 = vsel %vm1754_vm9, %v1762_v37, %v8765_v57 }
 0x439   :  { %v8099_v5 = vpop.eup %8098 }
 0x43a   :  { %v1753_v7 = vmul.f32 %v8099_v5, %v8097_v3 }
 0x43c   :  { %v1758_v8 = vrot.slane %v1753_v7, 6 }
 0x43e   :  { %v8775_v2 = vsel %vm1754_vm9, %v1758_v8, %v8721_v10 }
 0x43f   :  { %1765 = vst.msk [vmem:[#allocation2 + $0x6] sm:$0x3] %vm750_vm5, %v8775_v2  ;;  %7014 = vmatmul.mubr.msk.f32.vlgmr.msra.gmra.mrb[18].mxu0 %vm433_vm4, %v8775_v2  ;;  %7025 = vmatmul.mubr.msk.f32.vlgmr.msra.gmra.mrb[22].mxu1 %vm433_vm4, %v8775_v2 }
 0x440   :  { %7714 = vmatpush3.bf16.msra.mxu0 %v8504_v27  ;;  %7720 = vmatpush3.bf16.msra.mxu1 %v8540_v36 }
 0x441   :  { %7715 = vmatprep.subr.bf16.mxu0 %v8355_v16  ;;  %7721 = vmatprep.subr.bf16.mxu1 %v8355_v16 }
 0x442   :  { %7035 = vmatprep.mubr.msk.f32.mxu0 %vm8356_vm1, %v8357_v25  ;;  %7046 = vmatprep.mubr.msk.f32.mxu1 %vm8356_vm1, %v8357_v25 }
 0x444   :  { %7717 = vmatpush3.bf16.msra.mxu0 %v8526_v33  ;;  %7723 = vmatpush3.bf16.msra.mxu1 %v8554_v39 }
 0x445   :  { %7724 = vmatprep.subr.bf16.mxu0 %v8355_v16  ;;  %7730 = vmatprep.subr.bf16.mxu1 %v8355_v16 }
 0x447   :  { %7036 = vmatmul.mubr.msk.f32.vlgmr.msra.gmra.mrb[20].mxu0 %vm433_vm4, %v8775_v2  ;;  %7047 = vmatmul.mubr.msk.f32.vlgmr.msra.gmra.mrb[24].mxu1 %vm433_vm4, %v8775_v2 }
 0x448   :  { %7726 = vmatpush3.bf16.msra.mxu0 %v8468_v15  ;;  %7732 = vmatpush3.bf16.msra.mxu1 %v8500_v26 }
 0x449   :  { %7727 = vmatprep.subr.bf16.mxu0 %v8355_v16  ;;  %7733 = vmatprep.subr.bf16.mxu1 %v8355_v16 }
 0x44a   :  { %7057 = vmatprep.mubr.msk.f32.mxu0 %vm8356_vm1, %v8357_v25  ;;  %7068 = vmatprep.mubr.msk.f32.mxu1 %vm8356_vm1, %v8357_v25 }
 0x44c   :  { %7729 = vmatpush3.bf16.msra.mxu0 %v8481_v20  ;;  %7735 = vmatpush3.bf16.msra.mxu1 %v8522_v32 }
 0x44d   :  { %7736 = vmatprep.subr.bf16.mxu0 %v8355_v16  ;;  %7742 = vmatprep.subr.bf16.mxu1 %v8355_v16 }
 0x512   :  { %v1835_v9 = vpop.f32.mrb[18].mxu0  ;;  %v1912_v11 = vpop.f32.mrb[22].mxu1 }
 0x513   :  { %v1839_v12 = vadd.f32 %v1835_v9, %v8580_v43  ;;  %v1916_v13 = vadd.f32 %v1912_v11, %v8587_v50  ;;  %v7015_v14 = vpop.f32.mrb[19].mxu0  ;;  %v7026_v17 = vpop.f32.mrb[23].mxu1 }
 0x515   :  { %v6314_v18 = vmul.f32 -1.442695, %v1839_v12  ;;  %v6316_v19 = vmul.f32 -1.442695, %v1916_v13 }
 0x517   :  { %8100 = vpow2.f32 %v6314_v18 }
 0x518   :  { %8102 = vpow2.f32 %v6316_v19 }
 0x51a   :  { %v1989_v21 = vpop.f32.mrb[20].mxu0  ;;  %v2061_v10 = vpop.f32.mrb[24].mxu1 }
 0x51b   :  { %v2065_v22 = vadd.f32 %v2061_v10, %v8594_v55  ;;  %v7037_v23 = vpop.f32.mrb[21].mxu0  ;;  %v7048_v24 = vpop.f32.mrb[25].mxu1  ;;  %v1993_v30 = vadd.f32 %v1989_v21, %v8585_v47 }
 0x51d   :  { %v6319_v28 = vmul.f32 -1.442695, %v2065_v22 }
 0x51f   :  { %8104 = vpow2.f32 %v6319_v28 }
 0x520   :  { %8106 = vtanh.f32 %v1993_v30 }
 0x521   :  { %v8101_v29 = vpop.eup %8100 }
 0x522   :  { %v8103_v31 = vpop.eup %8102  ;;  %v1843_v34 = vadd.f32 1.0, %v8101_v29 }
 0x523   :  { %v1920_v35 = vadd.f32 1.0, %v8103_v31 }
 0x524   :  { %8108 = vrcp.f32 %v1843_v34 }
 0x525   :  { %8110 = vrcp.f32 %v1920_v35 }
 0x529   :  { %v8105_v40 = vpop.eup %8104 }
 0x52a   :  { %v8107_v41 = vpop.eup %8106  ;;  %v2069_v48 = vadd.f32 1.0, %v8105_v40 }
 0x52c   :  { %8112 = vrcp.f32 %v2069_v48 }
 0x52e   :  { %v8109_v42 = vpop.eup %8108 }
 0x52f   :  { %v8111_v44 = vpop.eup %8110  ;;  %v2073_v46 = vmul.f32 %v8109_v42, %v8107_v41 }
 0x530   :  { %v2072_v49 = vmul.f32 %v8111_v44, %v1764_v45 }
 0x532   :  { %v2074_v51 = vadd.f32 %v2073_v46, %v2072_v49 }
 0x534   :  { %8114 = vtanh.f32 %v2074_v51  ;;  %v8822_v52 = vsel %vm2077_vm10, %v2074_v51, %v1764_v45 }
 0x535   :  { %v2402_v23 = vrot.slane %v8822_v52, 6 }
 0x536   :  { %v8113_v54 = vpop.eup %8112 }
 0x53e   :  { %v8115_v53 = vpop.eup %8114 }
 0x53f   :  { %v2076_v61 = vmul.f32 %v8115_v53, %v8113_v54 }
 0x541   :  { %v8827_v56 = vsel %vm2077_vm10, %v2076_v61, %v8775_v2 }
 0x542   :  { %2082 = vst.msk [vmem:[#allocation2 + $0x8] sm:$0x3] %vm750_vm5, %v8827_v56  ;;  %7058 = vmatmul.mubr.msk.f32.vlgmr.msra.gmra.mrb[22].mxu0 %vm433_vm4, %v8827_v56  ;;  %7069 = vmatmul.mubr.msk.f32.vlgmr.msra.gmra.mrb[26].mxu1 %vm433_vm4, %v8827_v56 }
 0x543   :  { %7738 = vmatpush3.bf16.msra.mxu0 %v8504_v27  ;;  %7744 = vmatpush3.bf16.msra.mxu1 %v8540_v36 }
 0x544   :  { %7739 = vmatprep.subr.bf16.mxu0 %v8355_v16  ;;  %7745 = vmatprep.subr.bf16.mxu1 %v8355_v16 }
 0x545   :  { %7079 = vmatprep.mubr.msk.f32.mxu0 %vm8356_vm1, %v8357_v25  ;;  %7090 = vmatprep.mubr.msk.f32.mxu1 %vm8356_vm1, %v8357_v25 }
 0x547   :  { %7741 = vmatpush3.bf16.msra.mxu0 %v8526_v33  ;;  %7747 = vmatpush3.bf16.msra.mxu1 %v8554_v39 }
 0x548   :  { %7748 = vmatprep.subr.bf16.mxu0 %v8355_v16  ;;  %7754 = vmatprep.subr.bf16.mxu1 %v8355_v16 }
 0x54a   :  { %7080 = vmatmul.mubr.msk.f32.vlgmr.msra.gmra.mrb[24].mxu0 %vm433_vm4, %v8827_v56  ;;  %7091 = vmatmul.mubr.msk.f32.vlgmr.msra.gmra.mrb[28].mxu1 %vm433_vm4, %v8827_v56 }
 0x54b   :  { %7750 = vmatpush3.bf16.msra.mxu0 %v8468_v15  ;;  %7756 = vmatpush3.bf16.msra.mxu1 %v8500_v26 }
 0x54c   :  { %7751 = vmatprep.subr.bf16.mxu0 %v8355_v16  ;;  %7757 = vmatprep.subr.bf16.mxu1 %v8355_v16 }
 0x54d   :  { %7101 = vmatprep.mubr.msk.f32.mxu0 %vm8356_vm1, %v8357_v25  ;;  %7112 = vmatprep.mubr.msk.f32.mxu1 %vm8356_vm1, %v8357_v25 }
 0x54f   :  { %7753 = vmatpush3.bf16.msra.mxu0 %v8481_v20  ;;  %7759 = vmatpush3.bf16.msra.mxu1 %v8522_v32 }
 0x550   :  { %7760 = vmatprep.subr.bf16.mxu0 %v8355_v16  ;;  %7766 = vmatprep.subr.bf16.mxu1 %v8355_v16 }
 0x615   :  { %v2152_v57 = vpop.f32.mrb[22].mxu0  ;;  %v2232_v58 = vpop.f32.mrb[26].mxu1 }
 0x616   :  { %v2157_v6 = vrot.slane %v2152_v57, 6  ;;  %v2237_v59 = vrot.slane %v2232_v58, 6  ;;  %v7059_v4 = vpop.f32.mrb[23].mxu0  ;;  %v7070_v60 = vpop.f32.mrb[27].mxu1 }
 0x618   :  { %v2159_v62 = vadd.f32 %v2157_v6, %v8580_v43  ;;  %v2239_v63 = vadd.f32 %v2237_v59, %v8587_v50 }
 0x61a   :  { %v6321_v0 = vmul.f32 -1.442695, %v2159_v62  ;;  %v6323_v1 = vmul.f32 -1.442695, %v2239_v63 }
 0x61c   :  { %8116 = vpow2.f32 %v6321_v0 }
 0x61d   :  { %8118 = vpow2.f32 %v6323_v1  ;;  %v2312_v3 = vpop.f32.mrb[24].mxu0  ;;  %v2387_v5 = vpop.f32.mrb[28].mxu1 }
 0x61e   :  { %v2392_v7 = vrot.slane %v2387_v5, 6  ;;  %v7081_v8 = vpop.f32.mrb[25].mxu0  ;;  %v7092_v2 = vpop.f32.mrb[29].mxu1  ;;  %v2317_v9 = vrot.slane %v2312_v3, 6 }
 0x620   :  { %v2394_v11 = vadd.f32 %v2392_v7, %v8594_v55  ;;  %v2319_v13 = vadd.f32 %v2317_v9, %v8585_v47 }
 0x622   :  { %v6326_v12 = vmul.f32 -1.442695, %v2394_v11 }
 0x624   :  { %8120 = vpow2.f32 %v6326_v12 }
 0x625   :  { %8122 = vtanh.f32 %v2319_v13 }
 0x626   :  { %v8117_v14 = vpop.eup %8116 }
 0x627   :  { %v8119_v17 = vpop.eup %8118  ;;  %v2163_v18 = vadd.f32 1.0, %v8117_v14 }
 0x628   :  { %v2243_v19 = vadd.f32 1.0, %v8119_v17 }
 0x629   :  { %8124 = vrcp.f32 %v2163_v18 }
 0x62a   :  { %8126 = vrcp.f32 %v2243_v19 }
 0x62e   :  { %v8121_v21 = vpop.eup %8120 }
 0x62f   :  { %v8123_v10 = vpop.eup %8122  ;;  %v2398_v30 = vadd.f32 1.0, %v8121_v21 }
 0x631   :  { %8128 = vrcp.f32 %v2398_v30 }
 0x633   :  { %v8125_v22 = vpop.eup %8124 }
 0x634   :  { %v8127_v24 = vpop.eup %8126  ;;  %v2405_v28 = vmul.f32 %v8125_v22, %v8123_v10  ;;  %v6345_v10 = vld [vmem:[%s9593_s5 + $0x28] sm:$0xff] }
 0x635   :  { %v2404_v29 = vmul.f32 %v8127_v24, %v2402_v23  ;;  %v3103_v23 = vld [vmem:[%s9593_s5 + $0x10] sm:$0xff]  ;;  %v3104_v24 = vld [vmem:[%s9593_s5 + $0x18] sm:$0xff] }
 0x636   :  { %v7800_v30 = vpack.c.bf16 %v3104_v24, %v3103_v23  ;;  %v3457_v23 = vld [vmem:[%s9594_s6] sm:$0xff]  ;;  %v3458_v24 = vld [vmem:[%s9594_s6 + $0x8] sm:$0xff] }
 0x637   :  { %v8868_v31 = vadd.f32 %v2405_v28, %v2404_v29  ;;  %v6346_v28 = vld [vmem:[%s9593_s5 + $0x30] sm:$0xff]  ;;  %v6347_v29 = vld [vmem:[%s9593_s5 + $0x38] sm:$0xff] }
 0x639   :  { %8130 = vtanh.f32 %v8868_v31  ;;  %v2417_v0 = vrot.slane %v8868_v31, 2  ;;  %v6352_v31 = vld [vmem:[%s9593_s5 + $0x40] sm:$0xff] }
 0x63b   :  { %v8129_v34 = vpop.eup %8128  ;;  %v8919_v1 = vsel %vm2409_vm11, %v2417_v0, %v8822_v52 }
 0x63c   :  { %v2740_v8 = vrot.slane %v8919_v1, 4 }
 0x643   :  { %v8131_v35 = vpop.eup %8130 }
 0x644   :  { %v2408_v37 = vmul.f32 %v8131_v35, %v8129_v34  ;;  %v6353_v34 = vld [vmem:[%s9593_s5 + $0x48] sm:$0xff]  ;;  %v7808_v35 = vpack.c.bf16 %v6347_v29, %v6346_v28  ;;  %v6368_v28 = vld [vmem:[%s9594_s6 + $0x20] sm:$0xff]  ;;  %v9048_v29 = vpack.c.bf16 %v3458_v24, %v3457_v23 }
 0x646   :  { %v2413_v40 = vrot.slane %v2408_v37, 2  ;;  %v8987_v37 = vpack.c.bf16 %v6353_v34, %v6352_v31  ;;  %v3460_v34 = vld [vmem:[%s9594_s6 + $0x18] sm:$0xff] }
 0x648   :  { %v8875_v41 = vsel %vm2409_vm11, %v2413_v40, %v8827_v56  ;;  %v6360_v40 = vld [vmem:[%s9593_s5 + $0x60] sm:$0xff] }
 0x649   :  { %2420 = vst.msk [vmem:[#allocation2 + $0xa] sm:$0x3] %vm750_vm5, %v8875_v41  ;;  %7102 = vmatmul.mubr.msk.f32.vlgmr.msra.gmra.mrb[26].mxu0 %vm433_vm4, %v8875_v41  ;;  %7113 = vmatmul.mubr.msk.f32.vlgmr.msra.gmra.mrb[30].mxu1 %vm433_vm4, %v8875_v41 }
 0x64a   :  { %7762 = vmatpush3.bf16.msra.mxu0 %v8504_v27  ;;  %7768 = vmatpush3.bf16.msra.mxu1 %v8540_v36 }
 0x64b   :  { %7763 = vmatprep.subr.bf16.mxu0 %v8355_v16  ;;  %7769 = vmatprep.subr.bf16.mxu1 %v8355_v16 }
 0x64c   :  { %7123 = vmatprep.mubr.msk.f32.mxu0 %vm8356_vm1, %v8357_v25  ;;  %7134 = vmatprep.mubr.msk.f32.mxu1 %vm8356_vm1, %v8357_v25 }
 0x64e   :  { %7765 = vmatpush3.bf16.msra.mxu0 %v8526_v33  ;;  %7771 = vmatpush3.bf16.msra.mxu1 %v8554_v39 }
 0x64f   :  { %7772 = vmatprep.subr.bf16.mxu0 %v8355_v16  ;;  %7778 = vmatprep.subr.bf16.mxu1 %v8355_v16 }
 0x651   :  { %7124 = vmatmul.mubr.msk.f32.vlgmr.msra.gmra.mrb[28].mxu0 %vm433_vm4, %v8875_v41  ;;  %7135 = vmatmul.mubr.msk.f32.vlgmr.msra.gmra.mrb[32].mxu1 %vm433_vm4, %v8875_v41 }
 0x652   :  { %7774 = vmatpush3.bf16.msra.mxu0 %v8468_v15  ;;  %7780 = vmatpush3.bf16.msra.mxu1 %v8500_v26 }
 0x653   :  { %7775 = vmatprep.subr.bf16.mxu0 %v8355_v16  ;;  %7781 = vmatprep.subr.bf16.mxu1 %v8355_v16 }
 0x654   :  { %7145 = vmatprep.mubr.msk.f32.mxu0 %vm8356_vm1, %v8357_v25  ;;  %7156 = vmatprep.mubr.msk.f32.mxu1 %vm8356_vm1, %v8357_v25 }
 0x656   :  { %7777 = vmatpush3.bf16.msra.mxu0 %v8481_v20  ;;  %7783 = vmatpush3.bf16.msra.mxu1 %v8522_v32 }
 0x657   :  { %7784 = vmatprep.subr.bf16.mxu0 %v8355_v16  ;;  %7790 = vmatprep.subr.bf16.mxu1 %v8355_v16 }
 0x71c   :  { %v2490_v15 = vpop.f32.mrb[26].mxu0  ;;  %v2570_v26 = vpop.f32.mrb[30].mxu1 }
 0x71d   :  { %v2495_v42 = vrot.slane %v2490_v15, 4  ;;  %v2575_v44 = vrot.slane %v2570_v26, 4  ;;  %v7103_v45 = vpop.f32.mrb[27].mxu0  ;;  %v7114_v46 = vpop.f32.mrb[31].mxu1 }
 0x71f   :  { %v2497_v48 = vadd.f32 %v2495_v42, %v8580_v43  ;;  %v2577_v49 = vadd.f32 %v2575_v44, %v8587_v50 }
 0x721   :  { %v6328_v51 = vmul.f32 -1.442695, %v2497_v48  ;;  %v6330_v54 = vmul.f32 -1.442695, %v2577_v49 }
 0x723   :  { %8132 = vpow2.f32 %v6328_v51 }
 0x724   :  { %8134 = vpow2.f32 %v6330_v54  ;;  %v2650_v20 = vpop.f32.mrb[28].mxu0  ;;  %v2725_v32 = vpop.f32.mrb[32].mxu1 }
 0x725   :  { %v2730_v53 = vrot.slane %v2725_v32, 4  ;;  %v7125_v61 = vpop.f32.mrb[29].mxu0  ;;  %v7136_v56 = vpop.f32.mrb[33].mxu1  ;;  %v2655_v57 = vrot.slane %v2650_v20, 4 }
 0x727   :  { %v2732_v58 = vadd.f32 %v2730_v53, %v8594_v55  ;;  %v2657_v59 = vadd.f32 %v2655_v57, %v8585_v47 }
 0x729   :  { %v6333_v6 = vmul.f32 -1.442695, %v2732_v58 }
 0x72b   :  { %8136 = vpow2.f32 %v6333_v6 }
 0x72c   :  { %8138 = vtanh.f32 %v2657_v59 }
 0x72d   :  { %v8133_v4 = vpop.eup %8132 }
 0x72e   :  { %v8135_v60 = vpop.eup %8134  ;;  %v2501_v62 = vadd.f32 1.0, %v8133_v4 }
 0x72f   :  { %v2581_v63 = vadd.f32 1.0, %v8135_v60 }
 0x730   :  { %8140 = vrcp.f32 %v2501_v62 }
 0x731   :  { %8142 = vrcp.f32 %v2581_v63 }
 0x735   :  { %v8137_v3 = vpop.eup %8136 }
 0x736   :  { %v8139_v5 = vpop.eup %8138  ;;  %v2736_v11 = vadd.f32 1.0, %v8137_v3 }
 0x738   :  { %8144 = vrcp.f32 %v2736_v11 }
 0x73a   :  { %v8141_v7 = vpop.eup %8140 }
 0x73b   :  { %v8143_v2 = vpop.eup %8142  ;;  %v2743_v9 = vmul.f32 %v8141_v7, %v8139_v5 }
 0x73c   :  { %v2742_v12 = vmul.f32 %v8143_v2, %v2740_v8 }
 0x73e   :  { %v8922_v13 = vadd.f32 %v2743_v9, %v2742_v12 }
 0x740   :  { %8146 = vtanh.f32 %v8922_v13  ;;  %v2755_v63 = vrot.slane %v8922_v13, 4 }
 0x742   :  { %v8145_v14 = vpop.eup %8144  ;;  %v2757_v0 = vsel %vm2747_vm12, %v2755_v63, %v8919_v1 }
 0x743   :  { %v3078_v7 = vrot.slane %v2757_v0, 2 }
 0x74a   :  { %v8147_v17 = vpop.eup %8146 }
 0x74b   :  { %v2746_v18 = vmul.f32 %v8147_v17, %v8145_v14 }
 0x74d   :  { %v2751_v19 = vrot.slane %v2746_v18, 4 }
 0x74f   :  { %v8929_v52 = vsel %vm2747_vm12, %v2751_v19, %v8875_v41  ;;  %v6361_v41 = vld [vmem:[%s9593_s5 + $0x68] sm:$0xff] }
 0x750   :  { %2758 = vst.msk [vmem:[#allocation2 + $0xc] sm:$0x3] %vm750_vm5, %v8929_v52  ;;  %7146 = vmatmul.mubr.msk.f32.vlgmr.msra.gmra.mrb[30].mxu0 %vm433_vm4, %v8929_v52  ;;  %7157 = vmatmul.mubr.msk.f32.vlgmr.msra.gmra.mrb[34].mxu1 %vm433_vm4, %v8929_v52  ;;  %v8995_v15 = vpack.c.bf16 %v6361_v41, %v6360_v40 }
 0x751   :  { %7786 = vmatpush3.bf16.msra.mxu0 %v8504_v27  ;;  %7792 = vmatpush3.bf16.msra.mxu1 %v8540_v36  ;;  %v8951_v27 = vld [vmem:[#allocation2] sm:$0xff]  ;;  %v3102_v36 = vld [vmem:[%s9593_s5 + $0x8] sm:$0xff] }
 0x752   :  { %7787 = vmatprep.subr.bf16.mxu0 %v8355_v16  ;;  %7793 = vmatprep.subr.bf16.mxu1 %v8355_v16 }
 0x753   :  { %7167 = vmatprep.mubr.msk.f32.mxu0 %vm8356_vm1, %v8357_v25  ;;  %7178 = vmatprep.mubr.msk.f32.mxu1 %vm8356_vm1, %v8357_v25 }
 0x755   :  { %7789 = vmatpush3.bf16.msra.mxu0 %v8526_v33  ;;  %7795 = vmatpush3.bf16.msra.mxu1 %v8554_v39  ;;  %v3101_v33 = vld [vmem:[%s9593_s5] sm:$0xff] }
 0x756   :  { %v6344_v39 = vld [vmem:[%s9593_s5 + $0x20] sm:$0xff]  ;;  %v7796_v21 = vpack.c.bf16 %v3102_v36, %v3101_v33  ;;  %v6354_v33 = vld [vmem:[%s9593_s5 + $0x50] sm:$0xff]  ;;  %v6355_v36 = vld [vmem:[%s9593_s5 + $0x58] sm:$0xff] }
 0x757   :  { %v7804_v22 = vpack.c.bf16 %v6345_v10, %v6344_v39  ;;  %v6362_v39 = vld [vmem:[%s9593_s5 + $0x70] sm:$0xff]  ;;  %v7816_v10 = vpack.c.bf16 %v6355_v36, %v6354_v33 }
 0x758   :  { %7168 = vmatmul.mubr.msk.f32.vlgmr.msra.gmra.mrb[32].mxu0 %vm433_vm4, %v8929_v52  ;;  %7179 = vmatmul.mubr.msk.f32.vlgmr.msra.gmra.mrb[36].mxu1 %vm433_vm4, %v8929_v52 }
 0x759   :  { %7189 = vmatprep.mubr.msk.f32.mxu0 %vm433_vm4, %v8951_v27  ;;  %7200 = vmatprep.mubr.msk.f32.mxu1 %vm433_vm4, %v8951_v27 }
 0x75a   :  { %7797 = vmatprep.subr.bf16.mxu0 %v7796_v21  ;;  %7805 = vmatprep.subr.bf16.mxu1 %v7804_v22 }
 0x75b   :  { %7799 = vmatpush3.bf16.msra.mxu0 %v7796_v21  ;;  %7807 = vmatpush3.bf16.msra.mxu1 %v7804_v22 }
 0x75c   :  { %7801 = vmatprep.subr.bf16.mxu0 %v7800_v30  ;;  %7809 = vmatprep.subr.bf16.mxu1 %v7808_v35 }
 0x75f   :  { %7803 = vmatpush3.bf16.msra.mxu0 %v7800_v30  ;;  %7811 = vmatpush3.bf16.msra.mxu1 %v7808_v35  ;;  %v6369_v30 = vld [vmem:[%s9594_s6 + $0x28] sm:$0xff]  ;;  %v6370_v35 = vld [vmem:[%s9594_s6 + $0x30] sm:$0xff] }
 0x760   :  { %7813 = vmatprep.subr.bf16.mxu0 %v8987_v37  ;;  %7821 = vmatprep.subr.bf16.mxu1 %v8995_v15  ;;  %v9050_v31 = vpack.c.bf16 %v6369_v30, %v6368_v28 }
 0x823   :  { %v2828_v26 = vpop.f32.mrb[30].mxu0  ;;  %v2908_v42 = vpop.f32.mrb[34].mxu1 }
 0x824   :  { %v2833_v44 = vrot.slane %v2828_v26, 2  ;;  %v2913_v45 = vrot.slane %v2908_v42, 2  ;;  %v7147_v46 = vpop.f32.mrb[31].mxu0  ;;  %v7158_v48 = vpop.f32.mrb[35].mxu1  ;;  %v6373_v26 = vld [vmem:[%s9594_s6 + $0x48] sm:$0xff]  ;;  %v6376_v42 = vld [vmem:[%s9594_s6 + $0x60] sm:$0xff] }
 0x825   :  { %v6374_v48 = vld [vmem:[%s9594_s6 + $0x50] sm:$0xff] }
 0x826   :  { %v2835_v49 = vadd.f32 %v2833_v44, %v8580_v43  ;;  %v2915_v51 = vadd.f32 %v2913_v45, %v8587_v50  ;;  %v6377_v44 = vld [vmem:[%s9594_s6 + $0x68] sm:$0xff] }
 0x827   :  { %v9096_v46 = vpack.c.bf16 %v6377_v44, %v6376_v42 }
 0x828   :  { %v6335_v54 = vmul.f32 -1.442695, %v2835_v49  ;;  %v6337_v20 = vmul.f32 -1.442695, %v2915_v51  ;;  %v6375_v49 = vld [vmem:[%s9594_s6 + $0x58] sm:$0xff]  ;;  %v6378_v51 = vld [vmem:[%s9594_s6 + $0x70] sm:$0xff] }
 0x82a   :  { %8148 = vpow2.f32 %v6335_v54  ;;  %v6379_v54 = vld [vmem:[%s9594_s6 + $0x78] sm:$0xff] }
 0x82b   :  { %8150 = vpow2.f32 %v6337_v20  ;;  %v2988_v32 = vpop.f32.mrb[32].mxu0  ;;  %v3063_v53 = vpop.f32.mrb[36].mxu1  ;;  %v9116_v20 = vpack.c.bf16 %v6375_v49, %v6374_v48 }
 0x82c   :  { %v3068_v61 = vrot.slane %v3063_v53, 2  ;;  %v7169_v56 = vpop.f32.mrb[33].mxu0  ;;  %v7180_v57 = vpop.f32.mrb[37].mxu1  ;;  %v2993_v58 = vrot.slane %v2988_v32, 2  ;;  %v9118_v32 = vpack.c.bf16 %v6379_v54, %v6378_v51  ;;  %v6341_v53 = vld [vmem:[%s9595_s7] ss:$0 sm:$0xff] }
 0x82e   :  { %v3070_v6 = vadd.f32 %v3068_v61, %v8594_v55  ;;  %v2995_v4 = vadd.f32 %v2993_v58, %v8585_v47  ;;  %v6349_v61 = vld [vmem:[%s9595_s7 + $0x1] ss:$0 sm:$0xff] }
 0x830   :  { %v6340_v59 = vmul.f32 -1.442695, %v3070_v6 }
 0x832   :  { %8152 = vpow2.f32 %v6340_v59 }
 0x833   :  { %8154 = vtanh.f32 %v2995_v4 }
 0x834   :  { %v8149_v60 = vpop.eup %8148 }
 0x835   :  { %v8151_v62 = vpop.eup %8150  ;;  %v2839_v43 = vadd.f32 1.0, %v8149_v60  ;;  %v6357_v60 = vld [vmem:[%s9595_s7 + $0x2] ss:$0 sm:$0xff] }
 0x836   :  { %v2919_v50 = vadd.f32 1.0, %v8151_v62  ;;  %v6365_v62 = vld [vmem:[%s9595_s7 + $0x3] ss:$0 sm:$0xff] }
 0x837   :  { %8156 = vrcp.f32 %v2839_v43 }
 0x838   :  { %8158 = vrcp.f32 %v2919_v50 }
 0x83c   :  { %v8153_v3 = vpop.eup %8152 }
 0x83d   :  { %v8155_v5 = vpop.eup %8154  ;;  %v3074_v2 = vadd.f32 1.0, %v8153_v3 }
 0x83f   :  { %8160 = vrcp.f32 %v3074_v2 }
 0x841   :  { %v8157_v55 = vpop.eup %8156 }
 0x842   :  { %v8159_v8 = vpop.eup %8158  ;;  %v3081_v47 = vmul.f32 %v8157_v55, %v8155_v5 }
 0x843   :  { %v3080_v9 = vmul.f32 %v8159_v8, %v3078_v7 }
 0x845   :  { %v3082_v11 = vadd.f32 %v3081_v47, %v3080_v9 }
 0x847   :  { %8162 = vtanh.f32 %v3082_v11  ;;  %v3093_v12 = vrot.slane %v3082_v11, 6 }
 0x849   :  { %v3095_v13 = vsel %vm3085_vm13, %v3093_v12, %v2757_v0  ;;  %v8161_v1 = vpop.eup %8160 }
 0x84a   :  { %3098 = vst.msk [vmem:[#allocation7] sm:$0x3] %vm750_vm5, %v3095_v13 }
 0x851   :  { %v8163_v14 = vpop.eup %8162 }
 0x852   :  { %v3084_v17 = vmul.f32 %v8163_v14, %v8161_v1 }
 0x854   :  { %v3089_v18 = vrot.slane %v3084_v17, 6 }
 0x856   :  { %v3091_v19 = vsel %vm3085_vm13, %v3089_v18, %v8929_v52  ;;  %v6363_v52 = vld [vmem:[%s9593_s5 + $0x78] sm:$0xff] }
 0x857   :  { %3096 = vst.msk [vmem:[#allocation2 + $0xe] sm:$0x3] %vm750_vm5, %v3091_v19  ;;  %3097 = vst.msk [vmem:[#allocation6] sm:$0x3] %vm750_vm5, %v3091_v19  ;;  %v7824_v22 = vpack.c.bf16 %v6363_v52, %v6362_v39 }
 0x85e   :  { %v3100_v21 = vld [vmem:[#allocation2 + $0x8] sm:$0xff] }
 0x85f   :  { %7190 = vmatmul.mubr.msk.f32.vlgmr.msra.gmra.mrb[34].mxu0 %vm433_vm4, %v3100_v21  ;;  %7201 = vmatmul.mubr.msk.f32.vlgmr.msra.gmra.mrb[38].mxu1 %vm433_vm4, %v3100_v21 }
 0x860   :  { %7815 = vmatpush3.bf16.msra.mxu0 %v8987_v37  ;;  %7823 = vmatpush3.bf16.msra.mxu1 %v8995_v15  ;;  %v6371_v37 = vld [vmem:[%s9594_s6 + $0x38] sm:$0xff]  ;;  %v6372_v15 = vld [vmem:[%s9594_s6 + $0x40] sm:$0xff] }
 0x861   :  { %7211 = vmatprep.mubr.msk.f32.mxu0 %vm433_vm4, %v8951_v27  ;;  %7222 = vmatprep.mubr.msk.f32.mxu1 %vm433_vm4, %v8951_v27  ;;  %v3459_v27 = vld [vmem:[%s9594_s6 + $0x10] sm:$0xff]  ;;  %v9072_v41 = vpack.c.bf16 %v6371_v37, %v6370_v35  ;;  %v9094_v45 = vpack.c.bf16 %v6373_v26, %v6372_v15 }
 0x862   :  { %7817 = vmatprep.subr.bf16.mxu0 %v7816_v10  ;;  %7825 = vmatprep.subr.bf16.mxu1 %v7824_v22  ;;  %v9070_v40 = vpack.c.bf16 %v3460_v34, %v3459_v27 }
 0x864   :  { %7819 = vmatpush3.bf16.msra.mxu0 %v7816_v10  ;;  %7827 = vmatpush3.bf16.msra.mxu1 %v7824_v22 }
 0x865   :  { %7828 = vmatprep.subr.bf16.mxu0 %v8355_v16  ;;  %7834 = vmatprep.subr.bf16.mxu1 %v8355_v16 }
 0x867   :  { %7212 = vmatmul.mubr.msk.f32.vlgmr.msra.gmra.mrb[36].mxu0 %vm433_vm4, %v3100_v21  ;;  %7223 = vmatmul.mubr.msk.f32.vlgmr.msra.gmra.mrb[40].mxu1 %vm433_vm4, %v3100_v21 }
 0x868   :  { %7830 = vmatpush3.bf16.msra.mxu0 %v9048_v29  ;;  %7836 = vmatpush3.bf16.msra.mxu1 %v9050_v31 }
 0x869   :  { %7831 = vmatprep.subr.bf16.mxu0 %v8355_v16  ;;  %7837 = vmatprep.subr.bf16.mxu1 %v8355_v16 }
 0x86a   :  { %7233 = vmatprep.mubr.msk.f32.mxu0 %vm8356_vm1, %v8357_v25  ;;  %7244 = vmatprep.mubr.msk.f32.mxu1 %vm8356_vm1, %v8357_v25 }
 0x86c   :  { %7833 = vmatpush3.bf16.msra.mxu0 %v9070_v40  ;;  %7839 = vmatpush3.bf16.msra.mxu1 %v9072_v41 }
 0x86d   :  { %7840 = vmatprep.subr.bf16.mxu0 %v8355_v16  ;;  %7846 = vmatprep.subr.bf16.mxu1 %v8355_v16 }
 0x86f   :  { %7234 = vmatmul.mubr.f32.vlgmr.msra.gmra.mrb[38].mxu0 %v8357_v25  ;;  %7245 = vmatmul.mubr.f32.vlgmr.msra.gmra.mrb[42].mxu1 %v8357_v25 }
 0x870   :  { %7842 = vmatpush3.bf16.msra.mxu0 %v9094_v45  ;;  %7848 = vmatpush3.bf16.msra.mxu1 %v9096_v46 }
 0x871   :  { %7843 = vmatprep.subr.bf16.mxu0 %v8355_v16  ;;  %7849 = vmatprep.subr.bf16.mxu1 %v8355_v16 }
 0x872   :  { %7255 = vmatprep.mubr.msk.f32.mxu0 %vm8356_vm1, %v8357_v25  ;;  %7266 = vmatprep.mubr.msk.f32.mxu1 %vm8356_vm1, %v8357_v25 }
 0x874   :  { %7845 = vmatpush3.bf16.msra.mxu0 %v9116_v20  ;;  %7851 = vmatpush3.bf16.msra.mxu1 %v9118_v32 }
 0x875   :  { %7852 = vmatprep.subr.bf16.mxu0 %v8355_v16  ;;  %7858 = vmatprep.subr.bf16.mxu1 %v8355_v16 }
 0x877   :  { %7256 = vmatmul.mubr.f32.vlgmr.msra.gmra.mrb[40].mxu0 %v8357_v25  ;;  %7267 = vmatmul.mubr.f32.vlgmr.msra.gmra.mrb[44].mxu1 %v8357_v25 }
 0x878   :  { %7854 = vmatpush3.bf16.msra.mxu0 %v9048_v29  ;;  %7860 = vmatpush3.bf16.msra.mxu1 %v9050_v31 }
 0x879   :  { %7855 = vmatprep.subr.bf16.mxu0 %v8355_v16  ;;  %7861 = vmatprep.subr.bf16.mxu1 %v8355_v16 }
 0x87a   :  { %7277 = vmatprep.mubr.msk.f32.mxu0 %vm8356_vm1, %v8357_v25  ;;  %7288 = vmatprep.mubr.msk.f32.mxu1 %vm8356_vm1, %v8357_v25 }
 0x87c   :  { %7857 = vmatpush3.bf16.msra.mxu0 %v9070_v40  ;;  %7863 = vmatpush3.bf16.msra.mxu1 %v9072_v41 }
 0x87d   :  { %7864 = vmatprep.subr.bf16.mxu0 %v8355_v16  ;;  %7870 = vmatprep.subr.bf16.mxu1 %v8355_v16 }
 0x932   :  { %v7191_v56 = vpop.f32.mrb[34].mxu0  ;;  %v7202_v57 = vpop.f32.mrb[38].mxu1 }
 0x933   :  { %v9150_v58 = vadd.f32 %v7191_v56, %v6341_v53  ;;  %v9152_v6 = vadd.f32 %v7202_v57, %v6349_v61  ;;  %v3184_v59 = vpop.f32.mrb[35].mxu0  ;;  %v3272_v4 = vpop.f32.mrb[39].mxu1 }
 0x934   :  { %v9164_v55 = vadd.f32 %v6341_v53, %v3184_v59  ;;  %v9166_v7 = vadd.f32 %v6349_v61, %v3272_v4 }
 0x93a   :  { %v7213_v43 = vpop.f32.mrb[36].mxu0  ;;  %v7224_v50 = vpop.f32.mrb[40].mxu1 }
 0x93b   :  { %v9160_v63 = vadd.f32 %v7213_v43, %v6357_v60  ;;  %v9162_v0 = vadd.f32 %v7224_v50, %v6365_v62  ;;  %v3360_v3 = vpop.f32.mrb[37].mxu0  ;;  %v3448_v5 = vpop.f32.mrb[41].mxu1 }
 0x93c   :  { %v9170_v14 = vadd.f32 %v6365_v62, %v3448_v5  ;;  %v9173_v39 = vadd.f32 %v6357_v60, %v3360_v3 }
 0x942   :  { %v3542_v8 = vpop.f32.mrb[38].mxu0  ;;  %v3619_v47 = vpop.f32.mrb[42].mxu1 }
 0x943   :  { %v3546_v2 = vadd.f32 %v3542_v8, %v9164_v55  ;;  %v3623_v9 = vadd.f32 %v3619_v47, %v9166_v7  ;;  %v7235_v11 = vpop.f32.mrb[39].mxu0  ;;  %v7246_v12 = vpop.f32.mrb[43].mxu1 }
 0x945   :  { %v6380_v13 = vmul.f32 -1.442695, %v3546_v2  ;;  %v6381_v1 = vmul.f32 -1.442695, %v3623_v9 }
 0x947   :  { %8164 = vpow2.f32 %v6380_v13 }
 0x948   :  { %8166 = vpow2.f32 %v6381_v1 }
 0x94a   :  { %v3696_v17 = vpop.f32.mrb[40].mxu0  ;;  %v3768_v18 = vpop.f32.mrb[44].mxu1 }
 0x94b   :  { %v3772_v19 = vadd.f32 %v3768_v18, %v9170_v14  ;;  %v7257_v33 = vpop.f32.mrb[41].mxu0  ;;  %v7268_v36 = vpop.f32.mrb[45].mxu1  ;;  %v3700_v21 = vadd.f32 %v3696_v17, %v9173_v39 }
 0x94d   :  { %v6382_v52 = vmul.f32 -1.442695, %v3772_v19 }
 0x94f   :  { %8168 = vpow2.f32 %v6382_v52 }
 0x950   :  { %8170 = vtanh.f32 %v3700_v21 }
 0x951   :  { %v8165_v10 = vpop.eup %8164 }
 0x952   :  { %v8167_v22 = vpop.eup %8166  ;;  %v3550_v23 = vadd.f32 1.0, %v8165_v10 }
 0x953   :  { %v3627_v24 = vadd.f32 1.0, %v8167_v22 }
 0x954   :  { %8172 = vrcp.f32 %v3550_v23 }
 0x955   :  { %8174 = vrcp.f32 %v3627_v24 }
 0x959   :  { %v8169_v28 = vpop.eup %8168 }
 0x95a   :  { %v8171_v30 = vpop.eup %8170  ;;  %v3776_v37 = vadd.f32 1.0, %v8169_v28 }
 0x95c   :  { %8176 = vrcp.f32 %v3776_v37 }
 0x95e   :  { %v8173_v27 = vpop.eup %8172 }
 0x95f   :  { %v8175_v34 = vpop.eup %8174  ;;  %v3780_v35 = vmul.f32 %v8173_v27, %v8171_v30 }
 0x960   :  { %v3779_v15 = vmul.f32 0.0, %v8175_v34 }
 0x962   :  { %v3781_v26 = vadd.f32 %v3780_v35, %v3779_v15 }
 0x964   :  { %8178 = vtanh.f32 %v3781_v26  ;;  %v9220_v18 = vsel %vm745_vm6, %v3781_v26, 0.0 }
 0x965   :  { %v4106_v52 = vrot.slane %v9220_v18, 6 }
 0x966   :  { %v8177_v42 = vpop.eup %8176 }
 0x96e   :  { %v8179_v44 = vpop.eup %8178 }
 0x96f   :  { %v3783_v48 = vmul.f32 %v8179_v44, %v8177_v42 }
 0x971   :  { %v9178_v49 = vsel %vm745_vm6, %v3783_v48, 0.0 }
 0x972   :  { %3786 = vst.msk [vmem:[#allocation2] sm:$0x3] %vm750_vm5, %v9178_v49  ;;  %7278 = vmatmul.mubr.msk.f32.vlgmr.msra.gmra.mrb[42].mxu0 %vm433_vm4, %v9178_v49  ;;  %7289 = vmatmul.mubr.msk.f32.vlgmr.msra.gmra.mrb[46].mxu1 %vm433_vm4, %v9178_v49 }
 0x973   :  { %7866 = vmatpush3.bf16.msra.mxu0 %v9094_v45  ;;  %7872 = vmatpush3.bf16.msra.mxu1 %v9096_v46 }
 0x974   :  { %7867 = vmatprep.subr.bf16.mxu0 %v8355_v16  ;;  %7873 = vmatprep.subr.bf16.mxu1 %v8355_v16 }
 0x975   :  { %7299 = vmatprep.mubr.msk.f32.mxu0 %vm8356_vm1, %v8357_v25  ;;  %7310 = vmatprep.mubr.msk.f32.mxu1 %vm8356_vm1, %v8357_v25 }
 0x977   :  { %7869 = vmatpush3.bf16.msra.mxu0 %v9116_v20  ;;  %7875 = vmatpush3.bf16.msra.mxu1 %v9118_v32 }
 0x978   :  { %7876 = vmatprep.subr.bf16.mxu0 %v8355_v16  ;;  %7882 = vmatprep.subr.bf16.mxu1 %v8355_v16 }
 0x97a   :  { %7300 = vmatmul.mubr.msk.f32.vlgmr.msra.gmra.mrb[44].mxu0 %vm433_vm4, %v9178_v49  ;;  %7311 = vmatmul.mubr.msk.f32.vlgmr.msra.gmra.mrb[48].mxu1 %vm433_vm4, %v9178_v49 }
 0x97b   :  { %7878 = vmatpush3.bf16.msra.mxu0 %v9048_v29  ;;  %7884 = vmatpush3.bf16.msra.mxu1 %v9050_v31 }
 0x97c   :  { %7879 = vmatprep.subr.bf16.mxu0 %v8355_v16  ;;  %7885 = vmatprep.subr.bf16.mxu1 %v8355_v16 }
 0x97d   :  { %7321 = vmatprep.mubr.msk.f32.mxu0 %vm8356_vm1, %v8357_v25  ;;  %7332 = vmatprep.mubr.msk.f32.mxu1 %vm8356_vm1, %v8357_v25 }
 0x97f   :  { %7881 = vmatpush3.bf16.msra.mxu0 %v9070_v40  ;;  %7887 = vmatpush3.bf16.msra.mxu1 %v9072_v41 }
 0x980   :  { %7888 = vmatprep.subr.bf16.mxu0 %v8355_v16  ;;  %7894 = vmatprep.subr.bf16.mxu1 %v8355_v16 }
 0xa45   :  { %v3856_v51 = vpop.f32.mrb[42].mxu0  ;;  %v3936_v54 = vpop.f32.mrb[46].mxu1 }
 0xa46   :  { %v3861_v53 = vrot.slane %v3856_v51, 6  ;;  %v3941_v61 = vrot.slane %v3936_v54, 6  ;;  %v7279_v56 = vpop.f32.mrb[43].mxu0  ;;  %v7290_v57 = vpop.f32.mrb[47].mxu1 }
 0xa48   :  { %v3863_v59 = vadd.f32 %v3861_v53, %v9164_v55  ;;  %v3943_v4 = vadd.f32 %v3941_v61, %v9166_v7 }
 0xa4a   :  { %v6384_v60 = vmul.f32 -1.442695, %v3863_v59  ;;  %v6386_v62 = vmul.f32 -1.442695, %v3943_v4 }
 0xa4c   :  { %8180 = vpow2.f32 %v6384_v60 }
 0xa4d   :  { %8182 = vpow2.f32 %v6386_v62  ;;  %v4016_v43 = vpop.f32.mrb[44].mxu0  ;;  %v4091_v50 = vpop.f32.mrb[48].mxu1 }
 0xa4e   :  { %v4096_v3 = vrot.slane %v4091_v50, 6  ;;  %v7301_v5 = vpop.f32.mrb[45].mxu0  ;;  %v7312_v8 = vpop.f32.mrb[49].mxu1  ;;  %v4021_v47 = vrot.slane %v4016_v43, 6 }
 0xa50   :  { %v4098_v2 = vadd.f32 %v4096_v3, %v9170_v14  ;;  %v4023_v11 = vadd.f32 %v4021_v47, %v9173_v39 }
 0xa52   :  { %v6389_v9 = vmul.f32 -1.442695, %v4098_v2 }
 0xa54   :  { %8184 = vpow2.f32 %v6389_v9 }
 0xa55   :  { %8186 = vtanh.f32 %v4023_v11 }
 0xa56   :  { %v8181_v12 = vpop.eup %8180 }
 0xa57   :  { %v8183_v13 = vpop.eup %8182  ;;  %v3867_v1 = vadd.f32 1.0, %v8181_v12 }
 0xa58   :  { %v3947_v17 = vadd.f32 1.0, %v8183_v13 }
 0xa59   :  { %8188 = vrcp.f32 %v3867_v1 }
 0xa5a   :  { %8190 = vrcp.f32 %v3947_v17 }
 0xa5e   :  { %v8185_v19 = vpop.eup %8184 }
 0xa5f   :  { %v8187_v33 = vpop.eup %8186  ;;  %v4102_v22 = vadd.f32 1.0, %v8185_v19 }
 0xa61   :  { %8192 = vrcp.f32 %v4102_v22 }
 0xa63   :  { %v8189_v36 = vpop.eup %8188 }
 0xa64   :  { %v8191_v21 = vpop.eup %8190  ;;  %v4109_v10 = vmul.f32 %v8189_v36, %v8187_v33 }
 0xa65   :  { %v4108_v23 = vmul.f32 %v8191_v21, %v4106_v52 }
 0xa67   :  { %v9223_v24 = vadd.f32 %v4109_v10, %v4108_v23 }
 0xa69   :  { %8194 = vtanh.f32 %v9223_v24  ;;  %v4118_v9 = vrot.slane %v9223_v24, 2 }
 0xa6b   :  { %v8193_v28 = vpop.eup %8192  ;;  %v9274_v11 = vsel %vm1078_vm7, %v4118_v9, %v9220_v18 }
 0xa6c   :  { %v4442_v17 = vrot.slane %v9274_v11, 4 }
 0xa73   :  { %v8195_v30 = vpop.eup %8194 }
 0xa74   :  { %v4112_v27 = vmul.f32 %v8195_v30, %v8193_v28 }
 0xa76   :  { %v4114_v34 = vrot.slane %v4112_v27, 2 }
 0xa78   :  { %v9229_v35 = vsel %vm1078_vm7, %v4114_v34, %v9178_v49  ;;  %v4121_v37 = vsel %vm1078_vm7, %v4114_v34, 0.0 }
 0xa79   :  { %4122 = vst.msk [vmem:[#allocation2 + $0x2] sm:$0x3] %vm750_vm5, %v4121_v37  ;;  %7322 = vmatmul.mubr.msk.f32.vlgmr.msra.gmra.mrb[46].mxu0 %vm433_vm4, %v9229_v35  ;;  %7333 = vmatmul.mubr.msk.f32.vlgmr.msra.gmra.mrb[50].mxu1 %vm433_vm4, %v9229_v35 }
 0xa7a   :  { %7890 = vmatpush3.bf16.msra.mxu0 %v9094_v45  ;;  %7896 = vmatpush3.bf16.msra.mxu1 %v9096_v46 }
 0xa7b   :  { %7891 = vmatprep.subr.bf16.mxu0 %v8355_v16  ;;  %7897 = vmatprep.subr.bf16.mxu1 %v8355_v16 }
 0xa7c   :  { %7343 = vmatprep.mubr.msk.f32.mxu0 %vm8356_vm1, %v8357_v25  ;;  %7354 = vmatprep.mubr.msk.f32.mxu1 %vm8356_vm1, %v8357_v25 }
 0xa7e   :  { %7893 = vmatpush3.bf16.msra.mxu0 %v9116_v20  ;;  %7899 = vmatpush3.bf16.msra.mxu1 %v9118_v32 }
 0xa7f   :  { %7900 = vmatprep.subr.bf16.mxu0 %v8355_v16  ;;  %7906 = vmatprep.subr.bf16.mxu1 %v8355_v16 }
 0xa81   :  { %7344 = vmatmul.mubr.msk.f32.vlgmr.msra.gmra.mrb[48].mxu0 %vm433_vm4, %v9229_v35  ;;  %7355 = vmatmul.mubr.msk.f32.vlgmr.msra.gmra.mrb[52].mxu1 %vm433_vm4, %v9229_v35 }
 0xa82   :  { %7902 = vmatpush3.bf16.msra.mxu0 %v9048_v29  ;;  %7908 = vmatpush3.bf16.msra.mxu1 %v9050_v31 }
 0xa83   :  { %7903 = vmatprep.subr.bf16.mxu0 %v8355_v16  ;;  %7909 = vmatprep.subr.bf16.mxu1 %v8355_v16 }
 0xa84   :  { %7365 = vmatprep.mubr.msk.f32.mxu0 %vm8356_vm1, %v8357_v25  ;;  %7376 = vmatprep.mubr.msk.f32.mxu1 %vm8356_vm1, %v8357_v25 }
 0xa86   :  { %7905 = vmatpush3.bf16.msra.mxu0 %v9070_v40  ;;  %7911 = vmatpush3.bf16.msra.mxu1 %v9072_v41 }
 0xa87   :  { %7912 = vmatprep.subr.bf16.mxu0 %v8355_v16  ;;  %7918 = vmatprep.subr.bf16.mxu1 %v8355_v16 }
 0xb4c   :  { %v4192_v15 = vpop.f32.mrb[46].mxu0  ;;  %v4272_v26 = vpop.f32.mrb[50].mxu1 }
 0xb4d   :  { %v4197_v42 = vrot.slane %v4192_v15, 4  ;;  %v4277_v44 = vrot.slane %v4272_v26, 4  ;;  %v7323_v48 = vpop.f32.mrb[47].mxu0  ;;  %v7334_v49 = vpop.f32.mrb[51].mxu1 }
 0xb4f   :  { %v4199_v51 = vadd.f32 %v4197_v42, %v9164_v55  ;;  %v4279_v54 = vadd.f32 %v4277_v44, %v9166_v7 }
 0xb51   :  { %v6391_v53 = vmul.f32 -1.442695, %v4199_v51  ;;  %v6393_v61 = vmul.f32 -1.442695, %v4279_v54 }
 0xb53   :  { %8196 = vpow2.f32 %v6391_v53 }
 0xb54   :  { %8198 = vpow2.f32 %v6393_v61  ;;  %v4352_v56 = vpop.f32.mrb[48].mxu0  ;;  %v4427_v57 = vpop.f32.mrb[52].mxu1 }
 0xb55   :  { %v4432_v59 = vrot.slane %v4427_v57, 4  ;;  %v7345_v4 = vpop.f32.mrb[49].mxu0  ;;  %v7356_v60 = vpop.f32.mrb[53].mxu1  ;;  %v4357_v62 = vrot.slane %v4352_v56, 4 }
 0xb57   :  { %v4434_v43 = vadd.f32 %v4432_v59, %v9170_v14  ;;  %v4359_v3 = vadd.f32 %v4357_v62, %v9173_v39 }
 0xb59   :  { %v6396_v50 = vmul.f32 -1.442695, %v4434_v43 }
 0xb5b   :  { %8200 = vpow2.f32 %v6396_v50 }
 0xb5c   :  { %8202 = vtanh.f32 %v4359_v3 }
 0xb5d   :  { %v8197_v5 = vpop.eup %8196 }
 0xb5e   :  { %v8199_v8 = vpop.eup %8198  ;;  %v4203_v47 = vadd.f32 1.0, %v8197_v5 }
 0xb5f   :  { %v4283_v2 = vadd.f32 1.0, %v8199_v8 }
 0xb60   :  { %8204 = vrcp.f32 %v4203_v47 }
 0xb61   :  { %8206 = vrcp.f32 %v4283_v2 }
 0xb65   :  { %v8201_v12 = vpop.eup %8200 }
 0xb66   :  { %v8203_v13 = vpop.eup %8202  ;;  %v4438_v36 = vadd.f32 1.0, %v8201_v12 }
 0xb68   :  { %8208 = vrcp.f32 %v4438_v36 }
 0xb6a   :  { %v8205_v1 = vpop.eup %8204 }
 0xb6b   :  { %v8207_v19 = vpop.eup %8206  ;;  %v4445_v33 = vmul.f32 %v8205_v1, %v8203_v13 }
 0xb6c   :  { %v4444_v52 = vmul.f32 %v8207_v19, %v4442_v17 }
 0xb6e   :  { %v9277_v21 = vadd.f32 %v4445_v33, %v4444_v52 }
 0xb70   :  { %8210 = vtanh.f32 %v9277_v21  ;;  %v4454_v43 = vrot.slane %v9277_v21, 4 }
 0xb72   :  { %v8209_v10 = vpop.eup %8208  ;;  %v9328_v50 = vsel %vm1416_vm8, %v4454_v43, %v9274_v11 }
 0xb7a   :  { %v8211_v22 = vpop.eup %8210 }
 0xb7b   :  { %v4448_v23 = vmul.f32 %v8211_v22, %v8209_v10 }
 0xb7d   :  { %v4450_v24 = vrot.slane %v4448_v23, 4 }
 0xb7f   :  { %v9283_v18 = vsel %vm1416_vm8, %v4450_v24, %v9229_v35  ;;  %v4457_v28 = vsel %vm1416_vm8, %v4450_v24, 0.0 }
 0xb80   :  { %4458 = vst.msk [vmem:[#allocation2 + $0x4] sm:$0x3] %vm750_vm5, %v4457_v28  ;;  %7366 = vmatmul.mubr.msk.f32.vlgmr.msra.gmra.mrb[50].mxu0 %vm433_vm4, %v9283_v18  ;;  %7377 = vmatmul.mubr.msk.f32.vlgmr.msra.gmra.mrb[54].mxu1 %vm433_vm4, %v9283_v18 }
 0xb81   :  { %7914 = vmatpush3.bf16.msra.mxu0 %v9094_v45  ;;  %7920 = vmatpush3.bf16.msra.mxu1 %v9096_v46 }
 0xb82   :  { %7915 = vmatprep.subr.bf16.mxu0 %v8355_v16  ;;  %7921 = vmatprep.subr.bf16.mxu1 %v8355_v16 }
 0xb83   :  { %7387 = vmatprep.mubr.msk.f32.mxu0 %vm8356_vm1, %v8357_v25  ;;  %7398 = vmatprep.mubr.msk.f32.mxu1 %vm8356_vm1, %v8357_v25 }
 0xb85   :  { %7917 = vmatpush3.bf16.msra.mxu0 %v9116_v20  ;;  %7923 = vmatpush3.bf16.msra.mxu1 %v9118_v32 }
 0xb86   :  { %7924 = vmatprep.subr.bf16.mxu0 %v8355_v16  ;;  %7930 = vmatprep.subr.bf16.mxu1 %v8355_v16 }
 0xb88   :  { %7388 = vmatmul.mubr.msk.f32.vlgmr.msra.gmra.mrb[52].mxu0 %vm433_vm4, %v9283_v18  ;;  %7399 = vmatmul.mubr.msk.f32.vlgmr.msra.gmra.mrb[56].mxu1 %vm433_vm4, %v9283_v18 }
 0xb89   :  { %7926 = vmatpush3.bf16.msra.mxu0 %v9048_v29  ;;  %7932 = vmatpush3.bf16.msra.mxu1 %v9050_v31 }
 0xb8a   :  { %7927 = vmatprep.subr.bf16.mxu0 %v8355_v16  ;;  %7933 = vmatprep.subr.bf16.mxu1 %v8355_v16 }
 0xb8b   :  { %7409 = vmatprep.mubr.msk.f32.mxu0 %vm8356_vm1, %v8357_v25  ;;  %7420 = vmatprep.mubr.msk.f32.mxu1 %vm8356_vm1, %v8357_v25 }
 0xb8d   :  { %7929 = vmatpush3.bf16.msra.mxu0 %v9070_v40  ;;  %7935 = vmatpush3.bf16.msra.mxu1 %v9072_v41 }
 0xb8e   :  { %7936 = vmatprep.subr.bf16.mxu0 %v8355_v16  ;;  %7942 = vmatprep.subr.bf16.mxu1 %v8355_v16 }
 0xc53   :  { %v4528_v30 = vpop.f32.mrb[50].mxu0  ;;  %v4608_v27 = vpop.f32.mrb[54].mxu1 }
 0xc54   :  { %v4533_v34 = vrot.slane %v4528_v30, 2  ;;  %v4613_v35 = vrot.slane %v4608_v27, 2  ;;  %v7367_v37 = vpop.f32.mrb[51].mxu0  ;;  %v7378_v15 = vpop.f32.mrb[55].mxu1 }
 0xc56   :  { %v4535_v26 = vadd.f32 %v4533_v34, %v9164_v55  ;;  %v4615_v42 = vadd.f32 %v4613_v35, %v9166_v7 }
 0xc58   :  { %v6398_v44 = vmul.f32 -1.442695, %v4535_v26  ;;  %v6400_v48 = vmul.f32 -1.442695, %v4615_v42 }
 0xc5a   :  { %8212 = vpow2.f32 %v6398_v44 }
 0xc5b   :  { %8214 = vpow2.f32 %v6400_v48  ;;  %v4688_v49 = vpop.f32.mrb[52].mxu0  ;;  %v4763_v51 = vpop.f32.mrb[56].mxu1 }
 0xc5c   :  { %v4768_v54 = vrot.slane %v4763_v51, 2  ;;  %v7389_v53 = vpop.f32.mrb[53].mxu0  ;;  %v7400_v61 = vpop.f32.mrb[57].mxu1  ;;  %v4693_v56 = vrot.slane %v4688_v49, 2 }
 0xc5e   :  { %v4770_v57 = vadd.f32 %v4768_v54, %v9170_v14  ;;  %v4695_v4 = vadd.f32 %v4693_v56, %v9173_v39  ;;  %v4778_v39 = vrot.slane %v9328_v50, 2 }
 0xc60   :  { %v6403_v59 = vmul.f32 -1.442695, %v4770_v57 }
 0xc62   :  { %8216 = vpow2.f32 %v6403_v59 }
 0xc63   :  { %8218 = vtanh.f32 %v4695_v4 }
 0xc64   :  { %v8213_v60 = vpop.eup %8212 }
 0xc65   :  { %v8215_v62 = vpop.eup %8214  ;;  %v4539_v55 = vadd.f32 1.0, %v8213_v60 }
 0xc66   :  { %v4619_v7 = vadd.f32 1.0, %v8215_v62 }
 0xc67   :  { %8220 = vrcp.f32 %v4539_v55 }
 0xc68   :  { %8222 = vrcp.f32 %v4619_v7 }
 0xc6c   :  { %v8217_v3 = vpop.eup %8216 }
 0xc6d   :  { %v8219_v14 = vpop.eup %8218  ;;  %v4774_v2 = vadd.f32 1.0, %v8217_v3 }
 0xc6f   :  { %8224 = vrcp.f32 %v4774_v2 }
 0xc71   :  { %v8221_v5 = vpop.eup %8220 }
 0xc72   :  { %v8223_v8 = vpop.eup %8222  ;;  %v4781_v47 = vmul.f32 %v8221_v5, %v8219_v14 }
 0xc73   :  { %v4780_v9 = vmul.f32 %v8223_v8, %v4778_v39 }
 0xc75   :  { %v9331_v12 = vadd.f32 %v4781_v47, %v4780_v9 }
 0xc77   :  { %8226 = vtanh.f32 %v9331_v12  ;;  %v4790_v49 = vrot.slane %v9331_v12, 6 }
 0xc79   :  { %v8225_v13 = vpop.eup %8224  ;;  %v4792_v56 = vsel %vm1754_vm9, %v4790_v49, %v9328_v50 }
 0xc81   :  { %v8227_v1 = vpop.eup %8226 }
 0xc82   :  { %v4784_v17 = vmul.f32 %v8227_v1, %v8225_v13 }
 0xc84   :  { %v4786_v19 = vrot.slane %v4784_v17, 6 }
 0xc86   :  { %v9337_v11 = vsel %vm1754_vm9, %v4786_v19, %v9283_v18  ;;  %v4793_v33 = vsel %vm1754_vm9, %v4786_v19, 0.0 }
 0xc87   :  { %4794 = vst.msk [vmem:[#allocation2 + $0x6] sm:$0x3] %vm750_vm5, %v4793_v33  ;;  %7410 = vmatmul.mubr.msk.f32.vlgmr.msra.gmra.mrb[54].mxu0 %vm433_vm4, %v9337_v11  ;;  %7421 = vmatmul.mubr.msk.f32.vlgmr.msra.gmra.mrb[58].mxu1 %vm433_vm4, %v9337_v11 }
 0xc88   :  { %7938 = vmatpush3.bf16.msra.mxu0 %v9094_v45  ;;  %7944 = vmatpush3.bf16.msra.mxu1 %v9096_v46 }
 0xc89   :  { %7939 = vmatprep.subr.bf16.mxu0 %v8355_v16  ;;  %7945 = vmatprep.subr.bf16.mxu1 %v8355_v16 }
 0xc8a   :  { %7431 = vmatprep.mubr.msk.f32.mxu0 %vm8356_vm1, %v8357_v25  ;;  %7442 = vmatprep.mubr.msk.f32.mxu1 %vm8356_vm1, %v8357_v25 }
 0xc8c   :  { %7941 = vmatpush3.bf16.msra.mxu0 %v9116_v20  ;;  %7947 = vmatpush3.bf16.msra.mxu1 %v9118_v32 }
 0xc8d   :  { %7948 = vmatprep.subr.bf16.mxu0 %v8355_v16  ;;  %7954 = vmatprep.subr.bf16.mxu1 %v8355_v16 }
 0xc8f   :  { %7432 = vmatmul.mubr.msk.f32.vlgmr.msra.gmra.mrb[56].mxu0 %vm433_vm4, %v9337_v11  ;;  %7443 = vmatmul.mubr.msk.f32.vlgmr.msra.gmra.mrb[60].mxu1 %vm433_vm4, %v9337_v11 }
 0xc90   :  { %7950 = vmatpush3.bf16.msra.mxu0 %v9048_v29  ;;  %7956 = vmatpush3.bf16.msra.mxu1 %v9050_v31 }
 0xc91   :  { %7951 = vmatprep.subr.bf16.mxu0 %v8355_v16  ;;  %7957 = vmatprep.subr.bf16.mxu1 %v8355_v16 }
 0xc92   :  { %7453 = vmatprep.mubr.msk.f32.mxu0 %vm8356_vm1, %v8357_v25  ;;  %7464 = vmatprep.mubr.msk.f32.mxu1 %vm8356_vm1, %v8357_v25 }
 0xc94   :  { %7953 = vmatpush3.bf16.msra.mxu0 %v9070_v40  ;;  %7959 = vmatpush3.bf16.msra.mxu1 %v9072_v41 }
 0xc95   :  { %7960 = vmatprep.subr.bf16.mxu0 %v8355_v16  ;;  %7966 = vmatprep.subr.bf16.mxu1 %v8355_v16 }
 0xd5a   :  { %v4864_v36 = vpop.f32.mrb[54].mxu0  ;;  %v4941_v52 = vpop.f32.mrb[58].mxu1 }
 0xd5b   :  { %v4868_v21 = vadd.f32 %v4864_v36, %v9150_v58  ;;  %v4945_v10 = vadd.f32 %v4941_v52, %v9152_v6  ;;  %v7411_v22 = vpop.f32.mrb[55].mxu0  ;;  %v7422_v23 = vpop.f32.mrb[59].mxu1 }
 0xd5d   :  { %v6405_v24 = vmul.f32 -1.442695, %v4868_v21  ;;  %v6407_v18 = vmul.f32 -1.442695, %v4945_v10 }
 0xd5f   :  { %8228 = vpow2.f32 %v6405_v24 }
 0xd60   :  { %8230 = vpow2.f32 %v6407_v18 }
 0xd62   :  { %v5018_v28 = vpop.f32.mrb[56].mxu0  ;;  %v5090_v30 = vpop.f32.mrb[60].mxu1 }
 0xd63   :  { %v5094_v27 = vadd.f32 %v5090_v30, %v9162_v0  ;;  %v7433_v34 = vpop.f32.mrb[57].mxu0  ;;  %v7444_v35 = vpop.f32.mrb[61].mxu1  ;;  %v5022_v15 = vadd.f32 %v5018_v28, %v9160_v63 }
 0xd65   :  { %v6410_v37 = vmul.f32 -1.442695, %v5094_v27 }
 0xd67   :  { %8232 = vpow2.f32 %v6410_v37 }
 0xd68   :  { %8234 = vtanh.f32 %v5022_v15 }
 0xd69   :  { %v8229_v26 = vpop.eup %8228 }
 0xd6a   :  { %v8231_v42 = vpop.eup %8230  ;;  %v4872_v44 = vadd.f32 1.0, %v8229_v26 }
 0xd6b   :  { %v4949_v48 = vadd.f32 1.0, %v8231_v42 }
 0xd6c   :  { %8236 = vrcp.f32 %v4872_v44 }
 0xd6d   :  { %8238 = vrcp.f32 %v4949_v48 }
 0xd71   :  { %v8233_v51 = vpop.eup %8232 }
 0xd72   :  { %v8235_v54 = vpop.eup %8234  ;;  %v5098_v59 = vadd.f32 1.0, %v8233_v51 }
 0xd74   :  { %8240 = vrcp.f32 %v5098_v59 }
 0xd76   :  { %v8237_v53 = vpop.eup %8236 }
 0xd77   :  { %v8239_v61 = vpop.eup %8238  ;;  %v5102_v57 = vmul.f32 %v8237_v53, %v8235_v54 }
 0xd78   :  { %v5101_v4 = vmul.f32 %v8239_v61, %v4792_v56 }
 0xd7a   :  { %v5103_v60 = vadd.f32 %v5102_v57, %v5101_v4 }
 0xd7c   :  { %8242 = vtanh.f32 %v5103_v60  ;;  %v9384_v62 = vsel %vm2077_vm10, %v5103_v60, %v4792_v56 }
 0xd7d   :  { %v5429_v35 = vrot.slane %v9384_v62, 6 }
 0xd7e   :  { %v8241_v55 = vpop.eup %8240 }
 0xd86   :  { %v8243_v7 = vpop.eup %8242 }
 0xd87   :  { %v5105_v43 = vmul.f32 %v8243_v7, %v8241_v55 }
 0xd89   :  { %v9389_v3 = vsel %vm2077_vm10, %v5105_v43, %v9337_v11  ;;  %v5108_v50 = vsel %vm2077_vm10, %v5105_v43, 0.0 }
 0xd8a   :  { %5109 = vst.msk [vmem:[#allocation2 + $0x8] sm:$0x3] %vm750_vm5, %v5108_v50  ;;  %7454 = vmatmul.mubr.msk.f32.vlgmr.msra.gmra.mrb[58].mxu0 %vm433_vm4, %v9389_v3  ;;  %7465 = vmatmul.mubr.msk.f32.vlgmr.msra.gmra.mrb[62].mxu1 %vm433_vm4, %v9389_v3 }
 0xd8b   :  { %7962 = vmatpush3.bf16.msra.mxu0 %v9094_v45  ;;  %7968 = vmatpush3.bf16.msra.mxu1 %v9096_v46 }
 0xd8c   :  { %7963 = vmatprep.subr.bf16.mxu0 %v8355_v16  ;;  %7969 = vmatprep.subr.bf16.mxu1 %v8355_v16 }
 0xd8d   :  { %7475 = vmatprep.mubr.msk.f32.mxu0 %vm8356_vm1, %v8357_v25  ;;  %7486 = vmatprep.mubr.msk.f32.mxu1 %vm8356_vm1, %v8357_v25 }
 0xd8f   :  { %7965 = vmatpush3.bf16.msra.mxu0 %v9116_v20  ;;  %7971 = vmatpush3.bf16.msra.mxu1 %v9118_v32 }
 0xd90   :  { %7972 = vmatprep.subr.bf16.mxu0 %v8355_v16  ;;  %7978 = vmatprep.subr.bf16.mxu1 %v8355_v16 }
 0xd92   :  { %7476 = vmatmul.mubr.msk.f32.vlgmr.msra.gmra.mrb[60].mxu0 %vm433_vm4, %v9389_v3  ;;  %7487 = vmatmul.mubr.msk.f32.vlgmr.msra.gmra.mrb[64].mxu1 %vm433_vm4, %v9389_v3 }
 0xd93   :  { %7974 = vmatpush3.bf16.msra.mxu0 %v9048_v29  ;;  %7980 = vmatpush3.bf16.msra.mxu1 %v9050_v31 }
 0xd94   :  { %7975 = vmatprep.subr.bf16.mxu0 %v8355_v16  ;;  %7981 = vmatprep.subr.bf16.mxu1 %v8355_v16 }
 0xd95   :  { %7497 = vmatprep.mubr.msk.f32.mxu0 %vm8356_vm1, %v8357_v25  ;;  %7508 = vmatprep.mubr.msk.f32.mxu1 %vm8356_vm1, %v8357_v25 }
 0xd97   :  { %7977 = vmatpush3.bf16.msra.mxu0 %v9070_v40  ;;  %7983 = vmatpush3.bf16.msra.mxu1 %v9072_v41 }
 0xd98   :  { %7984 = vmatprep.subr.bf16.mxu0 %v8355_v16  ;;  %7990 = vmatprep.subr.bf16.mxu1 %v8355_v16 }
 0xe5d   :  { %v5179_v14 = vpop.f32.mrb[58].mxu0  ;;  %v5259_v5 = vpop.f32.mrb[62].mxu1 }
 0xe5e   :  { %v5184_v39 = vrot.slane %v5179_v14, 6  ;;  %v5264_v8 = vrot.slane %v5259_v5, 6  ;;  %v7455_v47 = vpop.f32.mrb[59].mxu0  ;;  %v7466_v2 = vpop.f32.mrb[63].mxu1 }
 0xe60   :  { %v5186_v9 = vadd.f32 %v5184_v39, %v9150_v58  ;;  %v5266_v12 = vadd.f32 %v5264_v8, %v9152_v6 }
 0xe62   :  { %v6412_v13 = vmul.f32 -1.442695, %v5186_v9  ;;  %v6414_v1 = vmul.f32 -1.442695, %v5266_v12 }
 0xe64   :  { %8244 = vpow2.f32 %v6412_v13 }
 0xe65   :  { %8246 = vpow2.f32 %v6414_v1  ;;  %v5339_v17 = vpop.f32.mrb[60].mxu0  ;;  %v5414_v19 = vpop.f32.mrb[64].mxu1 }
 0xe66   :  { %v5419_v11 = vrot.slane %v5414_v19, 6  ;;  %v7477_v33 = vpop.f32.mrb[61].mxu0  ;;  %v7488_v36 = vpop.f32.mrb[65].mxu1  ;;  %v5344_v52 = vrot.slane %v5339_v17, 6 }
 0xe68   :  { %v5421_v21 = vadd.f32 %v5419_v11, %v9162_v0  ;;  %v5346_v22 = vadd.f32 %v5344_v52, %v9160_v63 }
 0xe6a   :  { %v6417_v10 = vmul.f32 -1.442695, %v5421_v21 }
 0xe6c   :  { %8248 = vpow2.f32 %v6417_v10 }
 0xe6d   :  { %8250 = vtanh.f32 %v5346_v22 }
 0xe6e   :  { %v8245_v23 = vpop.eup %8244 }
 0xe6f   :  { %v8247_v24 = vpop.eup %8246  ;;  %v5190_v18 = vadd.f32 1.0, %v8245_v23 }
 0xe70   :  { %v5270_v28 = vadd.f32 1.0, %v8247_v24 }
 0xe71   :  { %8252 = vrcp.f32 %v5190_v18 }
 0xe72   :  { %8254 = vrcp.f32 %v5270_v28 }
 0xe76   :  { %v8249_v30 = vpop.eup %8248 }
 0xe77   :  { %v8251_v27 = vpop.eup %8250  ;;  %v5425_v26 = vadd.f32 1.0, %v8249_v30 }
 0xe79   :  { %8256 = vrcp.f32 %v5425_v26 }
 0xe7b   :  { %v8253_v34 = vpop.eup %8252 }
 0xe7c   :  { %v8255_v37 = vpop.eup %8254  ;;  %v5432_v15 = vmul.f32 %v8253_v34, %v8251_v27 }
 0xe7d   :  { %v5431_v42 = vmul.f32 %v8255_v37, %v5429_v35 }
 0xe7f   :  { %v9431_v44 = vadd.f32 %v5432_v15, %v5431_v42 }
 0xe81   :  { %8258 = vtanh.f32 %v9431_v44  ;;  %v5441_v1 = vrot.slane %v9431_v44, 2 }
 0xe83   :  { %v8257_v48 = vpop.eup %8256  ;;  %v9482_v17 = vsel %vm2409_vm11, %v5441_v1, %v9384_v62 }
 0xe84   :  { %v5765_v36 = vrot.slane %v9482_v17, 4 }
 0xe8b   :  { %v8259_v49 = vpop.eup %8258 }
 0xe8c   :  { %v5435_v51 = vmul.f32 %v8259_v49, %v8257_v48 }
 0xe8e   :  { %v5437_v54 = vrot.slane %v5435_v51, 2 }
 0xe90   :  { %v9437_v53 = vsel %vm2409_vm11, %v5437_v54, %v9389_v3  ;;  %v5444_v61 = vsel %vm2409_vm11, %v5437_v54, 0.0 }
 0xe91   :  { %5445 = vst.msk [vmem:[#allocation2 + $0xa] sm:$0x3] %vm750_vm5, %v5444_v61  ;;  %7498 = vmatmul.mubr.msk.f32.vlgmr.msra.gmra.mrb[62].mxu0 %vm433_vm4, %v9437_v53  ;;  %7509 = vmatmul.mubr.msk.f32.vlgmr.msra.gmra.mrb[66].mxu1 %vm433_vm4, %v9437_v53 }
 0xe92   :  { %7986 = vmatpush3.bf16.msra.mxu0 %v9094_v45  ;;  %7992 = vmatpush3.bf16.msra.mxu1 %v9096_v46 }
 0xe93   :  { %7987 = vmatprep.subr.bf16.mxu0 %v8355_v16  ;;  %7993 = vmatprep.subr.bf16.mxu1 %v8355_v16 }
 0xe94   :  { %7519 = vmatprep.mubr.msk.f32.mxu0 %vm8356_vm1, %v8357_v25  ;;  %7530 = vmatprep.mubr.msk.f32.mxu1 %vm8356_vm1, %v8357_v25 }
 0xe96   :  { %7989 = vmatpush3.bf16.msra.mxu0 %v9116_v20  ;;  %7995 = vmatpush3.bf16.msra.mxu1 %v9118_v32 }
 0xe97   :  { %7996 = vmatprep.subr.bf16.mxu0 %v8355_v16  ;;  %8002 = vmatprep.subr.bf16.mxu1 %v8355_v16 }
 0xe99   :  { %7520 = vmatmul.mubr.msk.f32.vlgmr.msra.gmra.mrb[64].mxu0 %vm433_vm4, %v9437_v53  ;;  %7531 = vmatmul.mubr.msk.f32.vlgmr.msra.gmra.mrb[68].mxu1 %vm433_vm4, %v9437_v53 }
 0xe9a   :  { %7998 = vmatpush3.bf16.msra.mxu0 %v9048_v29  ;;  %8004 = vmatpush3.bf16.msra.mxu1 %v9050_v31 }
 0xe9b   :  { %7999 = vmatprep.subr.bf16.mxu0 %v8355_v16  ;;  %8005 = vmatprep.subr.bf16.mxu1 %v8355_v16 }
 0xe9c   :  { %7541 = vmatprep.mubr.msk.f32.mxu0 %vm8356_vm1, %v8357_v25  ;;  %7552 = vmatprep.mubr.msk.f32.mxu1 %vm8356_vm1, %v8357_v25 }
 0xe9e   :  { %8001 = vmatpush3.bf16.msra.mxu0 %v9070_v40  ;;  %8007 = vmatpush3.bf16.msra.mxu1 %v9072_v41 }
 0xe9f   :  { %8008 = vmatprep.subr.bf16.mxu0 %v8355_v16  ;;  %8014 = vmatprep.subr.bf16.mxu1 %v8355_v16 }
 0xf64   :  { %v5515_v29 = vpop.f32.mrb[62].mxu0  ;;  %v5595_v31 = vpop.f32.mrb[66].mxu1 }
 0xf65   :  { %v5520_v56 = vrot.slane %v5515_v29, 4  ;;  %v5600_v57 = vrot.slane %v5595_v31, 4  ;;  %v7499_v59 = vpop.f32.mrb[63].mxu0  ;;  %v7510_v4 = vpop.f32.mrb[67].mxu1 }
 0xf67   :  { %v5522_v60 = vadd.f32 %v5520_v56, %v9150_v58  ;;  %v5602_v55 = vadd.f32 %v5600_v57, %v9152_v6 }
 0xf69   :  { %v6419_v7 = vmul.f32 -1.442695, %v5522_v60  ;;  %v6421_v43 = vmul.f32 -1.442695, %v5602_v55 }
 0xf6b   :  { %8260 = vpow2.f32 %v6419_v7 }
 0xf6c   :  { %8262 = vpow2.f32 %v6421_v43  ;;  %v5675_v40 = vpop.f32.mrb[64].mxu0  ;;  %v5750_v41 = vpop.f32.mrb[68].mxu1 }
 0xf6d   :  { %v5755_v3 = vrot.slane %v5750_v41, 4  ;;  %v7521_v50 = vpop.f32.mrb[65].mxu0  ;;  %v7532_v14 = vpop.f32.mrb[69].mxu1  ;;  %v5680_v5 = vrot.slane %v5675_v40, 4 }
 0xf6f   :  { %v5757_v39 = vadd.f32 %v5755_v3, %v9162_v0  ;;  %v5682_v47 = vadd.f32 %v5680_v5, %v9160_v63 }
 0xf71   :  { %v6424_v8 = vmul.f32 -1.442695, %v5757_v39 }
 0xf73   :  { %8264 = vpow2.f32 %v6424_v8 }
 0xf74   :  { %8266 = vtanh.f32 %v5682_v47 }
 0xf75   :  { %v8261_v2 = vpop.eup %8260 }
 0xf76   :  { %v8263_v9 = vpop.eup %8262  ;;  %v5526_v12 = vadd.f32 1.0, %v8261_v2 }
 0xf77   :  { %v5606_v13 = vadd.f32 1.0, %v8263_v9 }
 0xf78   :  { %8268 = vrcp.f32 %v5526_v12 }
 0xf79   :  { %8270 = vrcp.f32 %v5606_v13 }
 0xf7d   :  { %v8265_v19 = vpop.eup %8264 }
 0xf7e   :  { %v8267_v11 = vpop.eup %8266  ;;  %v5761_v10 = vadd.f32 1.0, %v8265_v19 }
 0xf80   :  { %8272 = vrcp.f32 %v5761_v10 }
 0xf82   :  { %v8269_v33 = vpop.eup %8268 }
 0xf83   :  { %v8271_v52 = vpop.eup %8270  ;;  %v5768_v21 = vmul.f32 %v8269_v33, %v8267_v11 }
 0xf84   :  { %v5767_v22 = vmul.f32 %v8271_v52, %v5765_v36 }
 0xf86   :  { %v9485_v23 = vadd.f32 %v5768_v21, %v5767_v22 }
 0xf88   :  { %8274 = vtanh.f32 %v9485_v23  ;;  %v5777_v43 = vrot.slane %v9485_v23, 4 }
 0xf8a   :  { %v8273_v24 = vpop.eup %8272  ;;  %v5779_v40 = vsel %vm2747_vm12, %v5777_v43, %v9482_v17 }
 0xf8b   :  { %v6101_v50 = vrot.slane %v5779_v40, 2 }
 0xf92   :  { %v8275_v18 = vpop.eup %8274 }
 0xf93   :  { %v5771_v28 = vmul.f32 %v8275_v18, %v8273_v24 }
 0xf95   :  { %v5773_v30 = vrot.slane %v5771_v28, 4 }
 0xf97   :  { %v9491_v62 = vsel %vm2747_vm12, %v5773_v30, %v9437_v53  ;;  %v5780_v27 = vsel %vm2747_vm12, %v5773_v30, 0.0 }
 0xf98   :  { %5781 = vst.msk [vmem:[#allocation2 + $0xc] sm:$0x3] %vm750_vm5, %v5780_v27  ;;  %7542 = vmatmul.mubr.msk.f32.vlgmr.msra.gmra.mrb[66].mxu0 %vm433_vm4, %v9491_v62  ;;  %7553 = vmatmul.mubr.msk.f32.vlgmr.msra.gmra.mrb[70].mxu1 %vm433_vm4, %v9491_v62 }
 0xf99   :  { %8010 = vmatpush3.bf16.msra.mxu0 %v9094_v45  ;;  %8016 = vmatpush3.bf16.msra.mxu1 %v9096_v46  ;;  %v6122_v45 = vld [vmem:[#allocation2] sm:$0xff] }
 0xf9a   :  { %8011 = vmatprep.subr.bf16.mxu0 %v8355_v16  ;;  %8017 = vmatprep.subr.bf16.mxu1 %v8355_v16  ;;  %v6124_v16 = vld [vmem:[%s9596_s8] sm:$0xff] }
 0xf9b   :  { %7563 = vmatprep.mubr.msk.f32.mxu0 %vm8356_vm1, %v8357_v25  ;;  %7574 = vmatprep.mubr.msk.f32.mxu1 %vm8356_vm1, %v8357_v25  ;;  %v6125_v25 = vld [vmem:[%s9596_s8 + $0x8] sm:$0xff] }
 0xf9c   :  { %v8020_v46 = vpack.c.bf16 %v6125_v25, %v6124_v16 }
 0xf9d   :  { %8013 = vmatpush3.bf16.msra.mxu0 %v9116_v20  ;;  %8019 = vmatpush3.bf16.msra.mxu1 %v9118_v32  ;;  %v6126_v20 = vld [vmem:[%s9596_s8 + $0x10] sm:$0xff]  ;;  %v6127_v32 = vld [vmem:[%s9596_s8 + $0x18] sm:$0xff]  ;;  %s8358_s8 = smov [#allocation6]  }
 0xf9e   :  { %8021 = vmatprep.subr.bf16.mxu0 %v8020_v46  ;;  %v8024_v34 = vpack.c.bf16 %v6127_v32, %v6126_v20  ;;  %s6225_s13 = sshll.u32 %s8358_s8, 4  ;;  %s6226_s13 = int_to_ptr.vmem [resolvable:$true] %s6225_s13 }
 0xf9f   :  { %s8304_s1 = scalar_lea.vmem %s6226_s13, 64  ;;  %p8309_p6 = scmp.lt.s32.totalorder %s6226_s13, %s6226_s13 }
 0xfa0   :  { %7564 = vmatmul.mubr.msk.f32.vlgmr.msra.gmra.mrb[68].mxu0 %vm433_vm4, %v9491_v62  ;;  %7575 = vmatmul.mubr.msk.f32.vlgmr.msra.gmra.mrb[72].mxu1 %vm433_vm4, %v9491_v62  ;;  %p8305_p5 = scmp.ne.s32.totalorder %s6226_s13, %s8304_s1  ;;  %p8310_p7 = scmp.lt.s32.totalorder %s8304_s1, %s8304_s1 }
 0xfa1   :  { %7585 = vmatprep.mubr.msk.f32.mxu0 %vm433_vm4, %v6122_v45  ;;  %8023 = vmatpush3.bf16.msra.mxu0 %v8020_v46 }
 0xfa2   :  { %8025 = vmatprep.subr.bf16.mxu0 %v8024_v34  ;;  %p8311_p8 = por %p8310_p7, %p8309_p6 }
 0xfa4   :  { %p8312_p9 = pnand %p8311_p8, %p8305_p5 }
 0xfa5   :  { %8027 = vmatpush3.bf16.msra.mxu0 %v8024_v34 }
0x106b   :  { %v5851_v35 = vpop.f32.mrb[66].mxu0  ;;  %v5931_v37 = vpop.f32.mrb[70].mxu1 }
0x106c   :  { %v5856_v15 = vrot.slane %v5851_v35, 2  ;;  %v5936_v26 = vrot.slane %v5931_v37, 2  ;;  %v7543_v42 = vpop.f32.mrb[67].mxu0  ;;  %v7554_v44 = vpop.f32.mrb[71].mxu1 }
0x106e   :  { %v5858_v48 = vadd.f32 %v5856_v15, %v9150_v58  ;;  %v5938_v49 = vadd.f32 %v5936_v26, %v9152_v6 }
0x1070   :  { %v6426_v51 = vmul.f32 -1.442695, %v5858_v48  ;;  %v6428_v54 = vmul.f32 -1.442695, %v5938_v49 }
0x1072   :  { %8276 = vpow2.f32 %v6426_v51 }
0x1073   :  { %8278 = vpow2.f32 %v6428_v54  ;;  %v6011_v53 = vpop.f32.mrb[68].mxu0  ;;  %v6086_v61 = vpop.f32.mrb[72].mxu1 }
0x1074   :  { %v6091_v29 = vrot.slane %v6086_v61, 2  ;;  %v7565_v31 = vpop.f32.mrb[69].mxu0  ;;  %v7576_v56 = vpop.f32.mrb[73].mxu1  ;;  %v6016_v57 = vrot.slane %v6011_v53, 2 }
0x1076   :  { %v6093_v59 = vadd.f32 %v6091_v29, %v9162_v0  ;;  %v6018_v60 = vadd.f32 %v6016_v57, %v9160_v63 }
0x1078   :  { %v6431_v4 = vmul.f32 -1.442695, %v6093_v59 }
0x107a   :  { %8280 = vpow2.f32 %v6431_v4 }
0x107b   :  { %8282 = vtanh.f32 %v6018_v60 }
0x107c   :  { %v8277_v55 = vpop.eup %8276 }
0x107d   :  { %v8279_v7 = vpop.eup %8278  ;;  %v5862_v58 = vadd.f32 1.0, %v8277_v55 }
0x107e   :  { %v5942_v6 = vadd.f32 1.0, %v8279_v7 }
0x107f   :  { %8284 = vrcp.f32 %v5862_v58 }
0x1080   :  { %8286 = vrcp.f32 %v5942_v6 }
0x1084   :  { %v8281_v41 = vpop.eup %8280 }
0x1085   :  { %v8283_v3 = vpop.eup %8282  ;;  %v6097_v5 = vadd.f32 1.0, %v8281_v41 }
0x1087   :  { %8288 = vrcp.f32 %v6097_v5 }
0x1089   :  { %v8285_v0 = vpop.eup %8284 }
0x108a   :  { %v8287_v14 = vpop.eup %8286  ;;  %v6104_v63 = vmul.f32 %v8285_v0, %v8283_v3 }
0x108b   :  { %v6103_v39 = vmul.f32 %v8287_v14, %v6101_v50 }
0x108d   :  { %v6105_v8 = vadd.f32 %v6104_v63, %v6103_v39 }
0x108f   :  { %8290 = vtanh.f32 %v6105_v8  ;;  %v6113_v47 = vrot.slane %v6105_v8, 6 }
0x1091   :  { %v6115_v2 = vsel %vm3085_vm13, %v6113_v47, %v5779_v40  ;;  %v8289_v9 = vpop.eup %8288 }
0x1092   :  { %6121 = vst.msk [vmem:[#allocation7 + $0x2] sm:$0x3] %vm750_vm5, %v6115_v2 }
0x1099   :  { %v8291_v12 = vpop.eup %8290 }
0x109a   :  { %v6107_v13 = vmul.f32 %v8291_v12, %v8289_v9 }
0x109c   :  { %v6109_v1 = vrot.slane %v6107_v13, 6 }
0x109e   :  { %v6116_v17 = vsel %vm3085_vm13, %v6109_v1, 0.0  ;;  %v6111_v19 = vsel %vm3085_vm13, %v6109_v1, %v9491_v62 }
0x109f   :  { %6117 = vst.msk [vmem:[#allocation2 + $0xe] sm:$0x3] %vm750_vm5, %v6116_v17  ;;  %6119 = vst.msk [vmem:[#allocation6 + $0x2] sm:$0x3] %vm750_vm5, %v6111_v19 }
0x10a6   :  { %v6123_v11 = vld [vmem:[#allocation2 + $0x8] sm:$0xff] }
0x10a7   :  { %7586 = vmatmul.mubr.msk.f32.vlgmr.msra.gmra.mrb[70].mxu0 %vm433_vm4, %v6123_v11 }
0x10a8   :  { %8315 = shalt.err (!%p8312_p9)
}
0x10a9   :  { %s8316_s16 = scalar_lea.hbm %s9599_s11, 64 }
0x10aa   :  { %p8317_p10 = scmp.ne.s32.totalorder %s9599_s11, %s8316_s16  ;;  %p8320_p11 = scmp.lt.u32.totalorder %s8316_s16, %s9599_s11 }
0x10ac   :  { %p8322_p12 = pnand %p8320_p11, %p8317_p10 }
0x10ae   :  { %8325 = shalt.err (!%p8322_p12)
}
0x10af   :  { %s8360_s19 = smov 32   ;;  %s8361_s20 = smov 2  }
0x10b0   :  { %6231 = dma.vmem_to_hbm [thread:$0]  %s6226_s13, 64, %s9599_s11, [#allocation4], %s8360_s19, %s8360_s19, %s8361_s20  }
0x10b1   :  { %s8326_s23 = scalar_lea.vmem %s9546_s2, 64  ;;  %p8331_p0 = scmp.lt.s32.totalorder %s9546_s2, %s9546_s2 }
0x10b2   :  { %p8327_p13 = scmp.ne.s32.totalorder %s9546_s2, %s8326_s23  ;;  %p8332_p1 = scmp.lt.s32.totalorder %s8326_s23, %s8326_s23 }
0x10b4   :  { %p8333_p2 = por %p8332_p1, %p8331_p0 }
0x10b6   :  { %p8334_p3 = pnand %p8333_p2, %p8327_p13 }
0x10b8   :  { %8337 = shalt.err (!%p8334_p3)
}
0x10b9   :  { %s8338_s7 = scalar_lea.hbm %s9600_s12, 64 }
0x10ba   :  { %p8339_p4 = scmp.ne.s32.totalorder %s9600_s12, %s8338_s7  ;;  %p8342_p5 = scmp.lt.u32.totalorder %s8338_s7, %s9600_s12 }
0x10bc   :  { %p8344_p6 = pnand %p8342_p5, %p8339_p4 }
0x10be   :  { %8347 = shalt.err (!%p8344_p6)
}
0x10bf   :  { %6243 = dma.vmem_to_hbm [thread:$0]  %s9546_s2, 64, %s9600_s12, [#allocation8], %s8360_s19, %s8360_s19, %s8361_s20  }
0x10c0   :  { %v6432_v38 = vld [vmem:[%s9597_s9] ss:$0 sm:$0xff] }
0x117a   :  { %v7587_v33 = vpop.f32.mrb[70].mxu0 }
0x117b   :  { %v6213_v36 = vadd.f32 %v7587_v33, %v6432_v38  ;;  %v6207_v52 = vpop.f32.mrb[71].mxu0 }
0x117c   :  { %v6208_v21 = vadd.f32 %v6432_v38, %v6207_v52 }
0x117d   :  { %6217 = vst.msk [vmem:[%s9598_s10 + $0x8] sm:$0xff] %vm74_vm0, %v6213_v36 }
0x117e   :  { %6216 = vst.msk [vmem:[%s9598_s10] sm:$0xff] %vm74_vm0, %v6208_v21 }
0x117f   :  { %8350 = dma.done.wait [#allocation4], 64  }
0x1180   :  { %8351 = vsyncadd [#allocation4], 4294967232 }
0x1181   :  { %8352 = dma.done.wait [#allocation8], 64  }
0x1182   :  { %8353 = vsyncadd [#allocation8], 4294967232 }
0x1183   :  { %6252 = vsyncpa [#allocation4], 1 }
0x1184   :  { %6253 = vsyncpa [#allocation8], 1 }
0x1185   :  { %6254 = vsyncpa [#allocation5], 1 }

</bundles_post_ra>
